<compile_context>
chip_gen: v6e
topology: v6e:2x2x1
jax: 0.10.0
libtpu: 0.0.40
codegen_flags: <defaults>
</compile_context>

<pallas_src>
import jax
import jax.numpy as jnp
from jax.experimental import pallas as pl
from jax.experimental.pallas import tpu as pltpu

# Logical (PyTorch) dims and lane-padded dims.
D_IN, D_H, D_Z = 784, 400, 20
D_IN_P, D_H_P, D_Z_P = 896, 512, 128          # lane-dense (multiples of 128)


def _round_up(a, m):
    return ((a + m - 1) // m) * m


def _pad_to(a, shape):
    pads = [(0, s - d) for d, s in zip(a.shape, shape)]
    return jnp.pad(a, pads)


# ---------------------------------------------------------------------------
# Kernel
# ---------------------------------------------------------------------------
def _vae_kernel(x_ref, eps_ref,
                w1_ref, b1_ref, wh_ref, bh_ref,
                w3_ref, b3_ref, w4_ref, b4_ref,
                recon_ref, muvar_ref):
    cdt = w1_ref.dtype                      # bf16 MXU-input dtype

    # ---- encode: h = relu(x @ W1 + b1) ----
    # x is read f32 and cast to bf16 here (intentional precision trade-off vs f32 torch).
    h = jnp.dot(x_ref[...].astype(cdt), w1_ref[...],
                preferred_element_type=jnp.float32) + b1_ref[...]
    h = jnp.maximum(h, 0.0)

    # ---- fused heads: [mu | logvar] = h @ [W21 | W22] + [b21 | b22] ----
    muvar = jnp.dot(h.astype(cdt), wh_ref[...],
                    preferred_element_type=jnp.float32) + bh_ref[...]
    mu = muvar[:, :D_Z_P]                   # clean 128-lane slices
    logvar = muvar[:, D_Z_P:]

    # ---- reparameterize: z = exp(0.5*logvar) * eps + mu   (eps kept f32) ----
    std = jnp.exp(0.5 * logvar)
    z = std * eps_ref[...] + mu

    # ---- decode ----
    h3 = jnp.dot(z.astype(cdt), w3_ref[...],
                 preferred_element_type=jnp.float32) + b3_ref[...]
    h3 = jnp.maximum(h3, 0.0)
    logits = jnp.dot(h3.astype(cdt), w4_ref[...],
                     preferred_element_type=jnp.float32) + b4_ref[...]

    # sigmoid via tanh: one EUP transcendental, no approximate reciprocal error.
    recon = 0.5 * jnp.tanh(0.5 * logits) + 0.5
    # zero the padded lanes (784..895) so the padded output is safe to consume directly.
    lane = jax.lax.broadcasted_iota(jnp.int32, (1, D_IN_P), 1)
    recon = jnp.where(lane < D_IN, recon, 0.0)

    recon_ref[...] = recon.astype(recon_ref.dtype)
    muvar_ref[...] = muvar.astype(muvar_ref.dtype)


# ---------------------------------------------------------------------------
# One-time parameter preparation (pad + fuse heads + cast to bf16)
# ---------------------------------------------------------------------------
def prepare_params(params, dtype=jnp.bfloat16):
    """Pad to lane-dense shapes, fuse fc21/fc22 into one head, cast weights to bf16.

    Call ONCE at init and reuse the result for every forward call."""
    w1, b1, w21, b21, w22, b22, w3, b3, w4, b4 = params

    # W1 keeps its true K = 784 (multiple of the bf16 sublane pack of 16).
    w1p = _pad_to(w1, (D_IN, D_H_P)).astype(dtype)
    b1p = _pad_to(b1.reshape(1, -1), (1, D_H_P)).astype(jnp.float32)

    wh = jnp.zeros((D_H_P, 2 * D_Z_P), jnp.float32)
    wh = wh.at[:D_H, :D_Z].set(w21).at[:D_H, D_Z_P:D_Z_P + D_Z].set(w22)
    whp = wh.astype(dtype)
    bhp = (jnp.zeros((1, 2 * D_Z_P), jnp.float32)
           .at[0, :D_Z].set(b21).at[0, D_Z_P:D_Z_P + D_Z].set(b22))

    w3p = _pad_to(w3, (D_Z_P, D_H_P)).astype(dtype)
    b3p = _pad_to(b3.reshape(1, -1), (1, D_H_P)).astype(jnp.float32)
    w4p = _pad_to(w4, (D_H_P, D_IN_P)).astype(dtype)
    b4p = _pad_to(b4.reshape(1, -1), (1, D_IN_P)).astype(jnp.float32)

    return (w1p, b1p, whp, bhp, w3p, b3p, w4p, b4p)


# ---------------------------------------------------------------------------
# Wrapper
# ---------------------------------------------------------------------------
def _pick_tb(batch, *, max_tb=512, min_blocks=2):
    """>= 2 parallel grid blocks when the batch allows (dual-TC v7x), capped at max_tb."""
    if batch >= 2 * 8:
        tb = _round_up(pl.cdiv(batch, min_blocks), 8)
    else:
        tb = _round_up(max(batch, 1), 8)
    return int(min(max_tb, tb))


def vae_forward(x, eps, prepared, *, max_tb=512):
    """x: (B, 784) f32, eps: (B, 20) f32, prepared = prepare_params(params).

    Returns padded, lane-dense outputs (slice lazily at the consumer):
      recon_p : (Bp, 896) bf16   (columns >= 784 are zero)
      muvar_p : (Bp, 256) f32    (mu in cols [0, 20), logvar in cols [128, 148))
    """
    B = x.shape[0]
    tb = _pick_tb(B, max_tb=max_tb)
    Bp = _round_up(B, tb)

    if Bp != B:
        x = jnp.pad(x, ((0, Bp - B), (0, 0)))
    # eps stays f32; only lane-padded 20 -> 128 (tiny).
    eps_p = jnp.pad(eps.astype(jnp.float32), ((0, Bp - B), (0, D_Z_P - D_Z)))

    def row_spec(d):
        return pl.BlockSpec((tb, d), lambda i: (i, 0))

    def weight_spec(arr):
        return pl.BlockSpec(arr.shape, lambda i: (0, 0))

    in_specs = [row_spec(D_IN), row_spec(D_Z_P)] + [weight_spec(p) for p in prepared]
    out_specs = [row_spec(D_IN_P), row_spec(2 * D_Z_P)]
    out_shape = [
        jax.ShapeDtypeStruct((Bp, D_IN_P), jnp.bfloat16),      # bf16 recon writeback
        jax.ShapeDtypeStruct((Bp, 2 * D_Z_P), jnp.float32),
    ]

    recon_p, muvar_p = pl.pallas_call(
        _vae_kernel,
        out_shape=out_shape,
        grid_spec=pltpu.PrefetchScalarGridSpec(
            num_scalar_prefetch=0,
            grid=(Bp // tb,),
            in_specs=in_specs,
            out_specs=out_specs,
        ),
        compiler_params=pltpu.CompilerParams(
            dimension_semantics=("parallel",),
            vmem_limit_bytes=32 * 1024 * 1024,
        ),
    )(x, eps_p, *prepared)
    return recon_p, muvar_p


def unpack_outputs(recon_p, muvar_p, batch):
    """Lazy consumer-side slicing back to module shapes/dtypes."""
    recon = recon_p[:batch, :D_IN].astype(jnp.float32)
    mu = muvar_p[:batch, :D_Z]
    logvar = muvar_p[:batch, D_Z_P:D_Z_P + D_Z]
    return recon, mu, logvar


# ---------------------------------------------------------------------------
# Init + references
# ---------------------------------------------------------------------------
def init_params(key):
    """Linear weights stored as (in, out), biases as (out,)."""
    def linear(k, din, dout):
        kw, kb = jax.random.split(k)
        bound = 1.0 / jnp.sqrt(din)
        w = jax.random.uniform(kw, (din, dout), jnp.float32, -bound, bound)
        b = jax.random.uniform(kb, (dout,), jnp.float32, -bound, bound)
        return w, b

    k1, k21, k22, k3, k4 = jax.random.split(key, 5)
    w1, b1 = linear(k1, D_IN, D_H)
    w21, b21 = linear(k21, D_H, D_Z)
    w22, b22 = linear(k22, D_H, D_Z)
    w3, b3 = linear(k3, D_Z, D_H)
    w4, b4 = linear(k4, D_H, D_IN)
    return (w1, b1, w21, b21, w22, b22, w3, b3, w4, b4)


def vae_ref_f32(x, eps, params):
    """Pure-f32 reference (module semantics)."""
    w1, b1, w21, b21, w22, b22, w3, b3, w4, b4 = params
    h = jnp.maximum(x @ w1 + b1, 0.0)
    mu = h @ w21 + b21
    logvar = h @ w22 + b22
    z = jnp.exp(0.5 * logvar) * eps + mu
    h3 = jnp.maximum(z @ w3 + b3, 0.0)
    recon = jax.nn.sigmoid(h3 @ w4 + b4)
    return recon, mu, logvar


def vae_ref_bf16(x, eps, prepared):
    """Pure-JAX mirror of the kernel's padded / bf16 dataflow (apples-to-apples)."""
    w1p, b1p, whp, bhp, w3p, b3p, w4p, b4p = prepared
    cdt = w1p.dtype
    h = jnp.maximum(jnp.dot(x.astype(cdt), w1p, preferred_element_type=jnp.float32) + b1p, 0.0)
    muvar = jnp.dot(h.astype(cdt), whp, preferred_element_type=jnp.float32) + bhp
    mu, logvar = muvar[:, :D_Z_P], muvar[:, D_Z_P:]
    eps_p = jnp.pad(eps.astype(jnp.float32), ((0, 0), (0, D_Z_P - D_Z)))
    z = jnp.exp(0.5 * logvar) * eps_p + mu
    h3 = jnp.maximum(jnp.dot(z.astype(cdt), w3p, preferred_element_type=jnp.float32) + b3p, 0.0)
    logits = jnp.dot(h3.astype(cdt), w4p, preferred_element_type=jnp.float32) + b4p
    recon = jax.nn.sigmoid(logits)
    return recon[:, :D_IN], mu[:, :D_Z], logvar[:, :D_Z]


if __name__ == "__main__":
    key = jax.random.PRNGKey(0)
    kx, keps, kp = jax.random.split(key, 3)

    B = 64
    x = jax.random.uniform(kx, (B, D_IN), jnp.float32)        # flattened 28x28 images
    # TODO(synk): torch.FloatTensor(std.size()).normal_() draws noise inside forward();
    # there is no faithful in-kernel equivalent of torch RNG, so Gaussian noise is drawn
    # deterministically from a JAX key and passed in as `eps`.
    eps = jax.random.normal(keps, (B, D_Z), jnp.float32)

    params = init_params(kp)
    prepared = prepare_params(params)        # once at init — reused for every call

    recon_p, muvar_p = vae_forward(x, eps, prepared)   # grid of 2 "parallel" blocks
    jax.block_until_ready((recon_p, muvar_p))

    recon, mu, logvar = unpack_outputs(recon_p, muvar_p, B)

    # Apples-to-apples check against a pure-JAX mirror of the bf16/padded dataflow.
    recon_m, mu_m, logvar_m = vae_ref_bf16(x, eps, prepared)
    assert jnp.allclose(mu, mu_m, atol=2e-3, rtol=2e-3)
    assert jnp.allclose(logvar, logvar_m, atol=2e-3, rtol=2e-3)
    assert jnp.allclose(recon, recon_m, atol=1e-2, rtol=1e-2)   # bf16 recon quantization

    # Loose check against full-precision module semantics (bf16 matmul rounding only).
    recon_f, mu_f, logvar_f = vae_ref_f32(x, eps, params)
    assert jnp.allclose(mu, mu_f, atol=5e-2, rtol=5e-2)
    assert jnp.allclose(logvar, logvar_f, atol=5e-2, rtol=5e-2)
    assert jnp.allclose(recon, recon_f, atol=5e-2, rtol=5e-2)

    # Padded recon lanes are zeroed in-kernel (safe to consume padded output directly).
    assert jnp.all(recon_p[:, D_IN:] == 0)

    print("KERNEL_OK")
</pallas_src>

<mosaic_0001>
module attributes {stable_mosaic.version = 11 : i64} {
  func.func @_vae_kernel(%arg0: i32, %arg1: memref<32x784xf32, #tpu.memory_space<vmem>>, %arg2: memref<32x128xf32, #tpu.memory_space<vmem>>, %arg3: memref<784x512xbf16, #tpu.memory_space<vmem>>, %arg4: memref<1x512xf32, #tpu.memory_space<vmem>>, %arg5: memref<512x256xbf16, #tpu.memory_space<vmem>>, %arg6: memref<1x256xf32, #tpu.memory_space<vmem>>, %arg7: memref<128x512xbf16, #tpu.memory_space<vmem>>, %arg8: memref<1x512xf32, #tpu.memory_space<vmem>>, %arg9: memref<512x896xbf16, #tpu.memory_space<vmem>>, %arg10: memref<1x896xf32, #tpu.memory_space<vmem>>, %arg11: memref<32x896xbf16, #tpu.memory_space<vmem>>, %arg12: memref<32x256xf32, #tpu.memory_space<vmem>>) attributes {dimension_semantics = [#tpu.dimension_semantics<parallel>], iteration_bounds = array<i64: 2>, scalar_prefetch = 0 : i64, scratch_operands = 0 : i64, tpu.core_type = #tpu.core_type<tc>, window_params = [{transform_indices = @transform_0, window_bounds = array<i64: 32, 784>}, {transform_indices = @transform_1, window_bounds = array<i64: 32, 128>}, {pipeline_mode = #tpu.pipeline_mode<synchronous>, transform_indices = @transform_2, window_bounds = array<i64: 784, 512>}, {pipeline_mode = #tpu.pipeline_mode<synchronous>, transform_indices = @transform_3, window_bounds = array<i64: 1, 512>}, {pipeline_mode = #tpu.pipeline_mode<synchronous>, transform_indices = @transform_4, window_bounds = array<i64: 512, 256>}, {pipeline_mode = #tpu.pipeline_mode<synchronous>, transform_indices = @transform_5, window_bounds = array<i64: 1, 256>}, {pipeline_mode = #tpu.pipeline_mode<synchronous>, transform_indices = @transform_6, window_bounds = array<i64: 128, 512>}, {pipeline_mode = #tpu.pipeline_mode<synchronous>, transform_indices = @transform_7, window_bounds = array<i64: 1, 512>}, {pipeline_mode = #tpu.pipeline_mode<synchronous>, transform_indices = @transform_8, window_bounds = array<i64: 512, 896>}, {pipeline_mode = #tpu.pipeline_mode<synchronous>, transform_indices = @transform_9, window_bounds = array<i64: 1, 896>}, {transform_indices = @transform_10, window_bounds = array<i64: 32, 896>}, {transform_indices = @transform_11, window_bounds = array<i64: 32, 256>}]} {
    %c0 = arith.constant 0 : index
    %c0_0 = arith.constant 0 : index
    %0 = vector.load %arg1[%c0, %c0_0] : memref<32x784xf32, #tpu.memory_space<vmem>>, vector<32x784xf32>
    %1 = arith.truncf %0 : vector<32x784xf32> to vector<32x784xbf16>
    %c0_1 = arith.constant 0 : index
    %c0_2 = arith.constant 0 : index
    %2 = vector.load %arg3[%c0_1, %c0_2] : memref<784x512xbf16, #tpu.memory_space<vmem>>, vector<784x512xbf16>
    %cst = arith.constant dense<0.000000e+00> : vector<32x512xf32>
    %3 = tpu.matmul %1, %2, %cst {dimension_numbers = #tpu.dot_dimension_numbers<[1], [0], [0], [1], [0, 0, 1, 1], [], []>} : vector<32x784xbf16>, vector<784x512xbf16>, vector<32x512xf32> -> vector<32x512xf32>
    %c0_3 = arith.constant 0 : index
    %c0_4 = arith.constant 0 : index
    %4 = vector.load %arg4[%c0_3, %c0_4] : memref<1x512xf32, #tpu.memory_space<vmem>>, vector<1x512xf32>
    %5 = vector.broadcast %4 : vector<1x512xf32> to vector<32x512xf32>
    %6 = arith.addf %3, %5 : vector<32x512xf32>
    %cst_5 = arith.constant 0.000000e+00 : f32
    %7 = vector.broadcast %cst_5 : f32 to vector<32x512xf32>
    %8 = arith.maximumf %6, %7 : vector<32x512xf32>
    %9 = arith.truncf %8 : vector<32x512xf32> to vector<32x512xbf16>
    %c0_6 = arith.constant 0 : index
    %c0_7 = arith.constant 0 : index
    %10 = vector.load %arg5[%c0_6, %c0_7] : memref<512x256xbf16, #tpu.memory_space<vmem>>, vector<512x256xbf16>
    %cst_8 = arith.constant dense<0.000000e+00> : vector<32x256xf32>
    %11 = tpu.matmul %9, %10, %cst_8 {dimension_numbers = #tpu.dot_dimension_numbers<[1], [0], [0], [1], [0, 0, 1, 1], [], []>} : vector<32x512xbf16>, vector<512x256xbf16>, vector<32x256xf32> -> vector<32x256xf32>
    %c0_9 = arith.constant 0 : index
    %c0_10 = arith.constant 0 : index
    %12 = vector.load %arg6[%c0_9, %c0_10] : memref<1x256xf32, #tpu.memory_space<vmem>>, vector<1x256xf32>
    %13 = vector.broadcast %12 : vector<1x256xf32> to vector<32x256xf32>
    %14 = arith.addf %11, %13 : vector<32x256xf32>
    %15 = vector.extract_strided_slice %14 {offsets = [0, 0], sizes = [32, 128], strides = [1, 1]} : vector<32x256xf32> to vector<32x128xf32>
    %16 = vector.extract_strided_slice %14 {offsets = [0, 128], sizes = [32, 128], strides = [1, 1]} : vector<32x256xf32> to vector<32x128xf32>
    %cst_11 = arith.constant 5.000000e-01 : f32
    %17 = vector.broadcast %cst_11 : f32 to vector<32x128xf32>
    %18 = arith.mulf %17, %16 : vector<32x128xf32>
    %19 = math.exp %18 : vector<32x128xf32>
    %c0_12 = arith.constant 0 : index
    %c0_13 = arith.constant 0 : index
    %20 = vector.load %arg2[%c0_12, %c0_13] : memref<32x128xf32, #tpu.memory_space<vmem>>, vector<32x128xf32>
    %21 = arith.mulf %19, %20 : vector<32x128xf32>
    %22 = arith.addf %21, %15 : vector<32x128xf32>
    %23 = arith.truncf %22 : vector<32x128xf32> to vector<32x128xbf16>
    %c0_14 = arith.constant 0 : index
    %c0_15 = arith.constant 0 : index
    %24 = vector.load %arg7[%c0_14, %c0_15] : memref<128x512xbf16, #tpu.memory_space<vmem>>, vector<128x512xbf16>
    %cst_16 = arith.constant dense<0.000000e+00> : vector<32x512xf32>
    %25 = tpu.matmul %23, %24, %cst_16 {dimension_numbers = #tpu.dot_dimension_numbers<[1], [0], [0], [1], [0, 0, 1, 1], [], []>} : vector<32x128xbf16>, vector<128x512xbf16>, vector<32x512xf32> -> vector<32x512xf32>
    %c0_17 = arith.constant 0 : index
    %c0_18 = arith.constant 0 : index
    %26 = vector.load %arg8[%c0_17, %c0_18] : memref<1x512xf32, #tpu.memory_space<vmem>>, vector<1x512xf32>
    %27 = vector.broadcast %26 : vector<1x512xf32> to vector<32x512xf32>
    %28 = arith.addf %25, %27 : vector<32x512xf32>
    %cst_19 = arith.constant 0.000000e+00 : f32
    %29 = vector.broadcast %cst_19 : f32 to vector<32x512xf32>
    %30 = arith.maximumf %28, %29 : vector<32x512xf32>
    %31 = arith.truncf %30 : vector<32x512xf32> to vector<32x512xbf16>
    %c0_20 = arith.constant 0 : index
    %c0_21 = arith.constant 0 : index
    %32 = vector.load %arg9[%c0_20, %c0_21] : memref<512x896xbf16, #tpu.memory_space<vmem>>, vector<512x896xbf16>
    %cst_22 = arith.constant dense<0.000000e+00> : vector<32x896xf32>
    %33 = tpu.matmul %31, %32, %cst_22 {dimension_numbers = #tpu.dot_dimension_numbers<[1], [0], [0], [1], [0, 0, 1, 1], [], []>} : vector<32x512xbf16>, vector<512x896xbf16>, vector<32x896xf32> -> vector<32x896xf32>
    %c0_23 = arith.constant 0 : index
    %c0_24 = arith.constant 0 : index
    %34 = vector.load %arg10[%c0_23, %c0_24] : memref<1x896xf32, #tpu.memory_space<vmem>>, vector<1x896xf32>
    %35 = vector.broadcast %34 : vector<1x896xf32> to vector<32x896xf32>
    %36 = arith.addf %33, %35 : vector<32x896xf32>
    %cst_25 = arith.constant 5.000000e-01 : f32
    %37 = vector.broadcast %cst_25 : f32 to vector<32x896xf32>
    %38 = arith.mulf %37, %36 : vector<32x896xf32>
    %39 = math.tanh %38 : vector<32x896xf32>
    %cst_26 = arith.constant 5.000000e-01 : f32
    %40 = vector.broadcast %cst_26 : f32 to vector<32x896xf32>
    %41 = arith.mulf %40, %39 : vector<32x896xf32>
    %cst_27 = arith.constant 5.000000e-01 : f32
    %42 = vector.broadcast %cst_27 : f32 to vector<32x896xf32>
    %43 = arith.addf %41, %42 : vector<32x896xf32>
    %44 = tpu.iota {dimensions = array<i32: 1>} : vector<1x896xi32>
    %c784_i32 = arith.constant 784 : i32
    %45 = vector.broadcast %c784_i32 : i32 to vector<1x896xi32>
    %46 = arith.cmpi slt, %44, %45 : vector<1x896xi32>
    %cst_28 = arith.constant 0.000000e+00 : f32
    %47 = vector.shape_cast %46 : vector<1x896xi1> to vector<1x896xi1>
    %48 = vector.broadcast %47 : vector<1x896xi1> to vector<32x896xi1>
    %49 = vector.broadcast %cst_28 : f32 to vector<32x896xf32>
    %50 = arith.select %48, %43, %49 : vector<32x896xi1>, vector<32x896xf32>
    %51 = arith.truncf %50 : vector<32x896xf32> to vector<32x896xbf16>
    %c0_29 = arith.constant 0 : index
    %c0_30 = arith.constant 0 : index
    %52 = vector.load %arg11[%c0_29, %c0_30] : memref<32x896xbf16, #tpu.memory_space<vmem>>, vector<32x896xbf16>
    tpu.vector_store %arg11[%c0_29, %c0_30], %51 {strides = array<i32>} : memref<32x896xbf16, #tpu.memory_space<vmem>>, vector<32x896xbf16>,
    %c0_31 = arith.constant 0 : index
    %c0_32 = arith.constant 0 : index
    %53 = vector.load %arg12[%c0_31, %c0_32] : memref<32x256xf32, #tpu.memory_space<vmem>>, vector<32x256xf32>
    tpu.vector_store %arg12[%c0_31, %c0_32], %14 {strides = array<i32>} : memref<32x256xf32, #tpu.memory_space<vmem>>, vector<32x256xf32>,
    return
  }
  func.func @transform_0(%arg0: i32) -> (i32, i32) {
    %c0_i32 = arith.constant 0 : i32
    %c0_i32_0 = arith.constant 0 : i32
    return %arg0, %c0_i32 : i32, i32
  }
  func.func @transform_1(%arg0: i32) -> (i32, i32) {
    %c0_i32 = arith.constant 0 : i32
    %c0_i32_0 = arith.constant 0 : i32
    return %arg0, %c0_i32 : i32, i32
  }
  func.func @transform_2(%arg0: i32) -> (i32, i32) {
    %c0_i32 = arith.constant 0 : i32
    %c0_i32_0 = arith.constant 0 : i32
    %c0_i32_1 = arith.constant 0 : i32
    return %c0_i32, %c0_i32_0 : i32, i32
  }
  func.func @transform_3(%arg0: i32) -> (i32, i32) {
    %c0_i32 = arith.constant 0 : i32
    %c0_i32_0 = arith.constant 0 : i32
    %c0_i32_1 = arith.constant 0 : i32
    return %c0_i32, %c0_i32_0 : i32, i32
  }
  func.func @transform_4(%arg0: i32) -> (i32, i32) {
    %c0_i32 = arith.constant 0 : i32
    %c0_i32_0 = arith.constant 0 : i32
    %c0_i32_1 = arith.constant 0 : i32
    return %c0_i32, %c0_i32_0 : i32, i32
  }
  func.func @transform_5(%arg0: i32) -> (i32, i32) {
    %c0_i32 = arith.constant 0 : i32
    %c0_i32_0 = arith.constant 0 : i32
    %c0_i32_1 = arith.constant 0 : i32
    return %c0_i32, %c0_i32_0 : i32, i32
  }
  func.func @transform_6(%arg0: i32) -> (i32, i32) {
    %c0_i32 = arith.constant 0 : i32
    %c0_i32_0 = arith.constant 0 : i32
    %c0_i32_1 = arith.constant 0 : i32
    return %c0_i32, %c0_i32_0 : i32, i32
  }
  func.func @transform_7(%arg0: i32) -> (i32, i32) {
    %c0_i32 = arith.constant 0 : i32
    %c0_i32_0 = arith.constant 0 : i32
    %c0_i32_1 = arith.constant 0 : i32
    return %c0_i32, %c0_i32_0 : i32, i32
  }
  func.func @transform_8(%arg0: i32) -> (i32, i32) {
    %c0_i32 = arith.constant 0 : i32
    %c0_i32_0 = arith.constant 0 : i32
    %c0_i32_1 = arith.constant 0 : i32
    return %c0_i32, %c0_i32_0 : i32, i32
  }
  func.func @transform_9(%arg0: i32) -> (i32, i32) {
    %c0_i32 = arith.constant 0 : i32
    %c0_i32_0 = arith.constant 0 : i32
    %c0_i32_1 = arith.constant 0 : i32
    return %c0_i32, %c0_i32_0 : i32, i32
  }
  func.func @transform_10(%arg0: i32) -> (i32, i32) {
    %c0_i32 = arith.constant 0 : i32
    %c0_i32_0 = arith.constant 0 : i32
    return %arg0, %c0_i32 : i32, i32
  }
  func.func @transform_11(%arg0: i32) -> (i32, i32) {
    %c0_i32 = arith.constant 0 : i32
    %c0_i32_0 = arith.constant 0 : i32
    return %arg0, %c0_i32 : i32, i32
  }
}

</mosaic_0001>

<bundles_post_ra>
// kernel: tpu_custom_call.1
= control target key start
LH: loop header
LB: loop body
LE: loop exit
PB: predicated region body
PF: predicated region fallthrough
CT: control target
= control target key end

     0   :  { %s7984_s0 = inlined_call_operand.hbm [shape: f32[64,784], index: 0, kind: input, shape index: {}]   ;;  %s7985_s1 = inlined_call_operand.hbm [shape: f32[64,128], index: 1, kind: input, shape index: {}]   ;;  %s7986_s2 = inlined_call_operand.hbm [shape: bf16[784,512], index: 2, kind: input, shape index: {}]   ;;  %s7987_s3 = inlined_call_operand.vmem [shape: f32[1,512], index: 3, kind: input, shape index: {}]   ;;  %s7988_s4 = inlined_call_operand.hbm [shape: bf16[512,256], index: 4, kind: input, shape index: {}]   ;;  %s7989_s5 = inlined_call_operand.vmem [shape: f32[1,256], index: 5, kind: input, shape index: {}]   ;;  %s7990_s6 = inlined_call_operand.hbm [shape: bf16[128,512], index: 6, kind: input, shape index: {}]   ;;  %s7991_s7 = inlined_call_operand.hbm [shape: f32[1,512], index: 7, kind: input, shape index: {}]   ;;  %s7992_s8 = inlined_call_operand.hbm [shape: bf16[512,896], index: 8, kind: input, shape index: {}]   ;;  %s7993_s9 = inlined_call_operand.vmem [shape: f32[1,896], index: 9, kind: input, shape index: {}]   ;;  %s7994_s10 = inlined_call_operand.hbm [shape: bf16[64,896], index: 10, kind: output, shape index: {0}]   ;;  %s7995_s11 = inlined_call_operand.hbm [shape: f32[64,256], index: 11, kind: output, shape index: {1}]  }
   0x1   :  { %8004 = sst [smem:[#allocation27_spill]] %s7984_s0 }
   0x2   :  { %8005 = sst [smem:[#allocation28_spill]] %s7986_s2 }
   0x3   :  { %8006 = sst [smem:[#allocation29_spill]] %s7988_s4 }
   0x4   :  { %8007 = sst [smem:[#allocation30_spill]] %s7990_s6 }
   0x5   :  { %8008 = sst [smem:[#allocation31_spill]] %s7991_s7 }
   0x6   :  { %8009 = sst [smem:[#allocation32_spill]] %s7992_s8 }
   0x7   :  { %17 = vsyncpa [#allocation3], 0 }
   0x8   :  { %19 = vsyncpa [#allocation3 + $0x1], 0 }
   0x9   :  { %20 = vsyncpa [#allocation6], 0 }
   0xa   :  { %22 = vsyncpa [#allocation6 + $0x1], 0 }
   0xb   :  { %23 = vsyncpa [#allocation9], 0 }
   0xc   :  { %24 = vsyncpa [#allocation12], 0 }
   0xd   :  { %25 = vsyncpa [#allocation4], 0 }
   0xe   :  { %27 = vsyncpa [#allocation4 + $0x1], 0 }
   0xf   :  { %28 = vsyncpa [#allocation16], 0 }
  0x10   :  { %30 = vsyncpa [#allocation16 + $0x1], 0  ;;  %s7422_s17 = smov 0   ;;  %s7424_s18 = smov 0  }
  0x11   :  { %s7426_s19 = smov 0   ;;  %s7428_s20 = smov 0  }
  0x12 LB: > { %8010 = sst [smem:[#allocation24_spill]] %s7334_s19  ;;  %s7340_s21 = smov [#allocation7]   ;;  %s7338_s20 = sphi %s7428_s20, %s8038_s20   ;;  %s7334_s19 = sphi %s7426_s19, %s8040_s19   ;;  %s7330_s18 = sphi %s7424_s18, %s8042_s18   ;;  %s7326_s17 = sphi %s7422_s17, %s8041_s17  }
  0x13   : > { %s325_s22 = sshll.u32 %s7340_s21, 4  ;;  %s7443_s23 = sadd.s32 4294967295, %s7338_s20   ;;  %s326_s22 = int_to_ptr.vmem [resolvable:$true] %s325_s22 }
  0x14   : > { %p5454_p0 = scmp.ge.s32.totalorder %s7338_s20, 1  ;;  %p7998_p1 = scmp.eq.s32.totalorder %s7443_s23, 0 }
  0x15   : > { %p313_p2 = scmp.lt.s32.totalorder %s7338_s20, 3  ;;  %s7341_s25 = smov [#allocation8]  }
  0x16   : > { %s341_s26 = sshll.u32 %s7341_s25, 4  ;;  %s7342_s28 = smov [#allocation11]   ;;  %s7461_s26 = int_to_ptr.vmem [resolvable:$true] %s341_s26 }
  0x17   : > { %p7448_p3 = pnand %p5454_p0, %p313_p2  ;;  %s7463_s29 = sshll.u32 %s7342_s28, 4  ;;  %s372_s29 = int_to_ptr.vmem [resolvable:$true] %s7463_s29 }
  0x18   : > { %s7053_s12 = scalar_lea.vmem %s326_s22, 25088  ;;  %p7061_p11 = scmp.lt.s32.totalorder %s326_s22, %s326_s22 }
  0x19   : > { %p6128_p5 = pneg %p7448_p3  ;;  %p7054_p8 = scmp.ne.s32.totalorder %s326_s22, %s7053_s12 }
  0x1a   : > { %p7062_p12 = scmp.lt.s32.totalorder %s7053_s12, %s7053_s12 }
  0x1b   : > { %p7457_p6 = pnand %p6128_p5, %p7998_p1 }
  0x1c   : > { %p7063_p13 = por %p7062_p12, %p7061_p11 }
  0x1d   : > { %p7467_p7 = pneg %p7457_p6 }
  0x1f   : > { %p7056_p9 = pnand %p7054_p8, %p7467_p7 }
  0x21   : > { %p7057_p10 = pneg %p7056_p9 }
  0x23   : > { %p7064_p0 = pnand %p7063_p13, %p7057_p10 }
  0x25   : > { %7067 = shalt.err (!%p7064_p0)
}
  0x26   : > { %s7343_s13 = smov 256   ;;  %s7344_s14 = smov 16  }
  0x27   : > { %s8014_s2 = sld [smem:[#allocation28_spill]]  ;;  %s7079_s21 = scalar_lea.vmem %s7461_s26, 8192 }
  0x28   : > { %p7080_p2 = scmp.ne.s32.totalorder %s7461_s26, %s7079_s21  ;;  %p7087_p9 = scmp.lt.s32.totalorder %s7461_s26, %s7461_s26 }
  0x29   : > { %p7088_p10 = scmp.lt.s32.totalorder %s7079_s21, %s7079_s21 }
  0x2a   : > { %p7082_p5 = pnand %p7080_p2, %p7467_p7 }
  0x2b   : > { %p7089_p11 = por %p7088_p10, %p7087_p9 }
  0x2c   : > { %p7083_p8 = pneg %p7082_p5 }
  0x2d   : > { %6131 = dma.hbm_to_vmem [thread:$0]  (!%p7457_p6), %s8014_s2, 25088, %s326_s22, [#allocation6], %s7343_s13, %s7343_s13, %s7344_s14  }
  0x2e   : > { %p7090_p12 = pnand %p7089_p11, %p7083_p8 }
  0x30   : > { %7093 = shalt.err (!%p7090_p12)
}
  0x31   : > { %s7996_s25 = smov 128   ;;  %s7997_s28 = smov 8  }
  0x32   : > { %s8015_s4 = sld [smem:[#allocation29_spill]]  ;;  %s7105_s15 = scalar_lea.vmem %s372_s29, 64 }
  0x33   : > { %p7106_p13 = scmp.ne.s32.totalorder %s372_s29, %s7105_s15  ;;  %p7113_p5 = scmp.lt.s32.totalorder %s372_s29, %s372_s29 }
  0x34   : > { %p7114_p8 = scmp.lt.s32.totalorder %s7105_s15, %s7105_s15 }
  0x35   : > { %p7108_p0 = pnand %p7106_p13, %p7467_p7 }
  0x36   : > { %p7115_p9 = por %p7114_p8, %p7113_p5 }
  0x37   : > { %p7109_p2 = pneg %p7108_p0 }
  0x38   : > { %6134 = dma.hbm_to_vmem [thread:$0]  (!%p7457_p6), %s8015_s4, 8192, %s7461_s26, [#allocation9], %s7996_s25, %s7996_s25, %s7997_s28  }
  0x39   : > { %p7116_p10 = pnand %p7115_p9, %p7109_p2 }
  0x3b   : > { %7119 = shalt.err (!%p7116_p10)
}
  0x3c   : > { %s8016_s7 = sld [smem:[#allocation31_spill]]  ;;  %s7347_s22 = smov [#allocation10]  }
  0x3d   : > { %s357_s26 = sshll.u32 %s7347_s22, 4  ;;  %s7348_s12 = smov [#allocation13]   ;;  %s358_s26 = int_to_ptr.vmem [resolvable:$true] %s357_s26 }
  0x3e   : > { %s381_s25 = sshll.u32 %s7348_s12, 4  ;;  %s7131_s28 = scalar_lea.vmem %s358_s26, 4096  ;;  %s382_s25 = int_to_ptr.vmem [resolvable:$true] %s381_s25 }
  0x3f   : > { %p7132_p11 = scmp.ne.s32.totalorder %s358_s26, %s7131_s28  ;;  %p7139_p0 = scmp.lt.s32.totalorder %s358_s26, %s358_s26 }
  0x40   : > { %p7140_p2 = scmp.lt.s32.totalorder %s7131_s28, %s7131_s28 }
  0x41   : > { %p7134_p12 = pnand %p7132_p11, %p7467_p7 }
  0x42   : > { %6140 = dma.hbm_to_vmem [thread:$0]  (!%p7457_p6), %s8016_s7, 64, %s372_s29, [#allocation12]  }
  0x43   : > { %p7135_p13 = pneg %p7134_p12  ;;  %p7141_p5 = por %p7140_p2, %p7139_p0 }
  0x45   : > { %p7142_p8 = pnand %p7141_p5, %p7135_p13 }
  0x47   : > { %7145 = shalt.err (!%p7142_p8)
}
  0x48   : > { %s8017_s6 = sld [smem:[#allocation30_spill]]  ;;  %s7157_s16 = scalar_lea.vmem %s382_s25, 28672 }
  0x49   : > { %p7158_p9 = scmp.ne.s32.totalorder %s382_s25, %s7157_s16  ;;  %p7165_p12 = scmp.lt.s32.totalorder %s382_s25, %s382_s25 }
  0x4a   : > { %p7166_p0 = scmp.lt.s32.totalorder %s7157_s16, %s7157_s16 }
  0x4b   : > { %p7160_p10 = pnand %p7158_p9, %p7467_p7 }
  0x4c   : > { %p7167_p13 = por %p7166_p0, %p7165_p12 }
  0x4d   : > { %p7161_p11 = pneg %p7160_p10 }
  0x4e   : > { %6137 = dma.hbm_to_vmem [thread:$0]  (!%p7457_p6), %s8017_s6, 4096, %s358_s26, [#allocation9], %s7343_s13, %s7343_s13, %s7344_s14  }
  0x4f   : > { %p7168_p2 = pnand %p7167_p13, %p7161_p11 }
  0x51   : > { %7171 = shalt.err (!%p7168_p2)
}
  0x52   : > { %s7349_s28 = smov 448   ;;  %s7350_s30 = smov 28  }
  0x53   : > { %s8018_s8 = sld [smem:[#allocation32_spill]]  ;;  %s5453_s21 = sadd.s32 4294967294, %s7338_s20  }
  0x54   : > { %s7523_s22 = sadd.s32 1, %s7338_s20   ;;  %s43_s26 = sadd.s32 1, %s7334_s19 }
  0x55   : > { %8019 = sst [smem:[#allocation25_spill]] %s7523_s22  ;;  %s40_s12 = ssub.s32 %s7338_s20, %s7523_s22 }
  0x56   : > { %p50_p7 = scmp.ne.s32.totalorder %s7334_s19, %s7330_s18  ;;  %p41_p5 = scmp.eq.s32.totalorder %s40_s12, 0 }
  0x57   : > { %p51_p8 = scmp.eq.s32.totalorder %s7338_s20, 0  ;;  %p56_p9 = scmp.ne.s32.totalorder %s7330_s18, %s7326_s17 }
  0x58   : > { %p274_p10 = scmp.eq.s32.totalorder %s7443_s23, 1  ;;  %p280_p0 = scmp.eq.s32.totalorder %s5453_s21, 1 }
  0x59   : > { %6143 = dma.hbm_to_vmem [thread:$0]  (!%p7457_p6), %s8018_s8, 28672, %s382_s25, [#allocation12], %s7349_s28, %s7349_s28, %s7350_s30  }
  0x5a   : > { %s7535_s29 = scalar_select %p41_p5, %s7334_s19, %s43_s26  }
  0x5b   : > { %p52_p11 = por %p51_p8, %p50_p7  ;;  %p7539_p12 = por %p7998_p1, %p56_p9 }
  0x5c   : > { %8020 = sst [smem:[#allocation26_spill]] %s7535_s29  ;;  %p7543_p6 = por %p274_p10, %p50_p7 }
  0x5d   : > { %s8021_s27 = scalar_select %p7539_p12, 1, 0 }
  0x5e   : > { %s8022_s25 = scalar_select %p7543_p6, 1, 0 }
  0x5f   : > { %p6163_p13 = scmp.lt.s32.totalorder %s7338_s20, 2  ;;  %s7549_s15 = sand.u32 1, %s7334_s19  }
  0x60   : > { %p7551_p2 = por %p280_p0, %p56_p9  ;;  %s6095_s28 = smul.u32 224, %s7549_s15 }
  0x61   : > { %p7556_p5 = pnand %p6163_p13, %p52_p11  ;;  %s6096_s13 = smul.u32 3584, %s7338_s20 }
  0x62   : > { %s8023_s16 = scalar_select %p7551_p2, 1, 0 }
  0x63   : > { %s8025_s0 = sld [smem:[#allocation27_spill]]  ;;  %s402_s12 = scalar_lea.vmem [#allocation2], %s6095_s28 }
  0x64   : > { %s410_s2 = sshll.u32 %s402_s12, 4  ;;  %s399_s4 = scalar_lea.sflag [#allocation3], %s7549_s15  ;;  %s7566_s2 = int_to_ptr.vmem [resolvable:$true] %s410_s2 }
  0x65   : > { %p7174_p8 = pneg %p7556_p5 }
  0x69   : > { %s7564_s21 = scalar_lea.hbm %s8025_s0, %s6096_s13  ;;  %s7177_s13 = scalar_lea.hbm %s8025_s0, 7168 }
  0x6a   : > { %s7172_s6 = scalar_lea.hbm %s7564_s21, 3584  ;;  %p7178_p11 = scmp.lt.s32.totalorder %s7564_s21, %s8025_s0 }
  0x6b   : > { %p7173_p7 = scmp.ne.s32.totalorder %s7564_s21, %s7172_s6  ;;  %p7179_p0 = scmp.lt.s32.totalorder %s7177_s13, %s7172_s6 }
  0x6d   : > { %p7175_p9 = pnand %p7174_p8, %p7173_p7  ;;  %p7180_p13 = por %p7179_p0, %p7178_p11 }
  0x6f   : > { %p7176_p10 = pneg %p7175_p9 }
  0x71   : > { %p7181_p4 = pnand %p7180_p13, %p7176_p10 }
  0x73   : > { %7184 = shalt.err (!%p7181_p4)
}
  0x74   : > { %s7185_s28 = scalar_lea.vmem %s7566_s2, 3584  ;;  %s7351_s7 = smov [#allocation2]  }
  0x75   : > { %p7186_p1 = scmp.ne.s32.totalorder %s7566_s2, %s7185_s28  ;;  %s7190_s12 = sshll.u32 %s7351_s7, 4  ;;  %s7191_s12 = int_to_ptr.vmem [resolvable:$false] %s7190_s12 }
  0x76   : > { %s7192_s14 = scalar_lea.vmem %s7191_s12, 7168  ;;  %p7193_p2 = scmp.lt.s32.totalorder %s7566_s2, %s7191_s12 }
  0x77   : > { %p7188_p7 = pnand %p7186_p1, %p7174_p8  ;;  %p7194_p6 = scmp.lt.s32.totalorder %s7192_s14, %s7185_s28 }
  0x79   : > { %p7189_p9 = pneg %p7188_p7  ;;  %p7195_p12 = por %p7194_p6, %p7193_p2 }
  0x7b   : > { %p7196_p11 = pnand %p7195_p12, %p7189_p9 }
  0x7d   : > { %7199 = shalt.err (!%p7196_p11)
}
  0x7e   : > { %s7352_s6 = smov 896   ;;  %s7353_s8 = smov 56  }
  0x7f   : > { %6147 = dma.hbm_to_vmem [thread:$0]  (!%p7556_p5), %s7564_s21, 3584, %s7566_s2, %s399_s4, %s7352_s6, %s7352_s6, %s7353_s8  }
  0x80   : > { %s420_s13 = sand.u32 1, %s7338_s20   ;;  %s5464_s26 = sshll.u32 %s7549_s15, 5 }
  0x81   : > { %s6020_s7 = sshll.u32 %s7338_s20, 9  ;;  %s424_s28 = scalar_lea.vmem [#allocation5], %s5464_s26 }
  0x82   : > { %s431_s12 = sshll.u32 %s424_s28, 4  ;;  %s7601_s29 = scalar_lea.hbm %s7985_s1, %s6020_s7  ;;  %s7603_s12 = int_to_ptr.vmem [resolvable:$true] %s431_s12 }
  0x83   : > { %s421_s19 = scalar_lea.sflag [#allocation6], %s420_s13  ;;  %s7200_s22 = scalar_lea.hbm %s7601_s29, 512 }
  0x84   : > { %p7201_p1 = scmp.ne.s32.totalorder %s7601_s29, %s7200_s22  ;;  %s7205_s15 = scalar_lea.hbm %s7985_s1, 1024 }
  0x85   : > { %p7206_p6 = scmp.lt.s32.totalorder %s7601_s29, %s7985_s1  ;;  %p7207_p2 = scmp.lt.s32.totalorder %s7205_s15, %s7200_s22 }
  0x86   : > { %p7203_p4 = pnand %p7201_p1, %p7174_p8 }
  0x87   : > { %p7208_p10 = por %p7207_p2, %p7206_p6 }
  0x88   : > { %p7204_p12 = pneg %p7203_p4 }
  0x8a   : > { %p7209_p0 = pnand %p7208_p10, %p7204_p12 }
  0x8c   : > { %7212 = shalt.err (!%p7209_p0)
}
  0x8d   : > { %s7213_s6 = scalar_lea.vmem %s7603_s12, 512  ;;  %s7354_s8 = smov [#allocation5]  }
  0x8e   : > { %p7214_p13 = scmp.ne.s32.totalorder %s7603_s12, %s7213_s6  ;;  %s7218_s13 = sshll.u32 %s7354_s8, 4  ;;  %s7219_s13 = int_to_ptr.vmem [resolvable:$false] %s7218_s13 }
  0x8f   : > { %s7220_s26 = scalar_lea.vmem %s7219_s13, 1024  ;;  %p7221_p11 = scmp.lt.s32.totalorder %s7603_s12, %s7219_s13 }
  0x90   : > { %p7216_p7 = pnand %p7214_p13, %p7174_p8  ;;  %p7222_p1 = scmp.lt.s32.totalorder %s7220_s26, %s7213_s6 }
  0x92   : > { %p7217_p9 = pneg %p7216_p7  ;;  %p7223_p4 = por %p7222_p1, %p7221_p11 }
  0x94   : > { %p7224_p6 = pnand %p7223_p4, %p7217_p9 }
  0x96   : > { %7227 = shalt.err (!%p7224_p6)
}
  0x97   : > { %s8026_s22 = smov 8   ;;  %s8027_s7 = smov 128  }
  0x98   : > { %6150 = dma.hbm_to_vmem [thread:$0]  (!%p7556_p5), %s7601_s29, 512, %s7603_s12, %s421_s19, %s8027_s7, %s8027_s7, %s8026_s22  }
  0x99   : > { %443 = sbr.rel (%p7448_p3) target bundleno = 1433 (0x599), region = 60  ;;  %s7633_s28 = sand.u32 (!%p7448_p3), 1, %s7330_s18  }
  0x9a   : > { %s6097_s14 = smul.u32 (!%p7448_p3), 224, %s7633_s28  ;;  %s446_s2 = scalar_lea.sflag (!%p7448_p3), [#allocation3], %s7633_s28 }
  0x9b   : > { %p8028_p8 = scmp.ne.s32.totalorder (!%p7448_p3), %s8021_s27, 0 }
  0x9c   : > { %s7637_s4 = scalar_lea.vmem (!%p7448_p3), [#allocation2], %s6097_s14 }
  0x9e   : > { %7297 = dma.done.wait (%p8028_p8), %s446_s2, 3584  }
  0x9f   : > { %7299 = vsyncadd (%p8028_p8), %s446_s2, 4294963712  ;;  %s454_s19 = sand.u32 1, %s7443_s23   ;;  %s5468_s24 = sshll.u32 %s7633_s28, 5 }
  0xa0   : > { %s455_s29 = scalar_lea.sflag [#allocation6], %s454_s19  ;;  %s7645_s30 = scalar_lea.vmem [#allocation5], %s5468_s24 }
  0xa1   : > { %7301 = dma.done.wait (%p8028_p8), %s455_s29, 512  }
  0xa2   : > { %7303 = vsyncadd (%p8028_p8), %s455_s29, 4294966784  ;;  %p8029_p3 = scmp.eq.s32.totalorder %s7443_s23, 0 }
  0xa4   : > { %7305 = dma.done.wait (%p8029_p3), [#allocation6], 25088   ;;  %p8030_p5 = pmov %p8029_p3 }
  0xa5   : > { %p8031_p12 = pmov %p8029_p3 }
  0xa6   : > { %7307 = vsyncadd (%p8030_p5), [#allocation6], 4294942208 }
  0xa7   : > { %7309 = dma.done.wait (%p8031_p12), [#allocation9], 12288   ;;  %p8032_p2 = pmov %p8029_p3 }
  0xa9   : > { %7311 = vsyncadd (%p8032_p2), [#allocation9], 4294955008  ;;  %p8033_p10 = pmov %p8032_p2 }
  0xaa   : > { %p8034_p0 = pmov %p8032_p2 }
  0xab   : > { %7313 = dma.done.wait (%p8033_p10), [#allocation12], 28736  }
  0xac   : > { %7315 = vsyncadd (%p8034_p0), [#allocation12], 4294938560  ;;  %v6220_v0 = vld [vmem:[#allocation7 + $0xe4] ss:$16 sps:$4 sm:$0xff]   ;;  %v6224_v2 = vld [vmem:[#allocation7 + $0xe0] ss:$16 sps:$4 sm:$0xff]  }
  0xad   : > { %v6222_v1 = vld [vmem:[#allocation7 + $0x2e4] ss:$16 sps:$4 sm:$0xff]   ;;  %1779 = vmatprep.subr.bf16.mxu0 %v6220_v0  ;;  %v6225_v3 = vld [vmem:[#allocation7 + $0x2e0] ss:$16 sps:$4 sm:$0xff]   ;;  %v533_v46 = vld [vmem:[%s7637_s4 + $0x8] sm:$0xff]  ;;  %vm1772_vm0 = vcmask 130048  }
  0xae   : > { %1832 = vmatprep.subr.bf16.mxu1 %v6222_v1  ;;  %v6226_v4 = vld [vmem:[#allocation7 + $0xc4] ss:$16 sps:$4 sm:$0xff]   ;;  %1780 = vmatpush1.bf16.msra.mxu0 %v6224_v2  ;;  %v6230_v6 = vld [vmem:[#allocation7 + $0xc0] ss:$16 sps:$4 sm:$0xff]   ;;  %v535_v48 = vld [vmem:[%s7637_s4 + $0x18] sm:$0xff]  ;;  %s5474_s0 = sshll.u32 %s7633_s28, 6 }
  0xaf   : > { %1833 = vmatpush1.bf16.msra.mxu1 %v6225_v3  ;;  %v6228_v5 = vld [vmem:[#allocation7 + $0x2c4] ss:$16 sps:$4 sm:$0xff]   ;;  %1781 = vmatprep.subr.bf16.mxu0 %v6226_v4  ;;  %v6231_v7 = vld [vmem:[#allocation7 + $0x2c0] ss:$16 sps:$4 sm:$0xff]   ;;  %s7791_s6 = scalar_lea.vmem [#allocation15], %s5474_s0  ;;  %s6098_s26 = smul.u32 112, %s7633_s28 }
  0xb0   : > { %1834 = vmatprep.subr.bf16.mxu1 %v6228_v5  ;;  %v6232_v8 = vld [vmem:[#allocation7 + $0xa4] ss:$16 sps:$4 sm:$0xff]   ;;  %v6236_v10 = vld [vmem:[#allocation7 + $0xa0] ss:$16 sps:$4 sm:$0xff]   ;;  %s5278_s7 = sshll.u32 %s7791_s6, 4  ;;  %s6038_s14 = sshll.u32 %s7443_s23, 10  ;;  %s7881_s7 = int_to_ptr.vmem [resolvable:$true] %s5278_s7 }
  0xb1   : > { %v6234_v9 = vld [vmem:[#allocation7 + $0x2a4] ss:$16 sps:$4 sm:$0xff]   ;;  %v6237_v11 = vld [vmem:[#allocation7 + $0x2a0] ss:$16 sps:$4 sm:$0xff]   ;;  %s7869_s22 = scalar_lea.vmem [#allocation14], %s6098_s26  ;;  %s7886_s19 = scalar_lea.hbm %s7995_s11, %s6038_s14 }
  0xb2   : > { %1782 = vmatpush1.bf16.msra.mxu0 %v6230_v6  ;;  %v6238_v12 = vld [vmem:[#allocation7 + $0x84] ss:$16 sps:$4 sm:$0xff]   ;;  %v6242_v14 = vld [vmem:[#allocation7 + $0x80] ss:$16 sps:$4 sm:$0xff]   ;;  %s5247_s24 = scalar_lea.sflag [#allocation16], %s7633_s28  ;;  %s7228_s29 = scalar_lea.vmem %s7881_s7, 1024 }
  0xb3   : > { %1835 = vmatpush1.bf16.msra.mxu1 %v6231_v7  ;;  %1783 = vmatprep.subr.bf16.mxu0 %v6232_v8  ;;  %v6240_v13 = vld [vmem:[#allocation7 + $0x284] ss:$16 sps:$4 sm:$0xff]   ;;  %v6243_v15 = vld [vmem:[#allocation7 + $0x280] ss:$16 sps:$4 sm:$0xff]   ;;  %v539_v7 = vld [vmem:[%s7637_s4 + $0x38] sm:$0xff]  ;;  %p7229_p13 = scmp.ne.s32.totalorder %s7881_s7, %s7228_s29  ;;  %p8035_p7 = scmp.ne.s32.totalorder %s8022_s25, 0 }
  0xb4   : > { %1836 = vmatprep.subr.bf16.mxu1 %v6234_v9  ;;  %v6244_v16 = vld [vmem:[#allocation7 + $0x64] ss:$16 sps:$4 sm:$0xff]   ;;  %v6248_v18 = vld [vmem:[#allocation7 + $0x60] ss:$16 sps:$4 sm:$0xff]   ;;  %v541_v9 = vld [vmem:[%s7637_s4 + $0x48] sm:$0xff] }
  0xb5   : > { %v6246_v17 = vld [vmem:[#allocation7 + $0x264] ss:$16 sps:$4 sm:$0xff]   ;;  %v6249_v19 = vld [vmem:[#allocation7 + $0x260] ss:$16 sps:$4 sm:$0xff]   ;;  %p7230_p9 = pnand %p7229_p13, %p8035_p7 }
  0xb6   : > { %1784 = vmatpush1.bf16.msra.mxu0 %v6236_v10  ;;  %v6250_v20 = vld [vmem:[#allocation7 + $0x44] ss:$16 sps:$4 sm:$0xff]   ;;  %v6254_v22 = vld [vmem:[#allocation7 + $0x40] ss:$16 sps:$4 sm:$0xff]  }
  0xb7   : > { %1837 = vmatpush1.bf16.msra.mxu1 %v6237_v11  ;;  %1785 = vmatprep.subr.bf16.mxu0 %v6238_v12  ;;  %v6252_v21 = vld [vmem:[#allocation7 + $0x244] ss:$16 sps:$4 sm:$0xff]   ;;  %v6255_v23 = vld [vmem:[#allocation7 + $0x240] ss:$16 sps:$4 sm:$0xff]   ;;  %v547_v12 = vld [vmem:[%s7637_s4 + $0x78] sm:$0xff]  ;;  %p7231_p11 = pneg %p7230_p9 }
  0xb8   : > { %1838 = vmatprep.subr.bf16.mxu1 %v6240_v13  ;;  %v6256_v24 = vld [vmem:[#allocation7 + $0x24] ss:$16 sps:$4 sm:$0xff]   ;;  %v6260_v26 = vld [vmem:[#allocation7 + $0x20] ss:$16 sps:$4 sm:$0xff]  }
  0xb9   : > { %v6258_v25 = vld [vmem:[#allocation7 + $0x224] ss:$16 sps:$4 sm:$0xff]   ;;  %v6261_v27 = vld [vmem:[#allocation7 + $0x220] ss:$16 sps:$4 sm:$0xff]  }
  0xba   : > { %1786 = vmatpush1.bf16.msra.mxu0 %v6242_v14  ;;  %v6262_v28 = vld [vmem:[#allocation7 + $0x4] ss:$16 sps:$4 sm:$0xff]   ;;  %v6266_v30 = vld [vmem:[#allocation7] ss:$16 sps:$4 sm:$0xff]   ;;  %v549_v14 = vld [vmem:[%s7637_s4 + $0x88] sm:$0xff] }
  0xbb   : > { %1839 = vmatpush1.bf16.msra.mxu1 %v6243_v15  ;;  %1787 = vmatprep.subr.bf16.mxu0 %v6244_v16  ;;  %v6264_v29 = vld [vmem:[#allocation7 + $0x204] ss:$16 sps:$4 sm:$0xff]   ;;  %v6267_v31 = vld [vmem:[#allocation7 + $0x200] ss:$16 sps:$4 sm:$0xff]  }
  0xbc   : > { %1840 = vmatprep.subr.bf16.mxu1 %v6246_v17  ;;  %v6268_v32 = vld [vmem:[#allocation7 + $0x1e4] ss:$16 sps:$4 sm:$0xff]   ;;  %v6272_v34 = vld [vmem:[#allocation7 + $0x1e0] ss:$16 sps:$4 sm:$0xff]  }
  0xbd   : > { %v6270_v33 = vld [vmem:[#allocation7 + $0x3e4] ss:$16 sps:$4 sm:$0xff]   ;;  %v6273_v35 = vld [vmem:[#allocation7 + $0x3e0] ss:$16 sps:$4 sm:$0xff]  }
  0xbe   : > { %1788 = vmatpush1.bf16.msra.mxu0 %v6248_v18  ;;  %v6274_v36 = vld [vmem:[#allocation7 + $0x1c4] ss:$16 sps:$4 sm:$0xff]   ;;  %v6278_v38 = vld [vmem:[#allocation7 + $0x1c0] ss:$16 sps:$4 sm:$0xff]  }
  0xbf   : > { %1841 = vmatpush1.bf16.msra.mxu1 %v6249_v19  ;;  %1789 = vmatprep.subr.bf16.mxu0 %v6250_v20  ;;  %v6276_v37 = vld [vmem:[#allocation7 + $0x3c4] ss:$16 sps:$4 sm:$0xff]   ;;  %v6279_v39 = vld [vmem:[#allocation7 + $0x3c0] ss:$16 sps:$4 sm:$0xff]  }
  0xc0   : > { %1842 = vmatprep.subr.bf16.mxu1 %v6252_v21  ;;  %v6280_v40 = vld [vmem:[#allocation7 + $0x1a4] ss:$16 sps:$4 sm:$0xff]   ;;  %v6284_v42 = vld [vmem:[#allocation7 + $0x1a0] ss:$16 sps:$4 sm:$0xff]  }
  0xc1   : > { %v6282_v41 = vld [vmem:[#allocation7 + $0x3a4] ss:$16 sps:$4 sm:$0xff]   ;;  %v6285_v43 = vld [vmem:[#allocation7 + $0x3a0] ss:$16 sps:$4 sm:$0xff]  }
  0xc2   : > { %1790 = vmatpush1.bf16.msra.mxu0 %v6254_v22  ;;  %v6286_v44 = vld [vmem:[#allocation7 + $0x184] ss:$16 sps:$4 sm:$0xff]   ;;  %v6290_v50 = vld [vmem:[#allocation7 + $0x180] ss:$16 sps:$4 sm:$0xff]  }
  0xc3   : > { %1843 = vmatpush1.bf16.msra.mxu1 %v6255_v23  ;;  %1791 = vmatprep.subr.bf16.mxu0 %v6256_v24  ;;  %v6288_v45 = vld [vmem:[#allocation7 + $0x384] ss:$16 sps:$4 sm:$0xff]   ;;  %v6291_v51 = vld [vmem:[#allocation7 + $0x380] ss:$16 sps:$4 sm:$0xff]  }
  0xc4   : > { %1844 = vmatprep.subr.bf16.mxu1 %v6258_v25  ;;  %v540_v47 = vld [vmem:[%s7637_s4 + $0x40] sm:$0xff]  ;;  %v542_v49 = vld [vmem:[%s7637_s4 + $0x50] sm:$0xff]  ;;  %v6333_v25 = vld [vmem:[#allocation7 + $0xec] ss:$16 sps:$4 sm:$0xff]  }
  0xc5   : > { %v6292_v52 = vld [vmem:[#allocation7 + $0x164] ss:$16 sps:$4 sm:$0xff]   ;;  %v7667_v53 = vpack.c.bf16 %v540_v47, %v533_v46  ;;  %v7669_v54 = vpack.c.bf16 %v542_v49, %v535_v48  ;;  %v6296_v56 = vld [vmem:[#allocation7 + $0x160] ss:$16 sps:$4 sm:$0xff]   ;;  %v6345_v46 = vld [vmem:[#allocation7 + $0xac] ss:$16 sps:$4 sm:$0xff]  }
  0xc6   : > { %1792 = vmatpush1.bf16.msra.mxu0 %v6260_v26  ;;  %v6294_v55 = vld [vmem:[#allocation7 + $0x364] ss:$16 sps:$4 sm:$0xff]   ;;  %v6297_v57 = vld [vmem:[#allocation7 + $0x360] ss:$16 sps:$4 sm:$0xff]   ;;  %v553_v26 = vld [vmem:[%s7637_s4 + $0xa8] sm:$0xff] }
  0xc7   : > { %1845 = vmatpush1.bf16.msra.mxu1 %v6261_v27  ;;  %1793 = vmatprep.subr.bf16.mxu0 %v6262_v28  ;;  %v6298_v58 = vld [vmem:[#allocation7 + $0x144] ss:$16 sps:$4 sm:$0xff]   ;;  %v6302_v60 = vld [vmem:[#allocation7 + $0x140] ss:$16 sps:$4 sm:$0xff]   ;;  %v555_v28 = vld [vmem:[%s7637_s4 + $0xb8] sm:$0xff] }
  0xc8   : > { %1846 = vmatprep.subr.bf16.mxu1 %v6264_v29  ;;  %1811 = vmatprep.mubr.bf16.mxu0 %v7667_v53  ;;  %v6300_v59 = vld [vmem:[#allocation7 + $0x344] ss:$16 sps:$4 sm:$0xff]   ;;  %v6303_v61 = vld [vmem:[#allocation7 + $0x340] ss:$16 sps:$4 sm:$0xff]   ;;  %v6343_v48 = vld [vmem:[#allocation7 + $0xa8] ss:$16 sps:$4 sm:$0xff]  }
  0xc9   : > { %1864 = vmatprep.mubr.bf16.mxu1 %v7669_v54  ;;  %v6304_v62 = vld [vmem:[#allocation7 + $0x124] ss:$16 sps:$4 sm:$0xff]   ;;  %v6308_v0 = vld [vmem:[#allocation7 + $0x120] ss:$16 sps:$4 sm:$0xff]   ;;  %v537_v49 = vld [vmem:[%s7637_s4 + $0x28] sm:$0xff] }
  0xca   : > { %1794 = vmatpush1.bf16.msra.mxu0 %v6266_v30  ;;  %v6306_v63 = vld [vmem:[#allocation7 + $0x324] ss:$16 sps:$4 sm:$0xff]   ;;  %v6309_v1 = vld [vmem:[#allocation7 + $0x320] ss:$16 sps:$4 sm:$0xff]  }
  0xcb   : > { %1847 = vmatpush1.bf16.msra.mxu1 %v6267_v31  ;;  %1795 = vmatprep.subr.bf16.mxu0 %v6268_v32  ;;  %v6310_v2 = vld [vmem:[#allocation7 + $0x104] ss:$16 sps:$4 sm:$0xff]   ;;  %v6314_v4 = vld [vmem:[#allocation7 + $0x100] ss:$16 sps:$4 sm:$0xff]  }
  0xcc   : > { %1848 = vmatprep.subr.bf16.mxu1 %v6270_v33  ;;  %v6312_v3 = vld [vmem:[#allocation7 + $0x304] ss:$16 sps:$4 sm:$0xff]   ;;  %v6315_v5 = vld [vmem:[#allocation7 + $0x300] ss:$16 sps:$4 sm:$0xff]  }
  0xcd   : > { %v532_v6 = vld [vmem:[%s7637_s4] sm:$0xff]  ;;  %v534_v8 = vld [vmem:[%s7637_s4 + $0x10] sm:$0xff] }
  0xce   : > { %1796 = vmatpush2.bf16.msra.mxu0 %v6272_v34  ;;  %v6318_v10 = vld [vmem:[#allocation7 + $0x4e4] ss:$16 sps:$4 sm:$0xff]   ;;  %v7680_v15 = vpack.c.bf16 %v539_v7, %v532_v6  ;;  %v7682_v16 = vpack.c.bf16 %v541_v9, %v534_v8  ;;  %v6316_v18 = vld [vmem:[#allocation7 + $0x4e0] ss:$16 sps:$4 sm:$0xff]   ;;  %v6369_v6 = vld [vmem:[#allocation7 + $0x2c] ss:$16 sps:$4 sm:$0xff]  }
  0xcf   : > { %1849 = vmatpush2.bf16.msra.mxu1 %v6273_v35  ;;  %1797 = vmatprep.subr.bf16.mxu0 %v6274_v36  ;;  %v6321_v11 = vld [vmem:[#allocation7 + $0x604] ss:$16 sps:$4 sm:$0xff]   ;;  %v6319_v19 = vld [vmem:[#allocation7 + $0x600] ss:$16 sps:$4 sm:$0xff]   ;;  %v7355_v35 = vmov 0  }
  0xd0   : > { %1850 = vmatprep.subr.bf16.mxu1 %v6276_v37  ;;  %v554_v13 = vld [vmem:[%s7637_s4 + $0xb0] sm:$0xff]  ;;  %v556_v17 = vld [vmem:[%s7637_s4 + $0xc0] sm:$0xff]  ;;  %v545_v37 = vld [vmem:[%s7637_s4 + $0x68] sm:$0xff] }
  0xd1   : > { %v6324_v20 = vld [vmem:[#allocation7 + $0x4c4] ss:$16 sps:$4 sm:$0xff]   ;;  %v7685_v21 = vpack.c.bf16 %v554_v13, %v547_v12  ;;  %v6322_v22 = vld [vmem:[#allocation7 + $0x4c0] ss:$16 sps:$4 sm:$0xff]   ;;  %v7687_v23 = vpack.c.bf16 %v556_v17, %v549_v14  ;;  %v6367_v8 = vld [vmem:[#allocation7 + $0x28] ss:$16 sps:$4 sm:$0xff]  }
  0xd2   : > { %1798 = vmatpush2.bf16.msra.mxu0 %v6278_v38  ;;  %v546_v24 = vld [vmem:[%s7637_s4 + $0x70] sm:$0xff]  ;;  %v548_v27 = vld [vmem:[%s7637_s4 + $0x80] sm:$0xff]  ;;  %v6381_v13 = vld [vmem:[#allocation7 + $0x1ec] ss:$16 sps:$4 sm:$0xff]  }
  0xd3   : > { %1851 = vmatpush2.bf16.msra.mxu1 %v6279_v39  ;;  %1799 = vmatprep.subr.bf16.mxu0 %v6280_v40  ;;  %v6327_v29 = vld [vmem:[#allocation7 + $0x4a4] ss:$16 sps:$4 sm:$0xff]   ;;  %v7697_v30 = vpack.c.bf16 %v553_v26, %v546_v24  ;;  %v7699_v31 = vpack.c.bf16 %v555_v28, %v548_v27  ;;  %v6325_v32 = vld [vmem:[#allocation7 + $0x4a0] ss:$16 sps:$4 sm:$0xff]   ;;  %v6331_v40 = vld [vmem:[#allocation7 + $0xe8] ss:$16 sps:$4 sm:$0xff]  }
  0xd4   : > { %1852 = vmatprep.subr.bf16.mxu1 %v6282_v41  ;;  %v6330_v33 = vld [vmem:[#allocation7 + $0x484] ss:$16 sps:$4 sm:$0xff]   ;;  %v6328_v34 = vld [vmem:[#allocation7 + $0x480] ss:$16 sps:$4 sm:$0xff]   ;;  %v6379_v17 = vld [vmem:[#allocation7 + $0x1e8] ss:$16 sps:$4 sm:$0xff]  }
  0xd5   : > { %v538_v36 = vld [vmem:[%s7637_s4 + $0x30] sm:$0xff]  ;;  %v6391_v27 = vld [vmem:[#allocation7 + $0x1a8] ss:$16 sps:$4 sm:$0xff]  }
  0xd6   : > { %1800 = vmatpush2.bf16.msra.mxu0 %v6284_v42  ;;  %v6336_v38 = vld [vmem:[#allocation7 + $0x464] ss:$16 sps:$4 sm:$0xff]   ;;  %v7706_v39 = vpack.c.bf16 %v545_v37, %v538_v36  ;;  %v6334_v41 = vld [vmem:[#allocation7 + $0x460] ss:$16 sps:$4 sm:$0xff]   ;;  %v6339_v42 = vld [vmem:[#allocation7 + $0xcc] ss:$16 sps:$4 sm:$0xff]  }
  0xd7   : > { %1853 = vmatpush2.bf16.msra.mxu1 %v6285_v43  ;;  %1801 = vmatprep.subr.bf16.mxu0 %v6286_v44  ;;  %v6342_v43 = vld [vmem:[#allocation7 + $0x444] ss:$16 sps:$4 sm:$0xff]   ;;  %v6337_v44 = vld [vmem:[#allocation7 + $0xc8] ss:$16 sps:$4 sm:$0xff]   ;;  %v6370_v9 = vld [vmem:[#allocation7 + $0x5a0] ss:$16 sps:$4 sm:$0xff]  }
  0xd8   : > { %1854 = vmatprep.subr.bf16.mxu1 %v6288_v45  ;;  %v6340_v45 = vld [vmem:[#allocation7 + $0x440] ss:$16 sps:$4 sm:$0xff]   ;;  %v6348_v47 = vld [vmem:[#allocation7 + $0x424] ss:$16 sps:$4 sm:$0xff]   ;;  %v6405_v36 = vld [vmem:[#allocation7 + $0x16c] ss:$16 sps:$4 sm:$0xff]  }
  0xd9   : > { %v6372_v7 = vld [vmem:[#allocation7 + $0x5a4] ss:$16 sps:$4 sm:$0xff]   ;;  %v6376_v12 = vld [vmem:[#allocation7 + $0x580] ss:$16 sps:$4 sm:$0xff]  }
  0xda   : > { %1802 = vmatpush2.bf16.msra.mxu0 %v6290_v50  ;;  %v544_v50 = vld [vmem:[%s7637_s4 + $0x60] sm:$0xff] }
  0xdb   : > { %1855 = vmatpush2.bf16.msra.mxu1 %v6291_v51  ;;  %1803 = vmatprep.subr.bf16.mxu0 %v6292_v52  ;;  %v6346_v51 = vld [vmem:[#allocation7 + $0x420] ss:$16 sps:$4 sm:$0xff]   ;;  %v7713_v52 = vpack.c.bf16 %v544_v50, %v537_v49  ;;  %v6384_v14 = vld [vmem:[#allocation7 + $0x564] ss:$16 sps:$4 sm:$0xff]   ;;  %v6412_v49 = vld [vmem:[#allocation7 + $0x2c8] ss:$16 sps:$4 sm:$0xff]  }
  0xdc   : > { %1856 = vmatprep.subr.bf16.mxu1 %v6294_v55  ;;  %v6351_v55 = vld [vmem:[#allocation7 + $0x8c] ss:$16 sps:$4 sm:$0xff]   ;;  %v6388_v24 = vld [vmem:[#allocation7 + $0x540] ss:$16 sps:$4 sm:$0xff]   ;;  %v6396_v26 = vld [vmem:[#allocation7 + $0x524] ss:$16 sps:$4 sm:$0xff]  }
  0xdd   : > { %v6394_v28 = vld [vmem:[#allocation7 + $0x520] ss:$16 sps:$4 sm:$0xff]  }
  0xde   : > { %1804 = vmatpush2.bf16.msra.mxu0 %v6296_v56  ;;  %v6354_v56 = vld [vmem:[#allocation7 + $0x404] ss:$16 sps:$4 sm:$0xff]  }
  0xdf   : > { %1857 = vmatpush2.bf16.msra.mxu1 %v6297_v57  ;;  %1805 = vmatprep.subr.bf16.mxu0 %v6298_v58  ;;  %v6349_v57 = vld [vmem:[#allocation7 + $0x88] ss:$16 sps:$4 sm:$0xff]   ;;  %v6352_v58 = vld [vmem:[#allocation7 + $0x400] ss:$16 sps:$4 sm:$0xff]  }
  0xe0   : > { %1858 = vmatprep.subr.bf16.mxu1 %v6300_v59  ;;  %v552_v59 = vld [vmem:[%s7637_s4 + $0xa0] sm:$0xff] }
  0xe1   : > { %v536_v37 = vld [vmem:[%s7637_s4 + $0x20] sm:$0xff] }
  0xe2   : > { %1806 = vmatpush2.bf16.msra.mxu0 %v6302_v60  ;;  %v559_v60 = vld [vmem:[%s7637_s4 + $0xd8] sm:$0xff] }
  0xe3   : > { %1859 = vmatpush2.bf16.msra.mxu1 %v6303_v61  ;;  %1807 = vmatprep.subr.bf16.mxu0 %v6304_v62  ;;  %v6357_v61 = vld [vmem:[#allocation7 + $0x6c] ss:$16 sps:$4 sm:$0xff]   ;;  %v7718_v62 = vpack.c.bf16 %v559_v60, %v552_v59  ;;  %v6418_v60 = vld [vmem:[#allocation7 + $0x2a8] ss:$16 sps:$4 sm:$0xff]  }
  0xe4   : > { %1860 = vmatprep.subr.bf16.mxu1 %v6306_v63  ;;  %v6360_v63 = vld [vmem:[#allocation7 + $0x5e4] ss:$16 sps:$4 sm:$0xff]  }
  0xe6   : > { %1808 = vmatpush2.bf16.msra.mxu0 %v6308_v0  ;;  %v6355_v0 = vld [vmem:[#allocation7 + $0x68] ss:$16 sps:$4 sm:$0xff]  }
  0xe7   : > { %1861 = vmatpush2.bf16.msra.mxu1 %v6309_v1  ;;  %1809 = vmatprep.subr.bf16.mxu0 %v6310_v2  ;;  %v6358_v1 = vld [vmem:[#allocation7 + $0x5e0] ss:$16 sps:$4 sm:$0xff]   ;;  %v6363_v2 = vld [vmem:[#allocation7 + $0x4c] ss:$16 sps:$4 sm:$0xff]  }
  0xe8   : > { %1862 = vmatprep.subr.bf16.mxu1 %v6312_v3  ;;  %v6366_v3 = vld [vmem:[#allocation7 + $0x5c4] ss:$16 sps:$4 sm:$0xff]  }
  0xea   : > { %1810 = vmatpush2.bf16.msra.mxu0 %v6314_v4  ;;  %v6361_v4 = vld [vmem:[#allocation7 + $0x48] ss:$16 sps:$4 sm:$0xff]  }
  0xeb   : > { %1863 = vmatpush2.bf16.msra.mxu1 %v6315_v5  ;;  %1885 = vmatprep.subr.bf16.mxu0 %v6318_v10  ;;  %v6364_v5 = vld [vmem:[#allocation7 + $0x5c0] ss:$16 sps:$4 sm:$0xff]   ;;  %v6378_v10 = vld [vmem:[#allocation7 + $0x584] ss:$16 sps:$4 sm:$0xff]  }
  0xec   : > { %1952 = vmatprep.subr.bf16.mxu1 %v6321_v11  ;;  %v6373_v11 = vld [vmem:[#allocation7 + $0x8] ss:$16 sps:$4 sm:$0xff]  }
  0xed   : > { %1812 = vmatmul.mubr.bf16.vlgmr.msra.gmra.mxu0 %v7680_v15 }
  0xee   : > { %1865 = vmatmul.mubr.bf16.vlgmr.msra.gmra.mxu1 %v7682_v16  ;;  %1886 = vmatpush1.bf16.msra.mxu0 %v6316_v18  ;;  %v6382_v18 = vld [vmem:[#allocation7 + $0x560] ss:$16 sps:$4 sm:$0xff]  }
  0xef   : > { %1953 = vmatpush1.bf16.msra.mxu1 %v6319_v19  ;;  %1887 = vmatprep.subr.bf16.mxu0 %v6324_v20  ;;  %v6387_v19 = vld [vmem:[#allocation7 + $0x1cc] ss:$16 sps:$4 sm:$0xff]   ;;  %v6390_v20 = vld [vmem:[#allocation7 + $0x544] ss:$16 sps:$4 sm:$0xff]  }
  0xf0   : > { %1821 = vmatprep.mubr.bf16.mxu0 %v7685_v21  ;;  %1874 = vmatprep.mubr.bf16.mxu1 %v7687_v23 }
  0xf1   : > { %1991 = vmatprep.subr.bf16.mxu1 %v6333_v25  ;;  %v6393_v25 = vld [vmem:[#allocation7 + $0x1ac] ss:$16 sps:$4 sm:$0xff]  }
  0xf2   : > { %1888 = vmatpush1.bf16.msra.mxu0 %v6322_v22  ;;  %v6385_v22 = vld [vmem:[#allocation7 + $0x1c8] ss:$16 sps:$4 sm:$0xff]  }
  0xf3   : > { %1889 = vmatprep.subr.bf16.mxu0 %v6327_v29  ;;  %v6399_v29 = vld [vmem:[#allocation7 + $0x18c] ss:$16 sps:$4 sm:$0xff]  }
  0xf5   : > { %1822 = vmatmul.mubr.bf16.gmra.mxu0 %v7697_v30 }
  0xf6   : > { %1875 = vmatmul.mubr.bf16.gmra.mxu1 %v7699_v31  ;;  %1890 = vmatpush1.bf16.msra.mxu0 %v6325_v32  ;;  %v6402_v32 = vld [vmem:[#allocation7 + $0x504] ss:$16 sps:$4 sm:$0xff]  }
  0xf7   : > { %1970 = vmatprep.mubr.bf16.mxu1 %v7355_v35  ;;  %1891 = vmatprep.subr.bf16.mxu0 %v6330_v33  ;;  %v6397_v33 = vld [vmem:[#allocation7 + $0x188] ss:$16 sps:$4 sm:$0xff]  }
  0xf8   : > { %1917 = vmatprep.mubr.bf16.mxu0 %v7713_v52 }
  0xfa   : > { %1892 = vmatpush1.bf16.msra.mxu0 %v6328_v34  ;;  %v6400_v34 = vld [vmem:[#allocation7 + $0x500] ss:$16 sps:$4 sm:$0xff]  }
  0xfb   : > { %1893 = vmatprep.subr.bf16.mxu0 %v6336_v38  ;;  %v543_v38 = vld [vmem:[%s7637_s4 + $0x58] sm:$0xff] }
  0xfe   : > { %5671 = vmatmul.mubr.msk.bf16.vlgmr.msra.gmra.mxu1 %vm1772_vm0, %v7706_v39  ;;  %1894 = vmatpush1.bf16.msra.mxu0 %v6334_v41  ;;  %v6403_v41 = vld [vmem:[#allocation7 + $0x168] ss:$16 sps:$4 sm:$0xff]  }
  0xff   : > { %1992 = vmatpush1.bf16.msra.mxu1 %v6331_v40  ;;  %1895 = vmatprep.subr.bf16.mxu0 %v6342_v43  ;;  %v6408_v40 = vld [vmem:[#allocation7 + $0x2ec] ss:$16 sps:$4 sm:$0xff]   ;;  %v7725_v43 = vpack.c.bf16 %v543_v38, %v536_v37  ;;  %v6475_v37 = vld [vmem:[#allocation7 + $0x5e8] ss:$16 sps:$4 sm:$0xff]  }
 0x100   : > { %1993 = vmatprep.subr.bf16.mxu1 %v6339_v42  ;;  %1980 = vmatprep.mubr.bf16.mxu1 %v7355_v35  ;;  %v6406_v42 = vld [vmem:[#allocation7 + $0x2e8] ss:$16 sps:$4 sm:$0xff]  }
 0x101   : > { %v6478_v38 = vld [vmem:[#allocation7 + $0x368] ss:$16 sps:$4 sm:$0xff]  }
 0x102   : > { %1896 = vmatpush1.bf16.msra.mxu0 %v6340_v45  ;;  %v558_v45 = vld [vmem:[%s7637_s4 + $0xd0] sm:$0xff] }
 0x103   : > { %1994 = vmatpush1.bf16.msra.mxu1 %v6337_v44  ;;  %1897 = vmatprep.subr.bf16.mxu0 %v6348_v47  ;;  %v551_v44 = vld [vmem:[%s7637_s4 + $0x98] sm:$0xff] }
 0x104   : > { %1995 = vmatprep.subr.bf16.mxu1 %v6345_v46  ;;  %v6411_v46 = vld [vmem:[#allocation7 + $0x14c] ss:$16 sps:$4 sm:$0xff]   ;;  %v7729_v50 = vpack.c.bf16 %v558_v45, %v551_v44  ;;  %v6484_v44 = vld [vmem:[#allocation7 + $0x348] ss:$16 sps:$4 sm:$0xff]  }
 0x105   : > { %v6414_v47 = vld [vmem:[#allocation7 + $0x2cc] ss:$16 sps:$4 sm:$0xff]  }
 0x106   : > { %1898 = vmatpush1.bf16.msra.mxu0 %v6346_v51  ;;  %5672 = vmatmul.mubr.msk.bf16.gmra.mxu1 %vm1772_vm0, %v7718_v62  ;;  %v6417_v51 = vld [vmem:[#allocation7 + $0x12c] ss:$16 sps:$4 sm:$0xff]  }
 0x107   : > { %1996 = vmatpush1.bf16.msra.mxu1 %v6343_v48  ;;  %1899 = vmatprep.subr.bf16.mxu0 %v6354_v56  ;;  %v6409_v48 = vld [vmem:[#allocation7 + $0x148] ss:$16 sps:$4 sm:$0xff]   ;;  %v6489_v45 = vld [vmem:[#allocation7 + $0x5ac] ss:$16 sps:$4 sm:$0xff]  }
 0x108   : > { %1997 = vmatprep.subr.bf16.mxu1 %v6351_v55  ;;  %2023 = vmatprep.mubr.bf16.mxu1 %v7667_v53  ;;  %v6375_v53 = vld [vmem:[#allocation7 + $0xc] ss:$16 sps:$4 sm:$0xff]   ;;  %v550_v55 = vld [vmem:[%s7637_s4 + $0x90] sm:$0xff] }
 0x109   : > { %v557_v56 = vld [vmem:[%s7637_s4 + $0xc8] sm:$0xff] }
 0x10a   : > { %1900 = vmatpush1.bf16.msra.mxu0 %v6352_v58  ;;  %v6415_v58 = vld [vmem:[#allocation7 + $0x128] ss:$16 sps:$4 sm:$0xff]   ;;  %v7735_v59 = vpack.c.bf16 %v557_v56, %v550_v55 }
 0x10b   : > { %1998 = vmatpush1.bf16.msra.mxu1 %v6349_v57  ;;  %1901 = vmatprep.subr.bf16.mxu0 %v6360_v63  ;;  %v6420_v57 = vld [vmem:[#allocation7 + $0x2ac] ss:$16 sps:$4 sm:$0xff]   ;;  %v6493_v55 = vld [vmem:[#allocation7 + $0x588] ss:$16 sps:$4 sm:$0xff]  }
 0x10c   : > { %1999 = vmatprep.subr.bf16.mxu1 %v6357_v61  ;;  %v6423_v61 = vld [vmem:[#allocation7 + $0x10c] ss:$16 sps:$4 sm:$0xff]   ;;  %v6496_v56 = vld [vmem:[#allocation7 + $0x308] ss:$16 sps:$4 sm:$0xff]  }
 0x10d   : > { %v6426_v63 = vld [vmem:[#allocation7 + $0x28c] ss:$16 sps:$4 sm:$0xff]  }
 0x10e   : > { %1902 = vmatpush2.bf16.msra.mxu0 %v6358_v1  ;;  %v6424_v1 = vld [vmem:[#allocation7 + $0x288] ss:$16 sps:$4 sm:$0xff]  }
 0x10f   : > { %2000 = vmatpush1.bf16.msra.mxu1 %v6355_v0  ;;  %1903 = vmatprep.subr.bf16.mxu0 %v6366_v3  ;;  %v6421_v0 = vld [vmem:[#allocation7 + $0x108] ss:$16 sps:$4 sm:$0xff]   ;;  %v6432_v3 = vld [vmem:[#allocation7 + $0x26c] ss:$16 sps:$4 sm:$0xff]  }
 0x110   : > { %2001 = vmatprep.subr.bf16.mxu1 %v6363_v2  ;;  %v6429_v2 = vld [vmem:[#allocation7 + $0x4ec] ss:$16 sps:$4 sm:$0xff]  }
 0x112   : > { %1904 = vmatpush2.bf16.msra.mxu0 %v6364_v5  ;;  %v6430_v5 = vld [vmem:[#allocation7 + $0x268] ss:$16 sps:$4 sm:$0xff]  }
 0x113   : > { %2002 = vmatpush1.bf16.msra.mxu1 %v6361_v4  ;;  %1905 = vmatprep.subr.bf16.mxu0 %v6372_v7  ;;  %v6427_v4 = vld [vmem:[#allocation7 + $0x4e8] ss:$16 sps:$4 sm:$0xff]   ;;  %v6438_v7 = vld [vmem:[#allocation7 + $0x24c] ss:$16 sps:$4 sm:$0xff]  }
 0x114   : > { %2003 = vmatprep.subr.bf16.mxu1 %v6369_v6  ;;  %v6435_v6 = vld [vmem:[#allocation7 + $0x4cc] ss:$16 sps:$4 sm:$0xff]  }
 0x116   : > { %1906 = vmatpush2.bf16.msra.mxu0 %v6370_v9  ;;  %v6436_v9 = vld [vmem:[#allocation7 + $0x248] ss:$16 sps:$4 sm:$0xff]  }
 0x117   : > { %2004 = vmatpush1.bf16.msra.mxu1 %v6367_v8  ;;  %1907 = vmatprep.subr.bf16.mxu0 %v6378_v10  ;;  %v6433_v8 = vld [vmem:[#allocation7 + $0x4c8] ss:$16 sps:$4 sm:$0xff]   ;;  %v6444_v10 = vld [vmem:[#allocation7 + $0x22c] ss:$16 sps:$4 sm:$0xff]  }
 0x118   : > { %2005 = vmatprep.subr.bf16.mxu1 %v6375_v53  ;;  %v6441_v53 = vld [vmem:[#allocation7 + $0x4ac] ss:$16 sps:$4 sm:$0xff]  }
 0x11a   : > { %1908 = vmatpush2.bf16.msra.mxu0 %v6376_v12  ;;  %v6447_v12 = vld [vmem:[#allocation7 + $0x48c] ss:$16 sps:$4 sm:$0xff]  }
 0x11b   : > { %2006 = vmatpush1.bf16.msra.mxu1 %v6373_v11  ;;  %1909 = vmatprep.subr.bf16.mxu0 %v6384_v14  ;;  %v6439_v11 = vld [vmem:[#allocation7 + $0x4a8] ss:$16 sps:$4 sm:$0xff]  }
 0x11c   : > { %2007 = vmatprep.subr.bf16.mxu1 %v6381_v13  ;;  %v6450_v13 = vld [vmem:[#allocation7 + $0x20c] ss:$16 sps:$4 sm:$0xff]   ;;  %v6448_v14 = vld [vmem:[#allocation7 + $0x208] ss:$16 sps:$4 sm:$0xff]  }
 0x11e   : > { %1910 = vmatpush2.bf16.msra.mxu0 %v6382_v18  ;;  %v6456_v18 = vld [vmem:[#allocation7 + $0x3ec] ss:$16 sps:$4 sm:$0xff]  }
 0x11f   : > { %2008 = vmatpush2.bf16.msra.mxu1 %v6379_v17  ;;  %1911 = vmatprep.subr.bf16.mxu0 %v6390_v20  ;;  %v6453_v17 = vld [vmem:[#allocation7 + $0x46c] ss:$16 sps:$4 sm:$0xff]   ;;  %v6454_v20 = vld [vmem:[#allocation7 + $0x3e8] ss:$16 sps:$4 sm:$0xff]  }
 0x120   : > { %2009 = vmatprep.subr.bf16.mxu1 %v6387_v19  ;;  %v6451_v19 = vld [vmem:[#allocation7 + $0x468] ss:$16 sps:$4 sm:$0xff]  }
 0x122   : > { %1912 = vmatpush2.bf16.msra.mxu0 %v6388_v24  ;;  %v6457_v24 = vld [vmem:[#allocation7 + $0x448] ss:$16 sps:$4 sm:$0xff]  }
 0x123   : > { %2010 = vmatpush2.bf16.msra.mxu1 %v6385_v22  ;;  %1913 = vmatprep.subr.bf16.mxu0 %v6396_v26  ;;  %v6462_v22 = vld [vmem:[#allocation7 + $0x3cc] ss:$16 sps:$4 sm:$0xff]  }
 0x124   : > { %2011 = vmatprep.subr.bf16.mxu1 %v6393_v25  ;;  %v6465_v25 = vld [vmem:[#allocation7 + $0x42c] ss:$16 sps:$4 sm:$0xff]  }
 0x125   : > { %v6468_v26 = vld [vmem:[#allocation7 + $0x3ac] ss:$16 sps:$4 sm:$0xff]  }
 0x126   : > { %1914 = vmatpush2.bf16.msra.mxu0 %v6394_v28  ;;  %v6466_v28 = vld [vmem:[#allocation7 + $0x3a8] ss:$16 sps:$4 sm:$0xff]  }
 0x127   : > { %2012 = vmatpush2.bf16.msra.mxu1 %v6391_v27  ;;  %1915 = vmatprep.subr.bf16.mxu0 %v6402_v32  ;;  %v6463_v27 = vld [vmem:[#allocation7 + $0x428] ss:$16 sps:$4 sm:$0xff]   ;;  %v6474_v32 = vld [vmem:[#allocation7 + $0x38c] ss:$16 sps:$4 sm:$0xff]  }
 0x128   : > { %2013 = vmatprep.subr.bf16.mxu1 %v6399_v29  ;;  %v6471_v29 = vld [vmem:[#allocation7 + $0x40c] ss:$16 sps:$4 sm:$0xff]  }
 0x12a   : > { %1916 = vmatpush2.bf16.msra.mxu0 %v6400_v34  ;;  %v6477_v34 = vld [vmem:[#allocation7 + $0x5ec] ss:$16 sps:$4 sm:$0xff]  }
 0x12b   : > { %2014 = vmatpush2.bf16.msra.mxu1 %v6397_v33  ;;  %2044 = vmatprep.subr.bf16.mxu0 %v6408_v40  ;;  %v6472_v33 = vld [vmem:[#allocation7 + $0x388] ss:$16 sps:$4 sm:$0xff]   ;;  %v6483_v40 = vld [vmem:[#allocation7 + $0x5cc] ss:$16 sps:$4 sm:$0xff]  }
 0x12c   : > { %2015 = vmatprep.subr.bf16.mxu1 %v6405_v36  ;;  %v6480_v36 = vld [vmem:[#allocation7 + $0x36c] ss:$16 sps:$4 sm:$0xff]  }
 0x12d   : > { %1918 = vmatmul.mubr.bf16.vlgmr.msra.gmra.mxu0 %v7725_v43 }
 0x12e   : > { %2045 = vmatpush1.bf16.msra.mxu0 %v6406_v42  ;;  %1927 = vmatprep.mubr.bf16.mxu0 %v7729_v50  ;;  %v6481_v42 = vld [vmem:[#allocation7 + $0x5c8] ss:$16 sps:$4 sm:$0xff]  }
 0x12f   : > { %2016 = vmatpush2.bf16.msra.mxu1 %v6403_v41  ;;  %2046 = vmatprep.subr.bf16.mxu0 %v6414_v47  ;;  %v6486_v41 = vld [vmem:[#allocation7 + $0x34c] ss:$16 sps:$4 sm:$0xff]   ;;  %v6487_v47 = vld [vmem:[#allocation7 + $0x5a8] ss:$16 sps:$4 sm:$0xff]  }
 0x130   : > { %2017 = vmatprep.subr.bf16.mxu1 %v6411_v46  ;;  %v6492_v46 = vld [vmem:[#allocation7 + $0x32c] ss:$16 sps:$4 sm:$0xff]  }
 0x132   : > { %2047 = vmatpush1.bf16.msra.mxu0 %v6412_v49  ;;  %v6495_v49 = vld [vmem:[#allocation7 + $0x58c] ss:$16 sps:$4 sm:$0xff]  }
 0x133   : > { %2018 = vmatpush2.bf16.msra.mxu1 %v6409_v48  ;;  %2048 = vmatprep.subr.bf16.mxu0 %v6420_v57  ;;  %v6490_v48 = vld [vmem:[#allocation7 + $0x328] ss:$16 sps:$4 sm:$0xff]   ;;  %v6501_v57 = vld [vmem:[#allocation7 + $0x56c] ss:$16 sps:$4 sm:$0xff]  }
 0x134   : > { %2019 = vmatprep.subr.bf16.mxu1 %v6417_v51  ;;  %v6498_v51 = vld [vmem:[#allocation7 + $0x30c] ss:$16 sps:$4 sm:$0xff]  }
 0x135   : > { %1928 = vmatmul.mubr.bf16.gmra.mxu0 %v7735_v59 }
 0x136   : > { %2049 = vmatpush1.bf16.msra.mxu0 %v6418_v60  ;;  %2076 = vmatprep.mubr.bf16.mxu0 %v7669_v54  ;;  %v6442_v54 = vld [vmem:[#allocation7 + $0x228] ss:$16 sps:$4 sm:$0xff]  }
 0x137   : > { %2020 = vmatpush2.bf16.msra.mxu1 %v6415_v58  ;;  %2050 = vmatprep.subr.bf16.mxu0 %v6426_v63  ;;  %v6504_v58 = vld [vmem:[#allocation7 + $0x60c] ss:$16 sps:$4 sm:$0xff]   ;;  %v6499_v60 = vld [vmem:[#allocation7 + $0x568] ss:$16 sps:$4 sm:$0xff]  }
 0x138   : > { %2021 = vmatprep.subr.bf16.mxu1 %v6423_v61  ;;  %v6502_v61 = vld [vmem:[#allocation7 + $0x608] ss:$16 sps:$4 sm:$0xff]   ;;  %v6507_v63 = vld [vmem:[#allocation7 + $0x54c] ss:$16 sps:$4 sm:$0xff]  }
 0x13a   : > { %2051 = vmatpush1.bf16.msra.mxu0 %v6424_v1  ;;  %v6516_v1 = vld [vmem:[#allocation8 + $0x74] ss:$8 sps:$4 sm:$0xff]  }
 0x13b   : > { %2022 = vmatpush2.bf16.msra.mxu1 %v6421_v0  ;;  %2052 = vmatprep.subr.bf16.mxu0 %v6432_v3  ;;  %v6505_v0 = vld [vmem:[#allocation7 + $0x548] ss:$16 sps:$4 sm:$0xff]  }
 0x13c   : > { %2097 = vmatprep.subr.bf16.mxu1 %v6429_v2  ;;  %v6510_v2 = vld [vmem:[#allocation7 + $0x52c] ss:$16 sps:$4 sm:$0xff]   ;;  %v6508_v3 = vld [vmem:[#allocation7 + $0x528] ss:$16 sps:$4 sm:$0xff]  }
 0x13e   : > { %2024 = vmatmul.mubr.bf16.vlgmr.msra.gmra.mxu1 %v7680_v15  ;;  %2053 = vmatpush1.bf16.msra.mxu0 %v6430_v5  ;;  %v6445_v15 = vld [vmem:[#allocation7 + $0x488] ss:$16 sps:$4 sm:$0xff]  }
 0x13f   : > { %2098 = vmatpush1.bf16.msra.mxu1 %v6427_v4  ;;  %2054 = vmatprep.subr.bf16.mxu0 %v6438_v7  ;;  %v6513_v4 = vld [vmem:[#allocation7 + $0x50c] ss:$16 sps:$4 sm:$0xff]   ;;  %v6511_v5 = vld [vmem:[#allocation7 + $0x508] ss:$16 sps:$4 sm:$0xff]  }
 0x140   : > { %2099 = vmatprep.subr.bf16.mxu1 %v6435_v6  ;;  %2033 = vmatprep.mubr.bf16.mxu1 %v7685_v21  ;;  %v6459_v21 = vld [vmem:[#allocation7 + $0x44c] ss:$16 sps:$4 sm:$0xff]   ;;  %v6514_v6 = vld [vmem:[#allocation8 + $0x70] ss:$8 sps:$4 sm:$0xff]  }
 0x141   : > { %v6522_v7 = vld [vmem:[#allocation8 + $0x54] ss:$8 sps:$4 sm:$0xff]  }
 0x142   : > { %2055 = vmatpush1.bf16.msra.mxu0 %v6436_v9  ;;  %v6564_v9 = vld [vmem:[#allocation8 + $0x174] ss:$8 sps:$4 sm:$0xff]  }
 0x143   : > { %2100 = vmatpush1.bf16.msra.mxu1 %v6433_v8  ;;  %2056 = vmatprep.subr.bf16.mxu0 %v6444_v10  ;;  %v6525_v8 = vld [vmem:[#allocation8 + $0x44] ss:$8 sps:$4 sm:$0xff]   ;;  %v6565_v10 = vld [vmem:[#allocation8 + $0x160] ss:$8 sps:$4 sm:$0xff]  }
 0x144   : > { %2101 = vmatprep.subr.bf16.mxu1 %v6441_v53  ;;  %v6523_v53 = vld [vmem:[#allocation8 + $0x40] ss:$8 sps:$4 sm:$0xff]  }
 0x146   : > { %2034 = vmatmul.mubr.bf16.gmra.mxu1 %v7697_v30  ;;  %2057 = vmatpush1.bf16.msra.mxu0 %v6442_v54  ;;  %v6460_v30 = vld [vmem:[#allocation7 + $0x3c8] ss:$16 sps:$4 sm:$0xff]  }
 0x147   : > { %2102 = vmatpush1.bf16.msra.mxu1 %v6439_v11  ;;  %2058 = vmatprep.subr.bf16.mxu0 %v6450_v13  ;;  %v6570_v11 = vld [vmem:[#allocation8 + $0x154] ss:$8 sps:$4 sm:$0xff]   ;;  %v6526_v54 = vld [vmem:[#allocation8 + $0x30] ss:$8 sps:$4 sm:$0xff]  }
 0x148   : > { %2103 = vmatprep.subr.bf16.mxu1 %v6447_v12  ;;  %2129 = vmatprep.mubr.bf16.mxu1 %v7713_v52  ;;  %v6469_v52 = vld [vmem:[#allocation7 + $0x408] ss:$16 sps:$4 sm:$0xff]   ;;  %v6531_v12 = vld [vmem:[#allocation8 + $0x24] ss:$8 sps:$4 sm:$0xff]  }
 0x149   : > { %v6568_v13 = vld [vmem:[#allocation8 + $0x150] ss:$8 sps:$4 sm:$0xff]  }
 0x14a   : > { %2059 = vmatpush1.bf16.msra.mxu0 %v6448_v14  ;;  %v6571_v14 = vld [vmem:[#allocation8 + $0x140] ss:$8 sps:$4 sm:$0xff]  }
 0x14b   : > { %2104 = vmatpush1.bf16.msra.mxu1 %v6445_v15  ;;  %2060 = vmatprep.subr.bf16.mxu0 %v6456_v18  ;;  %v6534_v15 = vld [vmem:[#allocation8 + $0x14] ss:$8 sps:$4 sm:$0xff]   ;;  %v6532_v18 = vld [vmem:[#allocation8 + $0x10] ss:$8 sps:$4 sm:$0xff]  }
 0x14c   : > { %2105 = vmatprep.subr.bf16.mxu1 %v6453_v17  ;;  %v6576_v17 = vld [vmem:[#allocation8 + $0x134] ss:$8 sps:$4 sm:$0xff]  }
 0x14e   : > { %2061 = vmatpush2.bf16.msra.mxu0 %v6454_v20  ;;  %v6574_v20 = vld [vmem:[#allocation8 + $0x130] ss:$8 sps:$4 sm:$0xff]  }
 0x14f   : > { %2106 = vmatpush1.bf16.msra.mxu1 %v6451_v19  ;;  %2062 = vmatprep.subr.bf16.mxu0 %v6462_v22  ;;  %v6537_v19 = vld [vmem:[#allocation8 + $0x4] ss:$8 sps:$4 sm:$0xff]   ;;  %v6535_v22 = vld [vmem:[#allocation8] ss:$8 sps:$4 sm:$0xff]  }
 0x150   : > { %2107 = vmatprep.subr.bf16.mxu1 %v6459_v21  ;;  %v6579_v21 = vld [vmem:[#allocation8 + $0x124] ss:$8 sps:$4 sm:$0xff]  }
 0x152   : > { %2063 = vmatpush2.bf16.msra.mxu0 %v6460_v30  ;;  %v6577_v30 = vld [vmem:[#allocation8 + $0x120] ss:$8 sps:$4 sm:$0xff]  }
 0x153   : > { %2108 = vmatpush1.bf16.msra.mxu1 %v6457_v24  ;;  %2064 = vmatprep.subr.bf16.mxu0 %v6468_v26  ;;  %v6540_v24 = vld [vmem:[#allocation8 + $0xf4] ss:$8 sps:$4 sm:$0xff]   ;;  %v6538_v26 = vld [vmem:[#allocation8 + $0xf0] ss:$8 sps:$4 sm:$0xff]  }
 0x154   : > { %2109 = vmatprep.subr.bf16.mxu1 %v6465_v25  ;;  %v6582_v25 = vld [vmem:[#allocation8 + $0x114] ss:$8 sps:$4 sm:$0xff]  }
 0x156   : > { %2065 = vmatpush2.bf16.msra.mxu0 %v6466_v28  ;;  %v6580_v28 = vld [vmem:[#allocation8 + $0x110] ss:$8 sps:$4 sm:$0xff]  }
 0x157   : > { %2110 = vmatpush1.bf16.msra.mxu1 %v6463_v27  ;;  %2066 = vmatprep.subr.bf16.mxu0 %v6474_v32  ;;  %v6543_v27 = vld [vmem:[#allocation8 + $0xe4] ss:$8 sps:$4 sm:$0xff]   ;;  %v6541_v32 = vld [vmem:[#allocation8 + $0xe0] ss:$8 sps:$4 sm:$0xff]  }
 0x158   : > { %2111 = vmatprep.subr.bf16.mxu1 %v6471_v29  ;;  %v6585_v29 = vld [vmem:[#allocation8 + $0x104] ss:$8 sps:$4 sm:$0xff]  }
 0x15a   : > { %2067 = vmatpush2.bf16.msra.mxu0 %v6472_v33  ;;  %v6583_v33 = vld [vmem:[#allocation8 + $0x100] ss:$8 sps:$4 sm:$0xff]  }
 0x15b   : > { %2112 = vmatpush1.bf16.msra.mxu1 %v6469_v52  ;;  %2068 = vmatprep.subr.bf16.mxu0 %v6480_v36  ;;  %v6546_v52 = vld [vmem:[#allocation8 + $0xd4] ss:$8 sps:$4 sm:$0xff]   ;;  %v6544_v36 = vld [vmem:[#allocation8 + $0xd0] ss:$8 sps:$4 sm:$0xff]  }
 0x15c   : > { %2113 = vmatprep.subr.bf16.mxu1 %v6477_v34  ;;  %v6588_v34 = vld [vmem:[#allocation8 + $0x1f4] ss:$8 sps:$4 sm:$0xff]  }
 0x15e   : > { %2069 = vmatpush2.bf16.msra.mxu0 %v6478_v38  ;;  %v6586_v38 = vld [vmem:[#allocation8 + $0x1f0] ss:$8 sps:$4 sm:$0xff]  }
 0x15f   : > { %2114 = vmatpush2.bf16.msra.mxu1 %v6475_v37  ;;  %2070 = vmatprep.subr.bf16.mxu0 %v6486_v41  ;;  %v6549_v37 = vld [vmem:[#allocation8 + $0xc4] ss:$8 sps:$4 sm:$0xff]   ;;  %v6552_v41 = vld [vmem:[#allocation8 + $0xb4] ss:$8 sps:$4 sm:$0xff]  }
 0x160   : > { %2115 = vmatprep.subr.bf16.mxu1 %v6483_v40  ;;  %v6547_v40 = vld [vmem:[#allocation8 + $0xc0] ss:$8 sps:$4 sm:$0xff]  }
 0x162   : > { %2071 = vmatpush2.bf16.msra.mxu0 %v6484_v44  ;;  %v6555_v44 = vld [vmem:[#allocation8 + $0xa4] ss:$8 sps:$4 sm:$0xff]  }
 0x163   : > { %2116 = vmatpush2.bf16.msra.mxu1 %v6481_v42  ;;  %2072 = vmatprep.subr.bf16.mxu0 %v6492_v46  ;;  %v6550_v42 = vld [vmem:[#allocation8 + $0xb0] ss:$8 sps:$4 sm:$0xff]   ;;  %v6558_v46 = vld [vmem:[#allocation8 + $0x94] ss:$8 sps:$4 sm:$0xff]  }
 0x164   : > { %2117 = vmatprep.subr.bf16.mxu1 %v6489_v45  ;;  %v6553_v45 = vld [vmem:[#allocation8 + $0xa0] ss:$8 sps:$4 sm:$0xff]  }
 0x166   : > { %2073 = vmatpush2.bf16.msra.mxu0 %v6490_v48  ;;  %v6589_v48 = vld [vmem:[#allocation8 + $0x1e0] ss:$8 sps:$4 sm:$0xff]  }
 0x167   : > { %2118 = vmatpush2.bf16.msra.mxu1 %v6487_v47  ;;  %2074 = vmatprep.subr.bf16.mxu0 %v6498_v51  ;;  %v6591_v47 = vld [vmem:[#allocation8 + $0x1e4] ss:$8 sps:$4 sm:$0xff]  }
 0x168   : > { %2119 = vmatprep.subr.bf16.mxu1 %v6495_v49  ;;  %v6556_v49 = vld [vmem:[#allocation8 + $0x90] ss:$8 sps:$4 sm:$0xff]   ;;  %v6561_v51 = vld [vmem:[#allocation8 + $0x84] ss:$8 sps:$4 sm:$0xff]  }
 0x16a   : > { %2075 = vmatpush2.bf16.msra.mxu0 %v6496_v56  ;;  %v6592_v56 = vld [vmem:[#allocation8 + $0x1d0] ss:$8 sps:$4 sm:$0xff]  }
 0x16b   : > { %2120 = vmatpush2.bf16.msra.mxu1 %v6493_v55  ;;  %2164 = vmatprep.subr.bf16.mxu0 %v6504_v58  ;;  %v6594_v55 = vld [vmem:[#allocation8 + $0x1d4] ss:$8 sps:$4 sm:$0xff]   ;;  %v6597_v58 = vld [vmem:[#allocation8 + $0x1c4] ss:$8 sps:$4 sm:$0xff]  }
 0x16c   : > { %2121 = vmatprep.subr.bf16.mxu1 %v6501_v57  ;;  %v6559_v57 = vld [vmem:[#allocation8 + $0x80] ss:$8 sps:$4 sm:$0xff]  }
 0x16d   : > { %2077 = vmatmul.mubr.bf16.vlgmr.msra.gmra.mxu0 %v7682_v16  ;;  %v6519_v16 = vld [vmem:[#allocation8 + $0x64] ss:$8 sps:$4 sm:$0xff]  }
 0x16e   : > { %2165 = vmatpush1.bf16.msra.mxu0 %v6502_v61  ;;  %2086 = vmatprep.mubr.bf16.mxu0 %v7687_v23  ;;  %v6517_v23 = vld [vmem:[#allocation8 + $0x60] ss:$8 sps:$4 sm:$0xff]   ;;  %v6600_v61 = vld [vmem:[#allocation8 + $0x1b4] ss:$8 sps:$4 sm:$0xff]  }
 0x16f   : > { %2122 = vmatpush2.bf16.msra.mxu1 %v6499_v60  ;;  %2623 = vmatprep.subr.bf16.mxu0 %v6516_v1  ;;  %v6595_v60 = vld [vmem:[#allocation8 + $0x1c0] ss:$8 sps:$4 sm:$0xff]  }
 0x170   : > { %2123 = vmatprep.subr.bf16.mxu1 %v6507_v63  ;;  %v6598_v63 = vld [vmem:[#allocation8 + $0x1b0] ss:$8 sps:$4 sm:$0xff]   ;;  %v6601_v1 = vld [vmem:[#allocation8 + $0x1a0] ss:$8 sps:$4 sm:$0xff]  }
 0x173   : > { %2124 = vmatpush2.bf16.msra.mxu1 %v6505_v0  ;;  %v6603_v0 = vld [vmem:[#allocation8 + $0x1a4] ss:$8 sps:$4 sm:$0xff]  }
 0x174   : > { %2125 = vmatprep.subr.bf16.mxu1 %v6510_v2 }
 0x175   : > { %2087 = vmatmul.mubr.bf16.gmra.mxu0 %v7699_v31  ;;  %v6520_v31 = vld [vmem:[#allocation8 + $0x50] ss:$8 sps:$4 sm:$0xff]  }
 0x176   : > { %2182 = vmatprep.mubr.bf16.mxu0 %v7355_v35 }
 0x177   : > { %2126 = vmatpush2.bf16.msra.mxu1 %v6508_v3  ;;  %v6606_v3 = vld [vmem:[#allocation8 + $0x194] ss:$8 sps:$4 sm:$0xff]  }
 0x178   : > { %2127 = vmatprep.subr.bf16.mxu1 %v6513_v4  ;;  %v6604_v4 = vld [vmem:[#allocation8 + $0x190] ss:$8 sps:$4 sm:$0xff]  }
 0x17b   : > { %2128 = vmatpush2.bf16.msra.mxu1 %v6511_v5 }
 0x17c   : > { %2676 = vmatprep.subr.bf16.mxu1 %v6564_v9 }
 0x17d   : > { %5673 = vmatmul.mubr.msk.bf16.vlgmr.msra.gmra.mxu0 %vm1772_vm0, %v7706_v39  ;;  %v6567_v39 = vld [vmem:[#allocation8 + $0x164] ss:$8 sps:$4 sm:$0xff]  }
 0x17e   : > { %2130 = vmatmul.mubr.bf16.vlgmr.msra.gmra.mxu1 %v7725_v43  ;;  %2192 = vmatprep.mubr.bf16.mxu0 %v7355_v35  ;;  %v6562_v43 = vld [vmem:[#allocation8 + $0x170] ss:$8 sps:$4 sm:$0xff]  }
 0x17f   : > { %2139 = vmatprep.mubr.bf16.mxu1 %v7729_v50  ;;  %2624 = vmatpush1.bf16.msra.mxu0 %v6514_v6  ;;  %v6528_v50 = vld [vmem:[#allocation8 + $0x34] ss:$8 sps:$4 sm:$0xff]   ;;  %v6609_v6 = vld [vmem:[#allocation8 + $0x184] ss:$8 sps:$4 sm:$0xff]  }
 0x180   : > { %2625 = vmatprep.subr.bf16.mxu0 %v6519_v16  ;;  %2677 = vmatpush1.bf16.msra.mxu1 %v6562_v43  ;;  %v6607_v16 = vld [vmem:[#allocation8 + $0x180] ss:$8 sps:$4 sm:$0xff]  }
 0x181   : > { %2678 = vmatprep.subr.bf16.mxu1 %v6567_v39 }
 0x183   : > { %2626 = vmatpush1.bf16.msra.mxu0 %v6517_v23 }
 0x184   : > { %2627 = vmatprep.subr.bf16.mxu0 %v6522_v7  ;;  %2679 = vmatpush1.bf16.msra.mxu1 %v6565_v10 }
 0x185   : > { %5674 = vmatmul.mubr.msk.bf16.gmra.mxu0 %vm1772_vm0, %v7718_v62  ;;  %v6529_v62 = vld [vmem:[#allocation8 + $0x20] ss:$8 sps:$4 sm:$0xff]   ;;  %2680 = vmatprep.subr.bf16.mxu1 %v6570_v11 }
 0x186   : > { %2140 = vmatmul.mubr.bf16.gmra.mxu1 %v7735_v59  ;;  %v6573_v59 = vld [vmem:[#allocation8 + $0x144] ss:$8 sps:$4 sm:$0xff]  }
 0x187   : > { %2628 = vmatpush1.bf16.msra.mxu0 %v6520_v31 }
 0x188   : > { %2629 = vmatprep.subr.bf16.mxu0 %v6525_v8  ;;  %2681 = vmatpush1.bf16.msra.mxu1 %v6568_v13 }
 0x189   : > { %2682 = vmatprep.subr.bf16.mxu1 %v6573_v59 }
 0x18b   : > { %2630 = vmatpush1.bf16.msra.mxu0 %v6523_v53  ;;  %v772_v53 = vlaneseq }
 0x18c   : > { %2631 = vmatprep.subr.bf16.mxu0 %v6528_v50  ;;  %2683 = vmatpush1.bf16.msra.mxu1 %v6571_v14  ;;  %v7767_v14 = vld [vmem:[%s7987_s3] sm:$0xf] }
 0x18d   : > { %2684 = vmatprep.subr.bf16.mxu1 %v6576_v17  ;;  %v7756_v11 = vshrl.u32 %v772_v53, 7 }
 0x18f   : > { %2632 = vmatpush1.bf16.msra.mxu0 %v6526_v54  ;;  %v7759_v13 = vsub.s32 1, %v7756_v11  ;;  %v7762_v59 = vsub.s32 0, %v7756_v11 }
 0x190   : > { %2633 = vmatprep.subr.bf16.mxu0 %v6531_v12  ;;  %2685 = vmatpush1.bf16.msra.mxu1 %v6574_v20 }
 0x191   : > { %2686 = vmatprep.subr.bf16.mxu1 %v6579_v21  ;;  %v779_v17 = vrot.slane %v7767_v14, %v7759_v13 }
 0x193   : > { %2634 = vmatpush1.bf16.msra.mxu0 %v6529_v62 }
 0x194   : > { %2635 = vmatprep.subr.bf16.mxu0 %v6534_v15  ;;  %2687 = vmatpush1.bf16.msra.mxu1 %v6577_v30 }
 0x195   : > { %2688 = vmatprep.subr.bf16.mxu1 %v6582_v25 }
 0x197   : > { %2636 = vmatpush1.bf16.msra.mxu0 %v6532_v18  ;;  %v775_v18 = vrot.slane %v7767_v14, %v7762_v59 }
 0x198   : > { %2637 = vmatprep.subr.bf16.mxu0 %v6537_v19  ;;  %2689 = vmatpush1.bf16.msra.mxu1 %v6580_v28 }
 0x199   : > { %2690 = vmatprep.subr.bf16.mxu1 %v6585_v29 }
 0x19b   : > { %2638 = vmatpush1.bf16.msra.mxu0 %v6535_v22 }
 0x19c   : > { %2639 = vmatprep.subr.bf16.mxu0 %v6540_v24  ;;  %2691 = vmatpush1.bf16.msra.mxu1 %v6583_v33 }
 0x19d   : > { %2692 = vmatprep.subr.bf16.mxu1 %v6588_v34 }
 0x19f   : > { %2640 = vmatpush2.bf16.msra.mxu0 %v6538_v26 }
 0x1a0   : > { %2641 = vmatprep.subr.bf16.mxu0 %v6543_v27  ;;  %2693 = vmatpush2.bf16.msra.mxu1 %v6586_v38 }
 0x1a1   : > { %2694 = vmatprep.subr.bf16.mxu1 %v6591_v47 }
 0x1a3   : > { %2642 = vmatpush2.bf16.msra.mxu0 %v6541_v32 }
 0x1a4   : > { %2643 = vmatprep.subr.bf16.mxu0 %v6546_v52  ;;  %2695 = vmatpush2.bf16.msra.mxu1 %v6589_v48 }
 0x1a5   : > { %2696 = vmatprep.subr.bf16.mxu1 %v6594_v55 }
 0x1a7   : > { %2644 = vmatpush2.bf16.msra.mxu0 %v6544_v36 }
 0x1a8   : > { %2645 = vmatprep.subr.bf16.mxu0 %v6549_v37  ;;  %2697 = vmatpush2.bf16.msra.mxu1 %v6592_v56 }
 0x1a9   : > { %2698 = vmatprep.subr.bf16.mxu1 %v6597_v58 }
 0x1ab   : > { %2646 = vmatpush2.bf16.msra.mxu0 %v6547_v40 }
 0x1ac   : > { %2647 = vmatprep.subr.bf16.mxu0 %v6552_v41  ;;  %2699 = vmatpush2.bf16.msra.mxu1 %v6595_v60 }
 0x1ad   : > { %2700 = vmatprep.subr.bf16.mxu1 %v6600_v61  ;;  %v1813_v7 = vpop.f32.mrf.mxu0 }
 0x1ae   : > { %v1866_v2 = vpop.f32.mrf.mxu1  ;;  %v1814_v22 = vadd.f32 %v1813_v7, %v775_v18 }
 0x1af   : > { %2648 = vmatpush2.bf16.msra.mxu0 %v6550_v42  ;;  %v1815_v8 = vpop.f32.mrf.mxu0 }
 0x1b0   : > { %2649 = vmatprep.subr.bf16.mxu0 %v6555_v44  ;;  %2701 = vmatpush2.bf16.msra.mxu1 %v6598_v63  ;;  %v1868_v5 = vpop.f32.mrf.mxu1  ;;  %v1816_v21 = vadd.f32 %v1815_v8, %v779_v17  ;;  %v1867_v29 = vadd.f32 %v1866_v2, %v1814_v22 }
 0x1b1   : > { %2702 = vmatprep.subr.bf16.mxu1 %v6603_v0  ;;  %v1817_v9 = vpop.f32.mrf.mxu0 }
 0x1b2   : > { %v1870_v23 = vpop.f32.mrf.mxu1  ;;  %v1818_v25 = vadd.f32 %v1817_v9, %v775_v18  ;;  %v1869_v27 = vadd.f32 %v1868_v5, %v1816_v21 }
 0x1b3   : > { %2650 = vmatpush2.bf16.msra.mxu0 %v6553_v45  ;;  %v1819_v50 = vpop.f32.mrf.mxu0 }
 0x1b4   : > { %2651 = vmatprep.subr.bf16.mxu0 %v6558_v46  ;;  %2703 = vmatpush2.bf16.msra.mxu1 %v6601_v1  ;;  %v1872_v31 = vpop.f32.mrf.mxu1  ;;  %v1820_v28 = vadd.f32 %v1819_v50, %v779_v17  ;;  %v1871_v33 = vadd.f32 %v1870_v23, %v1818_v25 }
 0x1b5   : > { %2704 = vmatprep.subr.bf16.mxu1 %v6606_v3  ;;  %v1823_v54 = vpop.f32.mrf.mxu0 }
 0x1b6   : > { %v1876_v43 = vpop.f32.mrf.mxu1  ;;  %v1873_v40 = vadd.f32 %v1872_v31, %v1820_v28  ;;  %v1824_v44 = vadd.f32 %v1823_v54, %v775_v18 }
 0x1b7   : > { %2652 = vmatpush2.bf16.msra.mxu0 %v6556_v49  ;;  %v1825_v62 = vpop.f32.mrf.mxu0 }
 0x1b8   : > { %2653 = vmatprep.subr.bf16.mxu0 %v6561_v51  ;;  %2705 = vmatpush2.bf16.msra.mxu1 %v6604_v4  ;;  %v1878_v39 = vpop.f32.mrf.mxu1  ;;  %v1826_v41 = vadd.f32 %v1825_v62, %v779_v17  ;;  %v1877_v61 = vadd.f32 %v1876_v43, %v1824_v44 }
 0x1b9   : > { %2706 = vmatprep.subr.bf16.mxu1 %v6609_v6  ;;  %v1827_v19 = vpop.f32.mrf.mxu0 }
 0x1ba   : > { %v1880_v10 = vpop.f32.mrf.mxu1  ;;  %v1828_v46 = vadd.f32 %v1827_v19, %v775_v18 }
 0x1bb   : > { %2654 = vmatpush2.bf16.msra.mxu0 %v6559_v57  ;;  %v1829_v24 = vpop.f32.mrf.mxu0  ;;  %v1879_v57 = vadd.f32 %v1878_v39, %v1826_v41 }
 0x1bc   : > { %2707 = vmatpush2.bf16.msra.mxu1 %v6607_v16  ;;  %v1882_v12 = vpop.f32.mrf.mxu1  ;;  %v1830_v58 = vadd.f32 %v1829_v24, %v779_v17  ;;  %v1881_v1 = vadd.f32 %v1880_v10, %v1828_v46 }
 0x1be   : > { %v1972_v15 = vpop.f32.mrf.mxu1  ;;  %v1883_v7 = vadd.f32 %v1882_v12, %v1830_v58 }
 0x1c0   : > { %v1974_v20 = vpop.f32.mrf.mxu1 }
 0x1c2   : > { %v1976_v30 = vpop.f32.mrf.mxu1 }
 0x1c4   : > { %v1978_v32 = vpop.f32.mrf.mxu1 }
 0x1c6   : > { %v1982_v37 = vpop.f32.mrf.mxu1 }
 0x1c8   : > { %v1984_v55 = vpop.f32.mrf.mxu1 }
 0x1ca   : > { %v1986_v6 = vpop.f32.mrf.mxu1 }
 0x1ed   : > { %v1919_v26 = vpop.f32.mrf.mxu0 }
 0x1ee   : > { %v1920_v36 = vadd.f32 %v1919_v26, %v1867_v29 }
 0x1ef   : > { %v1921_v52 = vpop.f32.mrf.mxu0 }
 0x1f0   : > { %v1922_v34 = vadd.f32 %v1921_v52, %v1869_v27  ;;  %v1973_v51 = vadd.f32 %v1972_v15, %v1920_v36  ;;  %v1988_v15 = vpop.f32.mrf.mxu1 }
 0x1f1   : > { %v1923_v38 = vpop.f32.mrf.mxu0 }
 0x1f2   : > { %v1924_v42 = vadd.f32 %v1923_v38, %v1871_v33  ;;  %v1975_v47 = vadd.f32 %v1974_v20, %v1922_v34  ;;  %v2203_v5 = vmax.f32 %v1973_v51, 0.0  ;;  %v7775_v33 = vsub.s32 3, %v7756_v11 }
 0x1f3   : > { %v1925_v45 = vpop.f32.mrf.mxu0  ;;  %v7778_v34 = vsub.s32 2, %v7756_v11 }
 0x1f4   : > { %v1977_v48 = vadd.f32 %v1976_v30, %v1924_v42  ;;  %v1926_v49 = vadd.f32 %v1925_v45, %v1873_v40  ;;  %v2204_v2 = vmax.f32 %v1975_v47, 0.0  ;;  %v787_v40 = vrot.slane %v7767_v14, %v7775_v33 }
 0x1f5   : > { %v1929_v56 = vpop.f32.mrf.mxu0  ;;  %v783_v41 = vrot.slane %v7767_v14, %v7778_v34 }
 0x1f6   : > { %v1979_v60 = vadd.f32 %v1978_v32, %v1926_v49  ;;  %v2207_v63 = vmax.f32 %v1977_v48, 0.0  ;;  %v1930_v16 = vadd.f32 %v1929_v56, %v1877_v61 }
 0x1f7   : > { %v1931_v0 = vpop.f32.mrf.mxu0 }
 0x1f8   : > { %v2208_v3 = vmax.f32 %v1979_v60, 0.0  ;;  %v1932_v4 = vadd.f32 %v1931_v0, %v1879_v57  ;;  %v2219_v9 = vpack.c.bf16 %v2207_v63, %v2203_v5  ;;  %v1983_v43 = vadd.f32 %v1982_v37, %v1930_v16 }
 0x1f9   : > { %v1933_v23 = vpop.f32.mrf.mxu0 }
 0x1fa   : > { %v1934_v31 = vadd.f32 %v1933_v23, %v1881_v1  ;;  %v2220_v8 = vpack.c.bf16 %v2208_v3, %v2204_v2  ;;  %v1985_v54 = vadd.f32 %v1984_v55, %v1932_v4  ;;  %v2211_v20 = vmax.f32 %v1983_v43, 0.0 }
 0x1fb   : > { %v1935_v50 = vpop.f32.mrf.mxu0 }
 0x1fc   : > { %v1987_v39 = vadd.f32 %v1986_v6, %v1934_v31  ;;  %v1936_v62 = vadd.f32 %v1935_v50, %v1883_v7  ;;  %2655 = vmatprep.mubr.bf16.mxu0 %v2220_v8  ;;  %v2212_v18 = vmax.f32 %v1985_v54, 0.0 }
 0x1fd   : > { %2656 = vmatmul.mubr.bf16.vlgmr.msra.gmra.mxu0 %v2219_v9 }
 0x1fe   : > { %v1989_v10 = vadd.f32 %v1988_v15, %v1936_v62  ;;  %v2215_v17 = vmax.f32 %v1987_v39, 0.0  ;;  %v2025_v12 = vpop.f32.mrf.mxu1 }
 0x1ff   : > { %v2026_v47 = vadd.f32 %v2025_v12, %v783_v41 }
 0x200   : > { %v2216_v19 = vmax.f32 %v1989_v10, 0.0  ;;  %v2223_v22 = vpack.c.bf16 %v2215_v17, %v2211_v20  ;;  %v2027_v24 = vpop.f32.mrf.mxu1 }
 0x201   : > { %v2028_v46 = vadd.f32 %v2027_v24, %v787_v40 }
 0x202   : > { %v2224_v21 = vpack.c.bf16 %v2216_v19, %v2212_v18  ;;  %v2029_v30 = vpop.f32.mrf.mxu1 }
 0x203   : > { %v2030_v51 = vadd.f32 %v2029_v30, %v783_v41 }
 0x204   : > { %2665 = vmatprep.mubr.bf16.mxu0 %v2224_v21  ;;  %v2031_v25 = vpop.f32.mrf.mxu1 }
 0x205   : > { %2666 = vmatmul.mubr.bf16.gmra.mxu0 %v2223_v22  ;;  %v2032_v60 = vadd.f32 %v2031_v25, %v787_v40 }
 0x206   : > { %3001 = vmatprep.mubr.bf16.mxu0 %v7355_v35  ;;  %v2035_v27 = vpop.f32.mrf.mxu1 }
 0x207   : > { %v2036_v5 = vadd.f32 %v2035_v27, %v783_v41 }
 0x208   : > { %v2037_v32 = vpop.f32.mrf.mxu1 }
 0x209   : > { %v2038_v3 = vadd.f32 %v2037_v32, %v787_v40 }
 0x20a   : > { %v2039_v37 = vpop.f32.mrf.mxu1 }
 0x20b   : > { %v2040_v54 = vadd.f32 %v2039_v37, %v783_v41 }
 0x20c   : > { %v2041_v44 = vpop.f32.mrf.mxu1 }
 0x20d   : > { %v2042_v43 = vadd.f32 %v2041_v44, %v787_v40 }
 0x22d   : > { %v2078_v26 = vpop.f32.mrf.mxu0 }
 0x22e   : > { %v2079_v56 = vadd.f32 %v2078_v26, %v2026_v47 }
 0x22f   : > { %v2080_v28 = vpop.f32.mrf.mxu0 }
 0x230   : > { %v2081_v55 = vadd.f32 %v2080_v28, %v2028_v46 }
 0x231   : > { %v2082_v29 = vpop.f32.mrf.mxu0 }
 0x232   : > { %v2083_v61 = vadd.f32 %v2082_v29, %v2030_v51  ;;  %v6615_v51 = vld [vmem:[#allocation10 + $0xec] ss:$16 sps:$4 sm:$0xff]  }
 0x233   : > { %v2084_v52 = vpop.f32.mrf.mxu0  ;;  %3022 = vmatprep.subr.bf16.mxu1 %v6615_v51 }
 0x234   : > { %v2085_v14 = vadd.f32 %v2084_v52, %v2032_v60  ;;  %v6616_v60 = vld [vmem:[#allocation10 + $0xc0] ss:$16 sps:$4 sm:$0xff]  }
 0x235   : > { %v2088_v36 = vpop.f32.mrf.mxu0 }
 0x236   : > { %v2089_v15 = vadd.f32 %v2088_v36, %v2036_v5  ;;  %v6631_v5 = vld [vmem:[#allocation10 + $0x88] ss:$16 sps:$4 sm:$0xff]  }
 0x237   : > { %v2090_v38 = vpop.f32.mrf.mxu0 }
 0x238   : > { %v2091_v39 = vadd.f32 %v2090_v38, %v2038_v3  ;;  %v6630_v3 = vld [vmem:[#allocation10 + $0x84] ss:$16 sps:$4 sm:$0xff]  }
 0x239   : > { %v2092_v42 = vpop.f32.mrf.mxu0 }
 0x23a   : > { %v2093_v19 = vadd.f32 %v2092_v42, %v2040_v54  ;;  %v6648_v54 = vld [vmem:[#allocation10 + $0x24] ss:$16 sps:$4 sm:$0xff]  }
 0x23b   : > { %v2094_v45 = vpop.f32.mrf.mxu0 }
 0x23c   : > { %v2095_v26 = vadd.f32 %v2094_v45, %v2042_v43  ;;  %v6612_v45 = vld [vmem:[#allocation10 + $0xe4] ss:$16 sps:$4 sm:$0xff]   ;;  %v6651_v43 = vld [vmem:[#allocation10 + $0x2c] ss:$16 sps:$4 sm:$0xff]  }
 0x23d   : > { %v2184_v49 = vpop.f32.mrf.mxu0  ;;  %2969 = vmatprep.subr.bf16.mxu0 %v6612_v45 }
 0x23e   : > { %v2131_v48 = vpop.f32.mrf.mxu1 }
 0x23f   : > { %v2186_v58 = vpop.f32.mrf.mxu0  ;;  %v2132_v0 = vadd.f32 %v2131_v48, %v2079_v56  ;;  %v6613_v56 = vld [vmem:[#allocation10 + $0xe8] ss:$16 sps:$4 sm:$0xff]  }
 0x240   : > { %v2133_v57 = vpop.f32.mrf.mxu1 }
 0x241   : > { %v2134_v63 = vadd.f32 %v2133_v57, %v2081_v55  ;;  %v2188_v2 = vpop.f32.mrf.mxu0  ;;  %v2185_v8 = vadd.f32 %v2184_v49, %v2132_v0  ;;  %v6610_v55 = vld [vmem:[#allocation10 + $0xe0] ss:$16 sps:$4 sm:$0xff]   ;;  %v6618_v57 = vld [vmem:[#allocation10 + $0xc4] ss:$16 sps:$4 sm:$0xff]   ;;  %v6627_v0 = vld [vmem:[#allocation10 + $0xac] ss:$16 sps:$4 sm:$0xff]  }
 0x242   : > { %v2135_v1 = vpop.f32.mrf.mxu1  ;;  %2970 = vmatpush1.bf16.msra.mxu0 %v6610_v55 }
 0x243   : > { %v2136_v4 = vadd.f32 %v2135_v1, %v2083_v61  ;;  %v2190_v16 = vpop.f32.mrf.mxu0  ;;  %v2187_v23 = vadd.f32 %v2186_v58, %v2134_v63  ;;  %v2205_v12 = vmax.f32 %v2185_v8, 0.0  ;;  %v6621_v58 = vld [vmem:[#allocation10 + $0xcc] ss:$16 sps:$4 sm:$0xff]   ;;  %v6619_v61 = vld [vmem:[#allocation10 + $0xc8] ss:$16 sps:$4 sm:$0xff]   ;;  %2971 = vmatprep.subr.bf16.mxu0 %v6618_v57 }
 0x244   : > { %v2137_v6 = vpop.f32.mrf.mxu1  ;;  %v6624_v63 = vld [vmem:[#allocation10 + $0xa4] ss:$16 sps:$4 sm:$0xff]   ;;  %v6622_v1 = vld [vmem:[#allocation10 + $0xa0] ss:$16 sps:$4 sm:$0xff]   ;;  %v6645_v8 = vld [vmem:[#allocation10 + $0x4c] ss:$16 sps:$4 sm:$0xff]  }
 0x245   : > { %v2189_v7 = vadd.f32 %v2188_v2, %v2136_v4  ;;  %v2138_v31 = vadd.f32 %v2137_v6, %v2085_v14  ;;  %v2194_v50 = vpop.f32.mrf.mxu0  ;;  %v2206_v20 = vmax.f32 %v2187_v23, 0.0  ;;  %v6625_v2 = vld [vmem:[#allocation10 + $0xa8] ss:$16 sps:$4 sm:$0xff]   ;;  %v6633_v14 = vld [vmem:[#allocation10 + $0x8c] ss:$16 sps:$4 sm:$0xff]  }
 0x246   : > { %v2141_v9 = vpop.f32.mrf.mxu1  ;;  %2972 = vmatpush1.bf16.msra.mxu0 %v6616_v60  ;;  %v6628_v4 = vld [vmem:[#allocation10 + $0x80] ss:$16 sps:$4 sm:$0xff]   ;;  %v6636_v6 = vld [vmem:[#allocation10 + $0x64] ss:$16 sps:$4 sm:$0xff]  }
 0x247   : > { %v2191_v62 = vadd.f32 %v2190_v16, %v2138_v31  ;;  %v2209_v10 = vmax.f32 %v2189_v7, 0.0  ;;  %v2196_v18 = vpop.f32.mrf.mxu0  ;;  %v2142_v24 = vadd.f32 %v2141_v9, %v2089_v15  ;;  %2973 = vmatprep.subr.bf16.mxu0 %v6624_v63  ;;  %v6639_v16 = vld [vmem:[#allocation10 + $0x6c] ss:$16 sps:$4 sm:$0xff]   ;;  %v6634_v23 = vld [vmem:[#allocation10 + $0x60] ss:$16 sps:$4 sm:$0xff]  }
 0x248   : > { %v2143_v17 = vpop.f32.mrf.mxu1  ;;  %v6637_v7 = vld [vmem:[#allocation10 + $0x68] ss:$16 sps:$4 sm:$0xff]   ;;  %v6642_v31 = vld [vmem:[#allocation10 + $0x44] ss:$16 sps:$4 sm:$0xff]   ;;  %v6640_v9 = vld [vmem:[#allocation10 + $0x40] ss:$16 sps:$4 sm:$0xff]  }
 0x249   : > { %v2210_v21 = vmax.f32 %v2191_v62, 0.0  ;;  %v2144_v22 = vadd.f32 %v2143_v17, %v2091_v39  ;;  %v2198_v25 = vpop.f32.mrf.mxu0  ;;  %v2221_v29 = vpack.c.bf16 %v2209_v10, %v2205_v12  ;;  %v2195_v40 = vadd.f32 %v2194_v50, %v2142_v24  ;;  %v6643_v50 = vld [vmem:[#allocation10 + $0x48] ss:$16 sps:$4 sm:$0xff]   ;;  %v6646_v39 = vld [vmem:[#allocation10 + $0x20] ss:$16 sps:$4 sm:$0xff]  }
 0x24a   : > { %v2145_v30 = vpop.f32.mrf.mxu1  ;;  %2974 = vmatpush1.bf16.msra.mxu0 %v6622_v1  ;;  %v6649_v62 = vld [vmem:[#allocation10 + $0x28] ss:$16 sps:$4 sm:$0xff]   ;;  %v6654_v15 = vld [vmem:[#allocation10 + $0x4] ss:$16 sps:$4 sm:$0xff]   ;;  %v6657_v10 = vld [vmem:[#allocation10 + $0xc] ss:$16 sps:$4 sm:$0xff]  }
 0x24b   : > { %v2222_v27 = vpack.c.bf16 %v2210_v21, %v2206_v20  ;;  %v2146_v28 = vadd.f32 %v2145_v30, %v2093_v19  ;;  %v2200_v52 = vpop.f32.mrf.mxu0  ;;  %v2197_v37 = vadd.f32 %v2196_v18, %v2144_v22  ;;  %v2213_v47 = vmax.f32 %v2195_v40, 0.0  ;;  %2975 = vmatprep.subr.bf16.mxu0 %v6630_v3  ;;  %v6652_v17 = vld [vmem:[#allocation10] ss:$16 sps:$4 sm:$0xff]   ;;  %v6655_v18 = vld [vmem:[#allocation10 + $0x8] ss:$16 sps:$4 sm:$0xff]  }
 0x24c   : > { %v2147_v32 = vpop.f32.mrf.mxu1  ;;  %v6660_v19 = vld [vmem:[#allocation13 + $0x18c] ss:$28 sps:$4 sm:$0xff]   ;;  %v2291_v24 = vld [vmem:[%s7989_s5] sm:$0x3] }
 0x24d   : > { %v2148_v38 = vadd.f32 %v2147_v32, %v2095_v26  ;;  %v2199_v36 = vadd.f32 %v2198_v25, %v2146_v28  ;;  %2708 = vmatprep.mubr.bf16.mxu1 %v2222_v27  ;;  %v2214_v44 = vmax.f32 %v2197_v37, 0.0  ;;  %v6663_v20 = vld [vmem:[#allocation13 + $0x50c] ss:$28 sps:$4 sm:$0xff]   ;;  %v2296_v25 = vrot.slane %v2291_v24, %v7762_v59 }
 0x24e   : > { %2709 = vmatmul.mubr.bf16.vlgmr.msra.gmra.mxu1 %v2221_v29  ;;  %2976 = vmatpush1.bf16.msra.mxu0 %v6628_v4  ;;  %v2300_v26 = vrot.slane %v2291_v24, %v7759_v13 }
 0x24f   : > { %v2201_v41 = vadd.f32 %v2200_v52, %v2148_v38  ;;  %v2217_v42 = vmax.f32 %v2199_v36, 0.0  ;;  %3023 = vmatpush1.bf16.msra.mxu1 %v6613_v56  ;;  %2977 = vmatprep.subr.bf16.mxu0 %v6636_v6 }
 0x250   : > { %3024 = vmatprep.subr.bf16.mxu1 %v6621_v58 }
 0x251   : > { %v2218_v46 = vmax.f32 %v2201_v41, 0.0  ;;  %v2225_v49 = vpack.c.bf16 %v2217_v42, %v2213_v47 }
 0x252   : > { %2978 = vmatpush1.bf16.msra.mxu0 %v6634_v23 }
 0x253   : > { %v2226_v48 = vpack.c.bf16 %v2218_v46, %v2214_v44  ;;  %3025 = vmatpush1.bf16.msra.mxu1 %v6619_v61  ;;  %2979 = vmatprep.subr.bf16.mxu0 %v6642_v31 }
 0x254   : > { %3026 = vmatprep.subr.bf16.mxu1 %v6627_v0 }
 0x255   : > { %2718 = vmatprep.mubr.bf16.mxu1 %v2226_v48 }
 0x256   : > { %2719 = vmatmul.mubr.bf16.gmra.mxu1 %v2225_v49  ;;  %2980 = vmatpush1.bf16.msra.mxu0 %v6640_v9  ;;  %v2742_v9 = vld [vmem:[%s7645_s30 + $0x8] sm:$0xff] }
 0x257   : > { %3054 = vmatprep.mubr.bf16.mxu1 %v7355_v35  ;;  %3027 = vmatpush1.bf16.msra.mxu1 %v6625_v2 }
 0x258   : > { %3028 = vmatprep.subr.bf16.mxu1 %v6633_v14  ;;  %2981 = vmatprep.subr.bf16.mxu0 %v6648_v54 }
 0x25a   : > { %2982 = vmatpush1.bf16.msra.mxu0 %v6646_v39 }
 0x25b   : > { %3029 = vmatpush1.bf16.msra.mxu1 %v6631_v5  ;;  %2983 = vmatprep.subr.bf16.mxu0 %v6654_v15 }
 0x25c   : > { %3030 = vmatprep.subr.bf16.mxu1 %v6639_v16 }
 0x25e   : > { %2984 = vmatpush1.bf16.msra.mxu0 %v6652_v17 }
 0x25f   : > { %3031 = vmatpush1.bf16.msra.mxu1 %v6637_v7  ;;  %4544 = vmatprep.subr.bf16.mxu0 %v6660_v19  ;;  %v6661_v19 = vld [vmem:[#allocation13 + $0x508] ss:$28 sps:$4 sm:$0xff]  }
 0x260   : > { %3032 = vmatprep.subr.bf16.mxu1 %v6645_v8  ;;  %v2741_v8 = vld [vmem:[%s7645_s30] sm:$0xff] }
 0x263   : > { %3033 = vmatpush1.bf16.msra.mxu1 %v6643_v50 }
 0x264   : > { %3034 = vmatprep.subr.bf16.mxu1 %v6651_v43 }
 0x267   : > { %3035 = vmatpush1.bf16.msra.mxu1 %v6649_v62 }
 0x268   : > { %3036 = vmatprep.subr.bf16.mxu1 %v6657_v10  ;;  %v2743_v10 = vld [vmem:[%s7645_s30 + $0x10] sm:$0xff] }
 0x26b   : > { %3037 = vmatpush1.bf16.msra.mxu1 %v6655_v18  ;;  %v6658_v18 = vld [vmem:[#allocation13 + $0x188] ss:$28 sps:$4 sm:$0xff]  }
 0x26c   : > { %4597 = vmatprep.subr.bf16.mxu1 %v6663_v20  ;;  %v2744_v20 = vld [vmem:[%s7645_s30 + $0x18] sm:$0xff]  ;;  %s7356_s30 = smov [#allocation15]  }
 0x26d   : > { %s7232_s27 = sshll.u32 %s7356_s30, 4  ;;  %s7233_s27 = int_to_ptr.vmem [resolvable:$false] %s7232_s27 }
 0x26e   : > { %s7234_s12 = scalar_lea.vmem %s7233_s27, 2048  ;;  %p7235_p1 = scmp.lt.s32.totalorder %s7881_s7, %s7233_s27 }
 0x26f   : > { %p7236_p4 = scmp.lt.s32.totalorder %s7234_s12, %s7228_s29 }
 0x271   : > { %p7237_p6 = por %p7236_p4, %p7235_p1 }
 0x273   : > { %p7238_p8 = pnand %p7237_p6, %p7231_p11 }
 0x2bd   : > { %v2657_v21 = vpop.f32.mrf.mxu0 }
 0x2be   : > { %v2658_v28 = vadd.f32 %v2657_v21, %v2296_v25  ;;  %v6666_v21 = vld [vmem:[#allocation13 + $0x154] ss:$28 sps:$4 sm:$0xff]  }
 0x2bf   : > { %v2659_v22 = vpop.f32.mrf.mxu0 }
 0x2c0   : > { %v2660_v32 = vadd.f32 %v2659_v22, %v2300_v26  ;;  %v6669_v22 = vld [vmem:[#allocation13 + $0x4d4] ss:$28 sps:$4 sm:$0xff]  }
 0x2c1   : > { %v2661_v12 = vpop.f32.mrf.mxu0 }
 0x2c2   : > { %v2662_v36 = vadd.f32 %v2661_v12, %v2296_v25 }
 0x2c3   : > { %v2663_v30 = vpop.f32.mrf.mxu0 }
 0x2c4   : > { %v2664_v42 = vadd.f32 %v2663_v30, %v2300_v26 }
 0x2c5   : > { %v2667_v27 = vpop.f32.mrf.mxu0 }
 0x2c6   : > { %v2668_v49 = vadd.f32 %v2667_v27, %v2296_v25  ;;  %v6672_v27 = vld [vmem:[#allocation13 + $0x11c] ss:$28 sps:$4 sm:$0xff]  }
 0x2c7   : > { %v2669_v37 = vpop.f32.mrf.mxu0 }
 0x2c8   : > { %v2670_v56 = vadd.f32 %v2669_v37, %v2300_v26  ;;  %v6670_v37 = vld [vmem:[#allocation13 + $0x118] ss:$28 sps:$4 sm:$0xff]  }
 0x2c9   : > { %v2671_v47 = vpop.f32.mrf.mxu0 }
 0x2ca   : > { %v2672_v63 = vadd.f32 %v2671_v47, %v2296_v25  ;;  %v6664_v25 = vld [vmem:[#allocation13 + $0x150] ss:$28 sps:$4 sm:$0xff]   ;;  %v6685_v47 = vld [vmem:[#allocation13 + $0x428] ss:$28 sps:$4 sm:$0xff]  }
 0x2cb   : > { %v2673_v60 = vpop.f32.mrf.mxu0 }
 0x2cc   : > { %v2674_v3 = vadd.f32 %v2673_v60, %v2300_v26  ;;  %v6667_v26 = vld [vmem:[#allocation13 + $0x4d0] ss:$28 sps:$4 sm:$0xff]   ;;  %v6702_v60 = vld [vmem:[#allocation13 + $0x4] ss:$28 sps:$4 sm:$0xff]  }
 0x30e   : > { %v2710_v29 = vpop.f32.mrf.mxu1 }
 0x30f   : > { %v2711_v52 = vadd.f32 %v2710_v29, %v2658_v28  ;;  %v6675_v28 = vld [vmem:[#allocation13 + $0x49c] ss:$28 sps:$4 sm:$0xff]  }
 0x310   : > { %v2712_v38 = vpop.f32.mrf.mxu1 }
 0x311   : > { %5233 = vst [vmem:[%s7791_s6] sm:$0xff] %v2711_v52  ;;  %v2713_v40 = vadd.f32 %v2712_v38, %v2660_v32  ;;  %v6673_v38 = vld [vmem:[#allocation13 + $0x498] ss:$28 sps:$4 sm:$0xff]  }
 0x312   : > { %v2714_v41 = vpop.f32.mrf.mxu1 }
 0x313   : > { %v2729_v44 = vmul.f32 0.5, %v2713_v40  ;;  %5234 = vst [vmem:[%s7791_s6 + $0x8] sm:$0xff] %v2713_v40  ;;  %v2715_v46 = vadd.f32 %v2714_v41, %v2662_v36  ;;  %v6678_v36 = vld [vmem:[#allocation13 + $0xe4] ss:$28 sps:$4 sm:$0xff]  }
 0x314   : > { %v2716_v48 = vpop.f32.mrf.mxu1  ;;  %v6676_v40 = vld [vmem:[#allocation13 + $0xe0] ss:$28 sps:$4 sm:$0xff]  }
 0x315   : > { %v2733_v45 = vmul.f32 1.442695, %v2729_v44  ;;  %5235 = vst [vmem:[%s7791_s6 + $0x10] sm:$0xff] %v2715_v46  ;;  %v2717_v51 = vadd.f32 %v2716_v48, %v2664_v42  ;;  %v6679_v41 = vld [vmem:[#allocation13 + $0x460] ss:$28 sps:$4 sm:$0xff]  }
 0x316   : > { %v2720_v55 = vpop.f32.mrf.mxu1  ;;  %v6684_v42 = vld [vmem:[#allocation13 + $0xac] ss:$28 sps:$4 sm:$0xff]   ;;  %v6690_v48 = vld [vmem:[#allocation13 + $0x74] ss:$28 sps:$4 sm:$0xff]  }
 0x317   : > { %6978 = vpow2.f32 %v2733_v45  ;;  %v2730_v57 = vmul.f32 0.5, %v2717_v51  ;;  %5236 = vst [vmem:[%s7791_s6 + $0x18] sm:$0xff] %v2717_v51  ;;  %v2721_v58 = vadd.f32 %v2720_v55, %v2668_v49  ;;  %v6687_v44 = vld [vmem:[#allocation13 + $0x42c] ss:$28 sps:$4 sm:$0xff]   ;;  %v6693_v49 = vld [vmem:[#allocation13 + $0x3f4] ss:$28 sps:$4 sm:$0xff]  }
 0x318   : > { %v2722_v61 = vpop.f32.mrf.mxu1  ;;  %v6688_v45 = vld [vmem:[#allocation13 + $0x70] ss:$28 sps:$4 sm:$0xff]   ;;  %v6696_v55 = vld [vmem:[#allocation13 + $0x3c] ss:$28 sps:$4 sm:$0xff]  }
 0x319   : > { %v2735_v0 = vmul.f32 1.442695, %v2730_v57  ;;  %5237 = vst [vmem:[%s7791_s6 + $0x20] sm:$0xff] %v2721_v58  ;;  %v2723_v1 = vadd.f32 %v2722_v61, %v2670_v56  ;;  %v6691_v51 = vld [vmem:[#allocation13 + $0x3f0] ss:$28 sps:$4 sm:$0xff]  }
 0x31a   : > { %v2724_v2 = vpop.f32.mrf.mxu1  ;;  %v6699_v56 = vld [vmem:[#allocation13 + $0x3bc] ss:$28 sps:$4 sm:$0xff]   ;;  %v6705_v61 = vld [vmem:[#allocation13 + $0x384] ss:$28 sps:$4 sm:$0xff]  }
 0x31b   : > { %6980 = vpow2.f32 %v2735_v0  ;;  %v2731_v14 = vmul.f32 0.5, %v2723_v1  ;;  %5238 = vst [vmem:[%s7791_s6 + $0x28] sm:$0xff] %v2723_v1  ;;  %v2725_v4 = vadd.f32 %v2724_v2, %v2672_v63  ;;  %v6694_v57 = vld [vmem:[#allocation13 + $0x38] ss:$28 sps:$4 sm:$0xff]   ;;  %v6700_v63 = vld [vmem:[#allocation13] ss:$28 sps:$4 sm:$0xff]  }
 0x31c   : > { %v2726_v5 = vpop.f32.mrf.mxu1  ;;  %v6703_v0 = vld [vmem:[#allocation13 + $0x380] ss:$28 sps:$4 sm:$0xff]   ;;  %v6708_v1 = vld [vmem:[#allocation13 + $0x34c] ss:$28 sps:$4 sm:$0xff]  }
 0x31d   : > { %v2737_v6 = vmul.f32 1.442695, %v2731_v14  ;;  %5239 = vst [vmem:[%s7791_s6 + $0x30] sm:$0xff] %v2725_v4  ;;  %v2727_v16 = vadd.f32 %v2726_v5, %v2674_v3  ;;  %v6711_v2 = vld [vmem:[#allocation13 + $0x6cc] ss:$28 sps:$4 sm:$0xff]  }
 0x31e   : > { %v6706_v3 = vld [vmem:[#allocation13 + $0x348] ss:$28 sps:$4 sm:$0xff]   ;;  %v6717_v5 = vld [vmem:[#allocation13 + $0x694] ss:$28 sps:$4 sm:$0xff]  }
 0x31f   : > { %6982 = vpow2.f32 %v2737_v6  ;;  %v2732_v23 = vmul.f32 0.5, %v2727_v16  ;;  %5240 = vst [vmem:[%s7791_s6 + $0x38] sm:$0xff] %v2727_v16  ;;  %v6709_v14 = vld [vmem:[#allocation13 + $0x6c8] ss:$28 sps:$4 sm:$0xff]   ;;  %v6712_v6 = vld [vmem:[#allocation13 + $0x310] ss:$28 sps:$4 sm:$0xff]  }
 0x320   : > { %v6715_v16 = vld [vmem:[#allocation13 + $0x690] ss:$28 sps:$4 sm:$0xff]  }
 0x321   : > { %v2739_v7 = vmul.f32 1.442695, %v2732_v23  ;;  %v6720_v23 = vld [vmem:[#allocation13 + $0x2dc] ss:$28 sps:$4 sm:$0xff]  }
 0x323   : > { %6984 = vpow2.f32 %v2739_v7  ;;  %v6723_v7 = vld [vmem:[#allocation13 + $0x65c] ss:$28 sps:$4 sm:$0xff]  }
 0x324   : > { %v6979_v31 = vpop.eup %6978 }
 0x325   : > { %v2745_v50 = vmul.f32 %v6979_v31, %v2741_v8  ;;  %v6718_v31 = vld [vmem:[#allocation13 + $0x2d8] ss:$28 sps:$4 sm:$0xff]  }
 0x326   : > { %v6721_v8 = vld [vmem:[#allocation13 + $0x658] ss:$28 sps:$4 sm:$0xff]  }
 0x327   : > { %v2749_v62 = vadd.f32 %v2745_v50, %v2711_v52  ;;  %v6729_v50 = vld [vmem:[#allocation13 + $0x624] ss:$28 sps:$4 sm:$0xff]  }
 0x328   : > { %v6981_v54 = vpop.eup %6980 }
 0x329   : > { %v2746_v39 = vmul.f32 %v6981_v54, %v2742_v9  ;;  %v6726_v9 = vld [vmem:[#allocation13 + $0x2a4] ss:$28 sps:$4 sm:$0xff]  }
 0x32a   : > { %v6724_v54 = vld [vmem:[#allocation13 + $0x2a0] ss:$28 sps:$4 sm:$0xff]  }
 0x32b   : > { %v2750_v43 = vadd.f32 %v2746_v39, %v2715_v46  ;;  %v6682_v46 = vld [vmem:[#allocation13 + $0xa8] ss:$28 sps:$4 sm:$0xff]   ;;  %v6727_v39 = vld [vmem:[#allocation13 + $0x620] ss:$28 sps:$4 sm:$0xff]  }
 0x32c   : > { %v6983_v15 = vpop.eup %6982 }
 0x32d   : > { %v2753_v17 = vpack.c.bf16 %v2750_v43, %v2749_v62  ;;  %v2747_v12 = vmul.f32 %v6983_v15, %v2743_v10  ;;  %v6732_v62 = vld [vmem:[#allocation13 + $0x26c] ss:$28 sps:$4 sm:$0xff]  }
 0x32e   : > { %v6735_v43 = vld [vmem:[#allocation13 + $0x5ec] ss:$28 sps:$4 sm:$0xff]  }
 0x32f   : > { %3002 = vmatmul.mubr.bf16.vlgmr.msra.gmra.mxu0 %v2753_v17  ;;  %3055 = vmatmul.mubr.bf16.vlgmr.msra.gmra.mxu1 %v2753_v17  ;;  %v2751_v29 = vadd.f32 %v2747_v12, %v2721_v58  ;;  %v6697_v58 = vld [vmem:[#allocation13 + $0x3b8] ss:$28 sps:$4 sm:$0xff]   ;;  %v6730_v15 = vld [vmem:[#allocation13 + $0x268] ss:$28 sps:$4 sm:$0xff]  }
 0x330   : > { %v6985_v24 = vpop.eup %6984  ;;  %3011 = vmatprep.mubr.bf16.mxu0 %v7355_v35  ;;  %3064 = vmatprep.mubr.bf16.mxu1 %v7355_v35  ;;  %v6681_v35 = vld [vmem:[#allocation13 + $0x464] ss:$28 sps:$4 sm:$0xff]   ;;  %v6738_v17 = vld [vmem:[#allocation13 + $0x234] ss:$28 sps:$4 sm:$0xff]  }
 0x331   : > { %v2748_v30 = vmul.f32 %v6985_v24, %v2744_v20  ;;  %4545 = vmatpush1.bf16.msra.mxu0 %v6658_v18  ;;  %4598 = vmatpush1.bf16.msra.mxu1 %v6661_v19  ;;  %v6733_v10 = vld [vmem:[#allocation13 + $0x5e8] ss:$28 sps:$4 sm:$0xff]   ;;  %v6741_v18 = vld [vmem:[#allocation13 + $0x5b4] ss:$28 sps:$4 sm:$0xff]  }
 0x332   : > { %4546 = vmatprep.subr.bf16.mxu0 %v6666_v21  ;;  %4599 = vmatprep.subr.bf16.mxu1 %v6669_v22  ;;  %v6736_v19 = vld [vmem:[#allocation13 + $0x230] ss:$28 sps:$4 sm:$0xff]   ;;  %v6744_v21 = vld [vmem:[#allocation13 + $0x1fc] ss:$28 sps:$4 sm:$0xff]  }
 0x333   : > { %v2752_v32 = vadd.f32 %v2748_v30, %v2725_v4  ;;  %v6714_v4 = vld [vmem:[#allocation13 + $0x314] ss:$28 sps:$4 sm:$0xff]   ;;  %v6747_v22 = vld [vmem:[#allocation13 + $0x57c] ss:$28 sps:$4 sm:$0xff]   ;;  %v6750_v30 = vld [vmem:[#allocation13 + $0x1c4] ss:$28 sps:$4 sm:$0xff]  }
 0x334   : > { %v6739_v20 = vld [vmem:[#allocation13 + $0x5b0] ss:$28 sps:$4 sm:$0xff]   ;;  %v6742_v12 = vld [vmem:[#allocation13 + $0x1f8] ss:$28 sps:$4 sm:$0xff]  }
 0x335   : > { %v2754_v52 = vpack.c.bf16 %v2752_v32, %v2751_v29  ;;  %4547 = vmatpush1.bf16.msra.mxu0 %v6664_v25  ;;  %4600 = vmatpush1.bf16.msra.mxu1 %v6667_v26  ;;  %v6745_v24 = vld [vmem:[#allocation13 + $0x578] ss:$28 sps:$4 sm:$0xff]   ;;  %v6753_v25 = vld [vmem:[#allocation13 + $0x544] ss:$28 sps:$4 sm:$0xff]   ;;  %v2787_v32 = vld [vmem:[#allocation11] sm:$0xf] }
 0x336   : > { %4548 = vmatprep.subr.bf16.mxu0 %v6672_v27  ;;  %4601 = vmatprep.subr.bf16.mxu1 %v6675_v28  ;;  %v6748_v26 = vld [vmem:[#allocation13 + $0x1c0] ss:$28 sps:$4 sm:$0xff]   ;;  %v6756_v28 = vld [vmem:[#allocation13 + $0x194] ss:$28 sps:$4 sm:$0xff]  }
 0x337   : > { %3012 = vmatmul.mubr.bf16.gmra.mxu0 %v2754_v52  ;;  %3065 = vmatmul.mubr.bf16.gmra.mxu1 %v2754_v52  ;;  %v6751_v27 = vld [vmem:[#allocation13 + $0x540] ss:$28 sps:$4 sm:$0xff]   ;;  %v6759_v29 = vld [vmem:[#allocation13 + $0x514] ss:$28 sps:$4 sm:$0xff]  }
 0x339   : > { %4549 = vmatpush1.bf16.msra.mxu0 %v6670_v37  ;;  %4602 = vmatpush1.bf16.msra.mxu1 %v6673_v38  ;;  %v2796_v38 = vrot.slane %v2787_v32, %v7759_v13 }
 0x33a   : > { %4550 = vmatprep.subr.bf16.mxu0 %v6678_v36  ;;  %4603 = vmatprep.subr.bf16.mxu1 %v6681_v35  ;;  %v2804_v36 = vrot.slane %v2787_v32, %v7775_v33  ;;  %v2792_v35 = vrot.slane %v2787_v32, %v7762_v59 }
 0x33d   : > { %4551 = vmatpush1.bf16.msra.mxu0 %v6676_v40  ;;  %4604 = vmatpush1.bf16.msra.mxu1 %v6679_v41  ;;  %v2800_v40 = vrot.slane %v2787_v32, %v7778_v34  ;;  %v6771_v32 = vld [vmem:[#allocation13 + $0x4a4] ss:$28 sps:$4 sm:$0xff]  }
 0x33e   : > { %4552 = vmatprep.subr.bf16.mxu0 %v6684_v42  ;;  %4605 = vmatprep.subr.bf16.mxu1 %v6687_v44 }
 0x341   : > { %4553 = vmatpush1.bf16.msra.mxu0 %v6682_v46  ;;  %4606 = vmatpush1.bf16.msra.mxu1 %v6685_v47 }
 0x342   : > { %4554 = vmatprep.subr.bf16.mxu0 %v6690_v48  ;;  %4607 = vmatprep.subr.bf16.mxu1 %v6693_v49 }
 0x345   : > { %4555 = vmatpush1.bf16.msra.mxu0 %v6688_v45  ;;  %4608 = vmatpush1.bf16.msra.mxu1 %v6691_v51 }
 0x346   : > { %4556 = vmatprep.subr.bf16.mxu0 %v6696_v55  ;;  %4609 = vmatprep.subr.bf16.mxu1 %v6699_v56 }
 0x349   : > { %4557 = vmatpush1.bf16.msra.mxu0 %v6694_v57  ;;  %4610 = vmatpush1.bf16.msra.mxu1 %v6697_v58 }
 0x34a   : > { %4558 = vmatprep.subr.bf16.mxu0 %v6702_v60  ;;  %4611 = vmatprep.subr.bf16.mxu1 %v6705_v61 }
 0x34d   : > { %4559 = vmatpush1.bf16.msra.mxu0 %v6700_v63  ;;  %4612 = vmatpush1.bf16.msra.mxu1 %v6703_v0 }
 0x34e   : > { %4560 = vmatprep.subr.bf16.mxu0 %v6708_v1  ;;  %4613 = vmatprep.subr.bf16.mxu1 %v6711_v2 }
 0x351   : > { %4561 = vmatpush2.bf16.msra.mxu0 %v6706_v3  ;;  %4614 = vmatpush2.bf16.msra.mxu1 %v6709_v14 }
 0x352   : > { %4562 = vmatprep.subr.bf16.mxu0 %v6714_v4  ;;  %4615 = vmatprep.subr.bf16.mxu1 %v6717_v5 }
 0x355   : > { %4563 = vmatpush2.bf16.msra.mxu0 %v6712_v6  ;;  %4616 = vmatpush2.bf16.msra.mxu1 %v6715_v16 }
 0x356   : > { %4564 = vmatprep.subr.bf16.mxu0 %v6720_v23  ;;  %4617 = vmatprep.subr.bf16.mxu1 %v6723_v7 }
 0x359   : > { %4565 = vmatpush2.bf16.msra.mxu0 %v6718_v31  ;;  %4618 = vmatpush2.bf16.msra.mxu1 %v6721_v8  ;;  %v6754_v8 = vld [vmem:[#allocation13 + $0x190] ss:$28 sps:$4 sm:$0xff]  }
 0x35a   : > { %4566 = vmatprep.subr.bf16.mxu0 %v6726_v9  ;;  %4619 = vmatprep.subr.bf16.mxu1 %v6729_v50  ;;  %v6757_v9 = vld [vmem:[#allocation13 + $0x510] ss:$28 sps:$4 sm:$0xff]  }
 0x35d   : > { %4567 = vmatpush2.bf16.msra.mxu0 %v6724_v54  ;;  %4620 = vmatpush2.bf16.msra.mxu1 %v6727_v39 }
 0x35e   : > { %4568 = vmatprep.subr.bf16.mxu0 %v6732_v62  ;;  %4621 = vmatprep.subr.bf16.mxu1 %v6735_v43 }
 0x361   : > { %4569 = vmatpush2.bf16.msra.mxu0 %v6730_v15  ;;  %4622 = vmatpush2.bf16.msra.mxu1 %v6733_v10  ;;  %v6762_v15 = vld [vmem:[#allocation13 + $0x15c] ss:$28 sps:$4 sm:$0xff]  }
 0x362   : > { %4570 = vmatprep.subr.bf16.mxu0 %v6738_v17  ;;  %4623 = vmatprep.subr.bf16.mxu1 %v6741_v18  ;;  %v6765_v10 = vld [vmem:[#allocation13 + $0x4dc] ss:$28 sps:$4 sm:$0xff]  }
 0x365   : > { %4571 = vmatpush2.bf16.msra.mxu0 %v6736_v19  ;;  %4624 = vmatpush2.bf16.msra.mxu1 %v6739_v20 }
 0x366   : > { %4572 = vmatprep.subr.bf16.mxu0 %v6744_v21  ;;  %4625 = vmatprep.subr.bf16.mxu1 %v6747_v22 }
 0x369   : > { %4573 = vmatpush2.bf16.msra.mxu0 %v6742_v12  ;;  %4626 = vmatpush2.bf16.msra.mxu1 %v6745_v24 }
 0x36a   : > { %4574 = vmatprep.subr.bf16.mxu0 %v6750_v30  ;;  %4627 = vmatprep.subr.bf16.mxu1 %v6753_v25  ;;  %v6760_v25 = vld [vmem:[#allocation13 + $0x158] ss:$28 sps:$4 sm:$0xff]  }
 0x36d   : > { %4575 = vmatpush2.bf16.msra.mxu0 %v6748_v26  ;;  %4628 = vmatpush2.bf16.msra.mxu1 %v6751_v27  ;;  %v6763_v26 = vld [vmem:[#allocation13 + $0x4d8] ss:$28 sps:$4 sm:$0xff]  }
 0x36e   : > { %4650 = vmatprep.subr.bf16.mxu0 %v6756_v28  ;;  %4703 = vmatprep.subr.bf16.mxu1 %v6759_v29  ;;  %v6768_v29 = vld [vmem:[#allocation13 + $0x124] ss:$28 sps:$4 sm:$0xff]  }
 0x3ef   : > { %v3003_v52 = vpop.f32.mrf.mxu0  ;;  %v3056_v37 = vpop.f32.mrf.mxu1 }
 0x3f0   : > { %v3004_v51 = vadd.f32 %v3003_v52, %v2792_v35  ;;  %v3057_v55 = vadd.f32 %v3056_v37, %v2800_v40 }
 0x3f1   : > { %v3005_v41 = vpop.f32.mrf.mxu0  ;;  %v3058_v42 = vpop.f32.mrf.mxu1 }
 0x3f2   : > { %v3006_v47 = vadd.f32 %v3005_v41, %v2796_v38  ;;  %v3059_v48 = vadd.f32 %v3058_v42, %v2804_v36  ;;  %v3075_v5 = vmax.f32 %v3004_v51, 0.0  ;;  %v3077_v6 = vmax.f32 %v3057_v55, 0.0  ;;  %v6772_v51 = vld [vmem:[#allocation13 + $0xe8] ss:$28 sps:$4 sm:$0xff]  }
 0x3f3   : > { %v3007_v44 = vpop.f32.mrf.mxu0  ;;  %v3060_v46 = vpop.f32.mrf.mxu1  ;;  %v6775_v55 = vld [vmem:[#allocation13 + $0x468] ss:$28 sps:$4 sm:$0xff]  }
 0x3f4   : > { %v3008_v49 = vadd.f32 %v3007_v44, %v2792_v35  ;;  %v3061_v45 = vadd.f32 %v3060_v46, %v2800_v40  ;;  %v3076_v2 = vmax.f32 %v3006_v47, 0.0  ;;  %v3078_v3 = vmax.f32 %v3059_v48, 0.0  ;;  %v6769_v46 = vld [vmem:[#allocation13 + $0x4a0] ss:$28 sps:$4 sm:$0xff]  }
 0x3f5   : > { %v3009_v56 = vpop.f32.mrf.mxu0  ;;  %v3062_v57 = vpop.f32.mrf.mxu1 }
 0x3f6   : > { %v3010_v58 = vadd.f32 %v3009_v56, %v2796_v38  ;;  %v3063_v60 = vadd.f32 %v3062_v57, %v2804_v36  ;;  %v3079_v61 = vmax.f32 %v3008_v49, 0.0  ;;  %v3081_v63 = vmax.f32 %v3061_v45, 0.0  ;;  %v6774_v49 = vld [vmem:[#allocation13 + $0xec] ss:$28 sps:$4 sm:$0xff]   ;;  %v6780_v56 = vld [vmem:[#allocation13 + $0xb4] ss:$28 sps:$4 sm:$0xff]  }
 0x3f7   : > { %v3013_v0 = vpop.f32.mrf.mxu0  ;;  %v3066_v1 = vpop.f32.mrf.mxu1  ;;  %v6777_v45 = vld [vmem:[#allocation13 + $0x46c] ss:$28 sps:$4 sm:$0xff]   ;;  %v6783_v57 = vld [vmem:[#allocation13 + $0x434] ss:$28 sps:$4 sm:$0xff]  }
 0x3f8   : > { %v3080_v14 = vmax.f32 %v3010_v58, 0.0  ;;  %v3082_v4 = vmax.f32 %v3063_v60, 0.0  ;;  %v7815_v50 = vpack.c.bf16 %v3079_v61, %v3075_v5  ;;  %v7817_v54 = vpack.c.bf16 %v3081_v63, %v3077_v6  ;;  %v6778_v58 = vld [vmem:[#allocation13 + $0xb0] ss:$28 sps:$4 sm:$0xff]   ;;  %v6786_v61 = vld [vmem:[#allocation13 + $0x7c] ss:$28 sps:$4 sm:$0xff]  }
 0x3f9   : > { %v3015_v16 = vpop.f32.mrf.mxu0  ;;  %v3068_v23 = vpop.f32.mrf.mxu1  ;;  %v3014_v20 = vadd.f32 %v3013_v0, %v2792_v35  ;;  %v3067_v21 = vadd.f32 %v3066_v1, %v2800_v40  ;;  %v6781_v60 = vld [vmem:[#allocation13 + $0x430] ss:$28 sps:$4 sm:$0xff]   ;;  %v6789_v63 = vld [vmem:[#allocation13 + $0x3fc] ss:$28 sps:$4 sm:$0xff]  }
 0x3fa   : > { %v7811_v7 = vpack.c.bf16 %v3080_v14, %v3076_v2  ;;  %v7813_v31 = vpack.c.bf16 %v3082_v4, %v3078_v3  ;;  %v3016_v39 = vadd.f32 %v3015_v16, %v2796_v38  ;;  %v3069_v17 = vadd.f32 %v3068_v23, %v2804_v36  ;;  %v6784_v0 = vld [vmem:[#allocation13 + $0x78] ss:$28 sps:$4 sm:$0xff]   ;;  %v6792_v2 = vld [vmem:[#allocation13 + $0x44] ss:$28 sps:$4 sm:$0xff]   ;;  %v6798_v5 = vld [vmem:[#allocation13 + $0xc] ss:$28 sps:$4 sm:$0xff]  }
 0x3fb   : > { %v3017_v62 = vpop.f32.mrf.mxu0  ;;  %v3070_v43 = vpop.f32.mrf.mxu1  ;;  %v3083_v41 = vmax.f32 %v3014_v20, 0.0  ;;  %v3085_v42 = vmax.f32 %v3067_v21, 0.0  ;;  %v6787_v1 = vld [vmem:[#allocation13 + $0x3f8] ss:$28 sps:$4 sm:$0xff]   ;;  %v6795_v3 = vld [vmem:[#allocation13 + $0x3c4] ss:$28 sps:$4 sm:$0xff]  }
 0x3fc   : > { %v3018_v18 = vadd.f32 %v3017_v62, %v2792_v35  ;;  %v3071_v19 = vadd.f32 %v3070_v43, %v2800_v40  ;;  %4576 = vmatprep.mubr.bf16.mxu0 %v7811_v7  ;;  %4629 = vmatprep.mubr.bf16.mxu1 %v7813_v31  ;;  %v3084_v52 = vmax.f32 %v3016_v39, 0.0  ;;  %v3086_v37 = vmax.f32 %v3069_v17, 0.0  ;;  %v6790_v14 = vld [vmem:[#allocation13 + $0x40] ss:$28 sps:$4 sm:$0xff]   ;;  %v6801_v6 = vld [vmem:[#allocation13 + $0x38c] ss:$28 sps:$4 sm:$0xff]  }
 0x3fd   : > { %v3019_v22 = vpop.f32.mrf.mxu0  ;;  %v3072_v12 = vpop.f32.mrf.mxu1  ;;  %4577 = vmatmul.mubr.bf16.vlgmr.msra.gmra.mxu0 %v7815_v50  ;;  %4630 = vmatmul.mubr.bf16.vlgmr.msra.gmra.mxu1 %v7817_v54  ;;  %v6793_v4 = vld [vmem:[#allocation13 + $0x3c0] ss:$28 sps:$4 sm:$0xff]   ;;  %v6796_v16 = vld [vmem:[#allocation13 + $0x8] ss:$28 sps:$4 sm:$0xff]   ;;  %v6802_v39 = vld [vmem:[#allocation13 + $0x350] ss:$28 sps:$4 sm:$0xff]  }
 0x3fe   : > { %v3020_v24 = vadd.f32 %v3019_v22, %v2796_v38  ;;  %v3073_v30 = vadd.f32 %v3072_v12, %v2804_v36  ;;  %4651 = vmatpush1.bf16.msra.mxu0 %v6754_v8  ;;  %4704 = vmatpush1.bf16.msra.mxu1 %v6757_v9  ;;  %v3087_v27 = vmax.f32 %v3018_v18, 0.0  ;;  %v3089_v28 = vmax.f32 %v3071_v19, 0.0  ;;  %v6766_v36 = vld [vmem:[#allocation13 + $0x120] ss:$28 sps:$4 sm:$0xff]   ;;  %v6799_v23 = vld [vmem:[#allocation13 + $0x388] ss:$28 sps:$4 sm:$0xff]  }
 0x3ff   : > { %4652 = vmatprep.subr.bf16.mxu0 %v6762_v15  ;;  %4705 = vmatprep.subr.bf16.mxu1 %v6765_v10  ;;  %v6804_v8 = vld [vmem:[#allocation13 + $0x354] ss:$28 sps:$4 sm:$0xff]   ;;  %v6810_v43 = vld [vmem:[#allocation13 + $0x31c] ss:$28 sps:$4 sm:$0xff]   ;;  %v6816_v18 = vld [vmem:[#allocation13 + $0x2e4] ss:$28 sps:$4 sm:$0xff]  }
 0x400   : > { %v3088_v35 = vmax.f32 %v3020_v24, 0.0  ;;  %v3090_v40 = vmax.f32 %v3073_v30, 0.0  ;;  %v7827_v47 = vpack.c.bf16 %v3087_v27, %v3083_v41  ;;  %v7829_v48 = vpack.c.bf16 %v3089_v28, %v3085_v42  ;;  %v6807_v9 = vld [vmem:[#allocation13 + $0x6d4] ss:$28 sps:$4 sm:$0xff]   ;;  %v6813_v15 = vld [vmem:[#allocation13 + $0x69c] ss:$28 sps:$4 sm:$0xff]  }
 0x401   : > { %v6805_v62 = vld [vmem:[#allocation13 + $0x6d0] ss:$28 sps:$4 sm:$0xff]   ;;  %v6808_v10 = vld [vmem:[#allocation13 + $0x318] ss:$28 sps:$4 sm:$0xff]   ;;  %v6819_v19 = vld [vmem:[#allocation13 + $0x664] ss:$28 sps:$4 sm:$0xff]  }
 0x402   : > { %v7823_v44 = vpack.c.bf16 %v3088_v35, %v3084_v52  ;;  %v7825_v38 = vpack.c.bf16 %v3090_v40, %v3086_v37  ;;  %4653 = vmatpush1.bf16.msra.mxu0 %v6760_v25  ;;  %4706 = vmatpush1.bf16.msra.mxu1 %v6763_v26  ;;  %v6811_v17 = vld [vmem:[#allocation13 + $0x698] ss:$28 sps:$4 sm:$0xff]   ;;  %v6814_v20 = vld [vmem:[#allocation13 + $0x2e0] ss:$28 sps:$4 sm:$0xff]   ;;  %v6822_v22 = vld [vmem:[#allocation13 + $0x2ac] ss:$28 sps:$4 sm:$0xff]  }
 0x403   : > { %4654 = vmatprep.subr.bf16.mxu0 %v6768_v29  ;;  %4707 = vmatprep.subr.bf16.mxu1 %v6771_v32  ;;  %v6817_v21 = vld [vmem:[#allocation13 + $0x660] ss:$28 sps:$4 sm:$0xff]   ;;  %v6825_v12 = vld [vmem:[#allocation13 + $0x62c] ss:$28 sps:$4 sm:$0xff]   ;;  %v6828_v25 = vld [vmem:[#allocation13 + $0x274] ss:$28 sps:$4 sm:$0xff]  }
 0x404   : > { %4586 = vmatprep.mubr.bf16.mxu0 %v7823_v44  ;;  %4639 = vmatprep.mubr.bf16.mxu1 %v7825_v38  ;;  %v6820_v24 = vld [vmem:[#allocation13 + $0x2a8] ss:$28 sps:$4 sm:$0xff]   ;;  %v6831_v26 = vld [vmem:[#allocation13 + $0x5f4] ss:$28 sps:$4 sm:$0xff]   ;;  %v6834_v29 = vld [vmem:[#allocation13 + $0x23c] ss:$28 sps:$4 sm:$0xff]  }
 0x405   : > { %4587 = vmatmul.mubr.bf16.gmra.mxu0 %v7827_v47  ;;  %4640 = vmatmul.mubr.bf16.gmra.mxu1 %v7829_v48  ;;  %v6823_v30 = vld [vmem:[#allocation13 + $0x628] ss:$28 sps:$4 sm:$0xff]   ;;  %v6826_v27 = vld [vmem:[#allocation13 + $0x270] ss:$28 sps:$4 sm:$0xff]   ;;  %v6837_v32 = vld [vmem:[#allocation13 + $0x5bc] ss:$28 sps:$4 sm:$0xff]  }
 0x406   : > { %4655 = vmatpush1.bf16.msra.mxu0 %v6766_v36  ;;  %4708 = vmatpush1.bf16.msra.mxu1 %v6769_v46  ;;  %v6829_v28 = vld [vmem:[#allocation13 + $0x5f0] ss:$28 sps:$4 sm:$0xff]   ;;  %v6832_v52 = vld [vmem:[#allocation13 + $0x238] ss:$28 sps:$4 sm:$0xff]   ;;  %v6840_v35 = vld [vmem:[#allocation13 + $0x204] ss:$28 sps:$4 sm:$0xff]  }
 0x407   : > { %4682 = vmatprep.mubr.bf16.mxu0 %v7811_v7  ;;  %4735 = vmatprep.mubr.bf16.mxu1 %v7813_v31  ;;  %v6835_v37 = vld [vmem:[#allocation13 + $0x5b8] ss:$28 sps:$4 sm:$0xff]   ;;  %v6843_v40 = vld [vmem:[#allocation13 + $0x584] ss:$28 sps:$4 sm:$0xff]   ;;  %v6846_v36 = vld [vmem:[#allocation13 + $0x1cc] ss:$28 sps:$4 sm:$0xff]  }
 0x408   : > { %4656 = vmatprep.subr.bf16.mxu0 %v6774_v49  ;;  %4709 = vmatprep.subr.bf16.mxu1 %v6777_v45  ;;  %v6838_v41 = vld [vmem:[#allocation13 + $0x200] ss:$28 sps:$4 sm:$0xff]   ;;  %v6849_v46 = vld [vmem:[#allocation13 + $0x54c] ss:$28 sps:$4 sm:$0xff]  }
 0x409   : > { %v6841_v42 = vld [vmem:[#allocation13 + $0x580] ss:$28 sps:$4 sm:$0xff]   ;;  %v6844_v49 = vld [vmem:[#allocation13 + $0x1c8] ss:$28 sps:$4 sm:$0xff]  }
 0x40a   : > { %4657 = vmatpush1.bf16.msra.mxu0 %v6772_v51  ;;  %4710 = vmatpush1.bf16.msra.mxu1 %v6775_v55  ;;  %v6847_v45 = vld [vmem:[#allocation13 + $0x548] ss:$28 sps:$4 sm:$0xff]   ;;  %v6852_v51 = vld [vmem:[#allocation13 + $0x19c] ss:$28 sps:$4 sm:$0xff]  }
 0x40b   : > { %4658 = vmatprep.subr.bf16.mxu0 %v6780_v56  ;;  %4711 = vmatprep.subr.bf16.mxu1 %v6783_v57  ;;  %v6855_v55 = vld [vmem:[#allocation13 + $0x51c] ss:$28 sps:$4 sm:$0xff]  }
 0x40c   : > { %v6850_v56 = vld [vmem:[#allocation13 + $0x198] ss:$28 sps:$4 sm:$0xff]  }
 0x40d   : > { %v6853_v57 = vld [vmem:[#allocation13 + $0x518] ss:$28 sps:$4 sm:$0xff]  }
 0x40e   : > { %4659 = vmatpush1.bf16.msra.mxu0 %v6778_v58  ;;  %4712 = vmatpush1.bf16.msra.mxu1 %v6781_v60  ;;  %v6858_v58 = vld [vmem:[#allocation13 + $0x164] ss:$28 sps:$4 sm:$0xff]  }
 0x40f   : > { %4660 = vmatprep.subr.bf16.mxu0 %v6786_v61  ;;  %4713 = vmatprep.subr.bf16.mxu1 %v6789_v63  ;;  %v6861_v60 = vld [vmem:[#allocation13 + $0x4e4] ss:$28 sps:$4 sm:$0xff]  }
 0x410   : > { %v6856_v61 = vld [vmem:[#allocation13 + $0x160] ss:$28 sps:$4 sm:$0xff]  }
 0x411   : > { %v6859_v63 = vld [vmem:[#allocation13 + $0x4e0] ss:$28 sps:$4 sm:$0xff]  }
 0x412   : > { %4661 = vmatpush1.bf16.msra.mxu0 %v6784_v0  ;;  %4714 = vmatpush1.bf16.msra.mxu1 %v6787_v1  ;;  %v6864_v0 = vld [vmem:[#allocation13 + $0x12c] ss:$28 sps:$4 sm:$0xff]  }
 0x413   : > { %4662 = vmatprep.subr.bf16.mxu0 %v6792_v2  ;;  %4715 = vmatprep.subr.bf16.mxu1 %v6795_v3  ;;  %v6867_v1 = vld [vmem:[#allocation13 + $0x4ac] ss:$28 sps:$4 sm:$0xff]  }
 0x414   : > { %v6862_v2 = vld [vmem:[#allocation13 + $0x128] ss:$28 sps:$4 sm:$0xff]  }
 0x415   : > { %v6865_v3 = vld [vmem:[#allocation13 + $0x4a8] ss:$28 sps:$4 sm:$0xff]  }
 0x416   : > { %4663 = vmatpush1.bf16.msra.mxu0 %v6790_v14  ;;  %4716 = vmatpush1.bf16.msra.mxu1 %v6793_v4  ;;  %v6870_v14 = vld [vmem:[#allocation13 + $0xf4] ss:$28 sps:$4 sm:$0xff]  }
 0x417   : > { %4664 = vmatprep.subr.bf16.mxu0 %v6798_v5  ;;  %4717 = vmatprep.subr.bf16.mxu1 %v6801_v6  ;;  %v6873_v4 = vld [vmem:[#allocation13 + $0x474] ss:$28 sps:$4 sm:$0xff]  }
 0x418   : > { %v6868_v5 = vld [vmem:[#allocation13 + $0xf0] ss:$28 sps:$4 sm:$0xff]  }
 0x419   : > { %v6871_v6 = vld [vmem:[#allocation13 + $0x470] ss:$28 sps:$4 sm:$0xff]  }
 0x41a   : > { %4665 = vmatpush1.bf16.msra.mxu0 %v6796_v16  ;;  %4718 = vmatpush1.bf16.msra.mxu1 %v6799_v23  ;;  %v6876_v16 = vld [vmem:[#allocation13 + $0xbc] ss:$28 sps:$4 sm:$0xff]  }
 0x41b   : > { %4666 = vmatprep.subr.bf16.mxu0 %v6804_v8  ;;  %4719 = vmatprep.subr.bf16.mxu1 %v6807_v9  ;;  %v6879_v23 = vld [vmem:[#allocation13 + $0x43c] ss:$28 sps:$4 sm:$0xff]  }
 0x41c   : > { %v6874_v8 = vld [vmem:[#allocation13 + $0xb8] ss:$28 sps:$4 sm:$0xff]  }
 0x41d   : > { %v6877_v9 = vld [vmem:[#allocation13 + $0x438] ss:$28 sps:$4 sm:$0xff]  }
 0x41e   : > { %4667 = vmatpush2.bf16.msra.mxu0 %v6802_v39  ;;  %4720 = vmatpush2.bf16.msra.mxu1 %v6805_v62  ;;  %v6882_v39 = vld [vmem:[#allocation13 + $0x84] ss:$28 sps:$4 sm:$0xff]  }
 0x41f   : > { %4668 = vmatprep.subr.bf16.mxu0 %v6810_v43  ;;  %4721 = vmatprep.subr.bf16.mxu1 %v6813_v15  ;;  %v6885_v62 = vld [vmem:[#allocation13 + $0x404] ss:$28 sps:$4 sm:$0xff]  }
 0x420   : > { %v6880_v43 = vld [vmem:[#allocation13 + $0x80] ss:$28 sps:$4 sm:$0xff]  }
 0x421   : > { %v6883_v15 = vld [vmem:[#allocation13 + $0x400] ss:$28 sps:$4 sm:$0xff]  }
 0x422   : > { %4669 = vmatpush2.bf16.msra.mxu0 %v6808_v10  ;;  %4722 = vmatpush2.bf16.msra.mxu1 %v6811_v17  ;;  %v6888_v10 = vld [vmem:[#allocation13 + $0x4c] ss:$28 sps:$4 sm:$0xff]  }
 0x423   : > { %4670 = vmatprep.subr.bf16.mxu0 %v6816_v18  ;;  %4723 = vmatprep.subr.bf16.mxu1 %v6819_v19  ;;  %v6891_v17 = vld [vmem:[#allocation13 + $0x3cc] ss:$28 sps:$4 sm:$0xff]  }
 0x424   : > { %v6886_v18 = vld [vmem:[#allocation13 + $0x48] ss:$28 sps:$4 sm:$0xff]  }
 0x425   : > { %v6889_v19 = vld [vmem:[#allocation13 + $0x3c8] ss:$28 sps:$4 sm:$0xff]  }
 0x426   : > { %4671 = vmatpush2.bf16.msra.mxu0 %v6814_v20  ;;  %4724 = vmatpush2.bf16.msra.mxu1 %v6817_v21  ;;  %v6894_v20 = vld [vmem:[#allocation13 + $0x14] ss:$28 sps:$4 sm:$0xff]  }
 0x427   : > { %4672 = vmatprep.subr.bf16.mxu0 %v6822_v22  ;;  %4725 = vmatprep.subr.bf16.mxu1 %v6825_v12  ;;  %v6897_v21 = vld [vmem:[#allocation13 + $0x394] ss:$28 sps:$4 sm:$0xff]  }
 0x428   : > { %v6892_v22 = vld [vmem:[#allocation13 + $0x10] ss:$28 sps:$4 sm:$0xff]  }
 0x429   : > { %v6895_v12 = vld [vmem:[#allocation13 + $0x390] ss:$28 sps:$4 sm:$0xff]  }
 0x42a   : > { %4673 = vmatpush2.bf16.msra.mxu0 %v6820_v24  ;;  %4726 = vmatpush2.bf16.msra.mxu1 %v6823_v30  ;;  %v6900_v24 = vld [vmem:[#allocation13 + $0x35c] ss:$28 sps:$4 sm:$0xff]  }
 0x42b   : > { %4674 = vmatprep.subr.bf16.mxu0 %v6828_v25  ;;  %4727 = vmatprep.subr.bf16.mxu1 %v6831_v26  ;;  %v6903_v30 = vld [vmem:[#allocation13 + $0x6dc] ss:$28 sps:$4 sm:$0xff]  }
 0x42c   : > { %v6898_v25 = vld [vmem:[#allocation13 + $0x358] ss:$28 sps:$4 sm:$0xff]  }
 0x42d   : > { %v6901_v26 = vld [vmem:[#allocation13 + $0x6d8] ss:$28 sps:$4 sm:$0xff]  }
 0x42e   : > { %4675 = vmatpush2.bf16.msra.mxu0 %v6826_v27  ;;  %4728 = vmatpush2.bf16.msra.mxu1 %v6829_v28  ;;  %v6906_v27 = vld [vmem:[#allocation13 + $0x324] ss:$28 sps:$4 sm:$0xff]  }
 0x42f   : > { %4676 = vmatprep.subr.bf16.mxu0 %v6834_v29  ;;  %4729 = vmatprep.subr.bf16.mxu1 %v6837_v32  ;;  %v6909_v28 = vld [vmem:[#allocation13 + $0x6a4] ss:$28 sps:$4 sm:$0xff]  }
 0x430   : > { %v6904_v29 = vld [vmem:[#allocation13 + $0x320] ss:$28 sps:$4 sm:$0xff]  }
 0x431   : > { %v6907_v32 = vld [vmem:[#allocation13 + $0x6a0] ss:$28 sps:$4 sm:$0xff]  }
 0x432   : > { %4677 = vmatpush2.bf16.msra.mxu0 %v6832_v52  ;;  %4730 = vmatpush2.bf16.msra.mxu1 %v6835_v37  ;;  %v6912_v52 = vld [vmem:[#allocation13 + $0x2ec] ss:$28 sps:$4 sm:$0xff]  }
 0x433   : > { %4678 = vmatprep.subr.bf16.mxu0 %v6840_v35  ;;  %4731 = vmatprep.subr.bf16.mxu1 %v6843_v40  ;;  %v6915_v37 = vld [vmem:[#allocation13 + $0x66c] ss:$28 sps:$4 sm:$0xff]  }
 0x434   : > { %v6910_v35 = vld [vmem:[#allocation13 + $0x2e8] ss:$28 sps:$4 sm:$0xff]  }
 0x435   : > { %v6913_v40 = vld [vmem:[#allocation13 + $0x668] ss:$28 sps:$4 sm:$0xff]  }
 0x436   : > { %4679 = vmatpush2.bf16.msra.mxu0 %v6838_v41  ;;  %4732 = vmatpush2.bf16.msra.mxu1 %v6841_v42  ;;  %v6918_v41 = vld [vmem:[#allocation13 + $0x2b4] ss:$28 sps:$4 sm:$0xff]  }
 0x437   : > { %4680 = vmatprep.subr.bf16.mxu0 %v6846_v36  ;;  %4733 = vmatprep.subr.bf16.mxu1 %v6849_v46  ;;  %v6921_v42 = vld [vmem:[#allocation13 + $0x634] ss:$28 sps:$4 sm:$0xff]  }
 0x438   : > { %v6916_v36 = vld [vmem:[#allocation13 + $0x2b0] ss:$28 sps:$4 sm:$0xff]  }
 0x439   : > { %v6919_v46 = vld [vmem:[#allocation13 + $0x630] ss:$28 sps:$4 sm:$0xff]  }
 0x43a   : > { %4681 = vmatpush2.bf16.msra.mxu0 %v6844_v49  ;;  %4734 = vmatpush2.bf16.msra.mxu1 %v6847_v45  ;;  %v6924_v49 = vld [vmem:[#allocation13 + $0x27c] ss:$28 sps:$4 sm:$0xff]  }
 0x43b   : > { %4756 = vmatprep.subr.bf16.mxu0 %v6852_v51  ;;  %4809 = vmatprep.subr.bf16.mxu1 %v6855_v55  ;;  %v6927_v45 = vld [vmem:[#allocation13 + $0x5fc] ss:$28 sps:$4 sm:$0xff]  }
 0x43c   : > { %v6922_v51 = vld [vmem:[#allocation13 + $0x278] ss:$28 sps:$4 sm:$0xff]  }
 0x43d   : > { %4683 = vmatmul.mubr.bf16.vlgmr.msra.gmra.mxu0 %v7815_v50  ;;  %4736 = vmatmul.mubr.bf16.vlgmr.msra.gmra.mxu1 %v7817_v54  ;;  %v6925_v55 = vld [vmem:[#allocation13 + $0x5f8] ss:$28 sps:$4 sm:$0xff]  }
 0x43e   : > { %4692 = vmatprep.mubr.bf16.mxu0 %v7823_v44  ;;  %4745 = vmatprep.mubr.bf16.mxu1 %v7825_v38 }
 0x43f   : > { %4757 = vmatpush1.bf16.msra.mxu0 %v6850_v56  ;;  %4810 = vmatpush1.bf16.msra.mxu1 %v6853_v57  ;;  %v6930_v56 = vld [vmem:[#allocation13 + $0x244] ss:$28 sps:$4 sm:$0xff]  }
 0x440   : > { %4758 = vmatprep.subr.bf16.mxu0 %v6858_v58  ;;  %4811 = vmatprep.subr.bf16.mxu1 %v6861_v60  ;;  %v6933_v57 = vld [vmem:[#allocation13 + $0x5c4] ss:$28 sps:$4 sm:$0xff]  }
 0x441   : > { %v6928_v58 = vld [vmem:[#allocation13 + $0x240] ss:$28 sps:$4 sm:$0xff]  }
 0x442   : > { %v6931_v60 = vld [vmem:[#allocation13 + $0x5c0] ss:$28 sps:$4 sm:$0xff]  }
 0x443   : > { %4759 = vmatpush1.bf16.msra.mxu0 %v6856_v61  ;;  %4812 = vmatpush1.bf16.msra.mxu1 %v6859_v63  ;;  %v6936_v61 = vld [vmem:[#allocation13 + $0x20c] ss:$28 sps:$4 sm:$0xff]  }
 0x444   : > { %4760 = vmatprep.subr.bf16.mxu0 %v6864_v0  ;;  %4813 = vmatprep.subr.bf16.mxu1 %v6867_v1  ;;  %v6939_v63 = vld [vmem:[#allocation13 + $0x58c] ss:$28 sps:$4 sm:$0xff]  }
 0x445   : > { %4693 = vmatmul.mubr.bf16.gmra.mxu0 %v7827_v47  ;;  %4746 = vmatmul.mubr.bf16.gmra.mxu1 %v7829_v48  ;;  %v6934_v0 = vld [vmem:[#allocation13 + $0x208] ss:$28 sps:$4 sm:$0xff]  }
 0x446   : > { %4788 = vmatprep.mubr.bf16.mxu0 %v7811_v7  ;;  %4841 = vmatprep.mubr.bf16.mxu1 %v7813_v31  ;;  %v6937_v1 = vld [vmem:[#allocation13 + $0x588] ss:$28 sps:$4 sm:$0xff]  }
 0x447   : > { %4761 = vmatpush1.bf16.msra.mxu0 %v6862_v2  ;;  %4814 = vmatpush1.bf16.msra.mxu1 %v6865_v3  ;;  %v6942_v2 = vld [vmem:[#allocation13 + $0x1d4] ss:$28 sps:$4 sm:$0xff]  }
 0x448   : > { %4762 = vmatprep.subr.bf16.mxu0 %v6870_v14  ;;  %4815 = vmatprep.subr.bf16.mxu1 %v6873_v4  ;;  %v6945_v3 = vld [vmem:[#allocation13 + $0x554] ss:$28 sps:$4 sm:$0xff]  }
 0x449   : > { %v6940_v14 = vld [vmem:[#allocation13 + $0x1d0] ss:$28 sps:$4 sm:$0xff]  }
 0x44a   : > { %v6943_v4 = vld [vmem:[#allocation13 + $0x550] ss:$28 sps:$4 sm:$0xff]  }
 0x44b   : > { %4763 = vmatpush1.bf16.msra.mxu0 %v6868_v5  ;;  %4816 = vmatpush1.bf16.msra.mxu1 %v6871_v6  ;;  %v6946_v5 = vld [vmem:[#allocation13 + $0x360] ss:$28 sps:$4 sm:$0xff]  }
 0x44c   : > { %4764 = vmatprep.subr.bf16.mxu0 %v6876_v16  ;;  %4817 = vmatprep.subr.bf16.mxu1 %v6879_v23  ;;  %v6947_v6 = vld [vmem:[#allocation13 + $0x6e0] ss:$28 sps:$4 sm:$0xff]  }
 0x44d   : > { %v6948_v16 = vld [vmem:[#allocation13 + $0x1a0] ss:$28 sps:$4 sm:$0xff]  }
 0x44e   : > { %v6949_v23 = vld [vmem:[#allocation13 + $0x520] ss:$28 sps:$4 sm:$0xff]  }
 0x44f   : > { %4765 = vmatpush1.bf16.msra.mxu0 %v6874_v8  ;;  %4818 = vmatpush1.bf16.msra.mxu1 %v6877_v9  ;;  %v6950_v8 = vld [vmem:[#allocation13 + $0x328] ss:$28 sps:$4 sm:$0xff]  }
 0x450   : > { %4766 = vmatprep.subr.bf16.mxu0 %v6882_v39  ;;  %4819 = vmatprep.subr.bf16.mxu1 %v6885_v62  ;;  %v6951_v9 = vld [vmem:[#allocation13 + $0x6a8] ss:$28 sps:$4 sm:$0xff]  }
 0x451   : > { %v6952_v39 = vld [vmem:[#allocation13 + $0x168] ss:$28 sps:$4 sm:$0xff]  }
 0x452   : > { %v6953_v62 = vld [vmem:[#allocation13 + $0x4e8] ss:$28 sps:$4 sm:$0xff]  }
 0x453   : > { %4767 = vmatpush1.bf16.msra.mxu0 %v6880_v43  ;;  %4820 = vmatpush1.bf16.msra.mxu1 %v6883_v15  ;;  %v6954_v43 = vld [vmem:[#allocation13 + $0x2f0] ss:$28 sps:$4 sm:$0xff]  }
 0x454   : > { %4768 = vmatprep.subr.bf16.mxu0 %v6888_v10  ;;  %4821 = vmatprep.subr.bf16.mxu1 %v6891_v17  ;;  %v6955_v15 = vld [vmem:[#allocation13 + $0x670] ss:$28 sps:$4 sm:$0xff]  }
 0x455   : > { %v6956_v10 = vld [vmem:[#allocation13 + $0x130] ss:$28 sps:$4 sm:$0xff]  }
 0x456   : > { %v6957_v17 = vld [vmem:[#allocation13 + $0x4b0] ss:$28 sps:$4 sm:$0xff]  }
 0x457   : > { %4769 = vmatpush1.bf16.msra.mxu0 %v6886_v18  ;;  %4822 = vmatpush1.bf16.msra.mxu1 %v6889_v19  ;;  %v6958_v18 = vld [vmem:[#allocation13 + $0x2b8] ss:$28 sps:$4 sm:$0xff]  }
 0x458   : > { %4770 = vmatprep.subr.bf16.mxu0 %v6894_v20  ;;  %4823 = vmatprep.subr.bf16.mxu1 %v6897_v21  ;;  %v6959_v19 = vld [vmem:[#allocation13 + $0x638] ss:$28 sps:$4 sm:$0xff]  }
 0x459   : > { %v6960_v20 = vld [vmem:[#allocation13 + $0xf8] ss:$28 sps:$4 sm:$0xff]  }
 0x45a   : > { %v6961_v21 = vld [vmem:[#allocation13 + $0x478] ss:$28 sps:$4 sm:$0xff]  }
 0x45b   : > { %4771 = vmatpush1.bf16.msra.mxu0 %v6892_v22  ;;  %4824 = vmatpush1.bf16.msra.mxu1 %v6895_v12  ;;  %v6962_v22 = vld [vmem:[#allocation13 + $0x280] ss:$28 sps:$4 sm:$0xff]  }
 0x45c   : > { %4772 = vmatprep.subr.bf16.mxu0 %v6900_v24  ;;  %4825 = vmatprep.subr.bf16.mxu1 %v6903_v30  ;;  %v6963_v12 = vld [vmem:[#allocation13 + $0x600] ss:$28 sps:$4 sm:$0xff]  }
 0x45d   : > { %v6964_v24 = vld [vmem:[#allocation13 + $0xc0] ss:$28 sps:$4 sm:$0xff]  }
 0x45e   : > { %v6965_v30 = vld [vmem:[#allocation13 + $0x440] ss:$28 sps:$4 sm:$0xff]  }
 0x45f   : > { %4773 = vmatpush2.bf16.msra.mxu0 %v6898_v25  ;;  %4826 = vmatpush2.bf16.msra.mxu1 %v6901_v26  ;;  %v6966_v25 = vld [vmem:[#allocation13 + $0x248] ss:$28 sps:$4 sm:$0xff]  }
 0x460   : > { %4774 = vmatprep.subr.bf16.mxu0 %v6906_v27  ;;  %4827 = vmatprep.subr.bf16.mxu1 %v6909_v28  ;;  %v6967_v26 = vld [vmem:[#allocation13 + $0x5c8] ss:$28 sps:$4 sm:$0xff]   ;;  %v6970_v27 = vld [vmem:[#allocation13 + $0x210] ss:$28 sps:$4 sm:$0xff]  }
 0x461   : > { %v6971_v28 = vld [vmem:[#allocation13 + $0x590] ss:$28 sps:$4 sm:$0xff]  }
 0x463   : > { %4775 = vmatpush2.bf16.msra.mxu0 %v6904_v29  ;;  %4828 = vmatpush2.bf16.msra.mxu1 %v6907_v32  ;;  %v6972_v29 = vld [vmem:[#allocation13 + $0x50] ss:$28 sps:$4 sm:$0xff]  }
 0x464   : > { %4776 = vmatprep.subr.bf16.mxu0 %v6912_v52  ;;  %4829 = vmatprep.subr.bf16.mxu1 %v6915_v37  ;;  %v6973_v32 = vld [vmem:[#allocation13 + $0x3d0] ss:$28 sps:$4 sm:$0xff]   ;;  %v6974_v52 = vld [vmem:[#allocation13 + $0x1d8] ss:$28 sps:$4 sm:$0xff]  }
 0x465   : > { %v6975_v37 = vld [vmem:[#allocation13 + $0x558] ss:$28 sps:$4 sm:$0xff]  }
 0x467   : > { %4777 = vmatpush2.bf16.msra.mxu0 %v6910_v35  ;;  %4830 = vmatpush2.bf16.msra.mxu1 %v6913_v40  ;;  %v6976_v35 = vld [vmem:[#allocation13 + $0x18] ss:$28 sps:$4 sm:$0xff]  }
 0x468   : > { %4778 = vmatprep.subr.bf16.mxu0 %v6918_v41  ;;  %4831 = vmatprep.subr.bf16.mxu1 %v6921_v42  ;;  %v6977_v40 = vld [vmem:[#allocation13 + $0x398] ss:$28 sps:$4 sm:$0xff]   ;;  %v7862_v41 = vld [vmem:[%s7993_s9] sm:$0xff] }
 0x469   : > { %v3360_v42 = vrot.slane %v7862_v41, %v7762_v59 }
 0x46b   : > { %4779 = vmatpush2.bf16.msra.mxu0 %v6916_v36  ;;  %4832 = vmatpush2.bf16.msra.mxu1 %v6919_v46 }
 0x46c   : > { %4780 = vmatprep.subr.bf16.mxu0 %v6924_v49  ;;  %4833 = vmatprep.subr.bf16.mxu1 %v6927_v45 }
 0x46f   : > { %4781 = vmatpush2.bf16.msra.mxu0 %v6922_v51  ;;  %4834 = vmatpush2.bf16.msra.mxu1 %v6925_v55 }
 0x470   : > { %4782 = vmatprep.subr.bf16.mxu0 %v6930_v56  ;;  %4835 = vmatprep.subr.bf16.mxu1 %v6933_v57 }
 0x473   : > { %4783 = vmatpush2.bf16.msra.mxu0 %v6928_v58  ;;  %4836 = vmatpush2.bf16.msra.mxu1 %v6931_v60 }
 0x474   : > { %4784 = vmatprep.subr.bf16.mxu0 %v6936_v61  ;;  %4837 = vmatprep.subr.bf16.mxu1 %v6939_v63 }
 0x477   : > { %4785 = vmatpush2.bf16.msra.mxu0 %v6934_v0  ;;  %4838 = vmatpush2.bf16.msra.mxu1 %v6937_v1 }
 0x478   : > { %4786 = vmatprep.subr.bf16.mxu0 %v6942_v2  ;;  %4839 = vmatprep.subr.bf16.mxu1 %v6945_v3 }
 0x47b   : > { %4787 = vmatpush2.bf16.msra.mxu0 %v6940_v14  ;;  %4840 = vmatpush2.bf16.msra.mxu1 %v6943_v4 }
 0x47c   : > { %6039 = vmatprep.subr.bf16.mxu0 %v6946_v5  ;;  %6067 = vmatprep.subr.bf16.mxu1 %v6947_v6 }
 0x47e   : > { %4789 = vmatmul.mubr.bf16.vlgmr.msra.gmra.mxu0 %v7815_v50  ;;  %4842 = vmatmul.mubr.bf16.vlgmr.msra.gmra.mxu1 %v7817_v54 }
 0x47f   : > { %4798 = vmatprep.mubr.bf16.mxu0 %v7823_v44  ;;  %4851 = vmatprep.mubr.bf16.mxu1 %v7825_v38 }
 0x480   : > { %6040 = vmatpush3.bf16.msra.mxu0 %v6948_v16  ;;  %6068 = vmatpush3.bf16.msra.mxu1 %v6949_v23 }
 0x481   : > { %6041 = vmatprep.subr.bf16.mxu0 %v6950_v8  ;;  %6069 = vmatprep.subr.bf16.mxu1 %v6951_v9 }
 0x484   : > { %6042 = vmatpush3.bf16.msra.mxu0 %v6952_v39  ;;  %6070 = vmatpush3.bf16.msra.mxu1 %v6953_v62 }
 0x485   : > { %6043 = vmatprep.subr.bf16.mxu0 %v6954_v43  ;;  %6071 = vmatprep.subr.bf16.mxu1 %v6955_v15 }
 0x486   : > { %4799 = vmatmul.mubr.bf16.gmra.mxu0 %v7827_v47  ;;  %4852 = vmatmul.mubr.bf16.gmra.mxu1 %v7829_v48 }
 0x487   : > { %4894 = vmatprep.mubr.bf16.mxu0 %v7811_v7  ;;  %4943 = vmatprep.mubr.bf16.mxu1 %v7813_v31  ;;  %v6968_v7 = vld [vmem:[#allocation13 + $0x88] ss:$28 sps:$4 sm:$0xff]  }
 0x488   : > { %6044 = vmatpush3.bf16.msra.mxu0 %v6956_v10  ;;  %6072 = vmatpush3.bf16.msra.mxu1 %v6957_v17  ;;  %v6969_v31 = vld [vmem:[#allocation13 + $0x408] ss:$28 sps:$4 sm:$0xff]  }
 0x489   : > { %6045 = vmatprep.subr.bf16.mxu0 %v6958_v18  ;;  %6073 = vmatprep.subr.bf16.mxu1 %v6959_v19 }
 0x48c   : > { %6046 = vmatpush3.bf16.msra.mxu0 %v6960_v20  ;;  %6074 = vmatpush3.bf16.msra.mxu1 %v6961_v21 }
 0x48d   : > { %6047 = vmatprep.subr.bf16.mxu0 %v6962_v22  ;;  %6075 = vmatprep.subr.bf16.mxu1 %v6963_v12 }
 0x490   : > { %6048 = vmatpush3.bf16.msra.mxu0 %v6964_v24  ;;  %6076 = vmatpush3.bf16.msra.mxu1 %v6965_v30 }
 0x491   : > { %6049 = vmatprep.subr.bf16.mxu0 %v6966_v25  ;;  %6077 = vmatprep.subr.bf16.mxu1 %v6967_v26 }
 0x494   : > { %6050 = vmatpush3.bf16.msra.mxu0 %v6968_v7  ;;  %6078 = vmatpush3.bf16.msra.mxu1 %v6969_v31 }
 0x495   : > { %6051 = vmatprep.subr.bf16.mxu0 %v6970_v27  ;;  %6079 = vmatprep.subr.bf16.mxu1 %v6971_v28 }
 0x498   : > { %6052 = vmatpush3.bf16.msra.mxu0 %v6972_v29  ;;  %6080 = vmatpush3.bf16.msra.mxu1 %v6973_v32 }
 0x499   : > { %6053 = vmatprep.subr.bf16.mxu0 %v6974_v52  ;;  %6081 = vmatprep.subr.bf16.mxu1 %v6975_v37 }
 0x49c   : > { %6054 = vmatpush3.bf16.msra.mxu0 %v6976_v35  ;;  %6082 = vmatpush3.bf16.msra.mxu1 %v6977_v40 }
 0x49f   : > { %4895 = vmatmul.mubr.bf16.vlgmr.msra.gmra.mxu0 %v7815_v50  ;;  %4944 = vmatmul.mubr.bf16.vlgmr.msra.gmra.mxu1 %v7817_v54  ;;  %v3364_v50 = vrot.slane %v7862_v41, %v7759_v13 }
 0x4a0   : > { %4902 = vmatprep.mubr.bf16.mxu0 %v7823_v44  ;;  %4951 = vmatprep.mubr.bf16.mxu1 %v7825_v38 }
 0x4a7   : > { %4903 = vmatmul.mubr.bf16.gmra.mxu0 %v7827_v47  ;;  %4952 = vmatmul.mubr.bf16.gmra.mxu1 %v7829_v48 }
 0x4bd   : > { %v4578_v54 = vpop.f32.mrf.mxu0  ;;  %v4631_v36 = vpop.f32.mrf.mxu1 }
 0x4be   : > { %v4579_v44 = vadd.f32 %v4578_v54, %v3360_v42 }
 0x4bf   : > { %v4580_v46 = vpop.f32.mrf.mxu0  ;;  %v4633_v38 = vpop.f32.mrf.mxu1 }
 0x4c0   : > { %v4632_v49 = vadd.f32 %v4631_v36, %v4579_v44  ;;  %v4581_v47 = vadd.f32 %v4580_v46, %v3364_v50 }
 0x4c1   : > { %v4582_v45 = vpop.f32.mrf.mxu0  ;;  %v4635_v48 = vpop.f32.mrf.mxu1 }
 0x4c2   : > { %v4960_v51 = vmul.f32 0.5, %v4632_v49  ;;  %v4634_v55 = vadd.f32 %v4633_v38, %v4581_v47  ;;  %v4583_v56 = vadd.f32 %v4582_v45, %v3360_v42 }
 0x4c3   : > { %v4584_v57 = vpop.f32.mrf.mxu0  ;;  %v4637_v58 = vpop.f32.mrf.mxu1 }
 0x4c4   : > { %6986 = vtanh.f32 %v4960_v51  ;;  %v4961_v60 = vmul.f32 0.5, %v4634_v55  ;;  %v4636_v59 = vadd.f32 %v4635_v48, %v4583_v56  ;;  %v4585_v61 = vadd.f32 %v4584_v57, %v3364_v50 }
 0x4c5   : > { %v4588_v63 = vpop.f32.mrf.mxu0  ;;  %v4641_v13 = vpop.f32.mrf.mxu1  ;;  %v3368_v51 = vrot.slane %v7862_v41, %v7778_v34  ;;  %v3372_v55 = vrot.slane %v7862_v41, %v7775_v33 }
 0x4c6   : > { %6988 = vtanh.f32 %v4961_v60  ;;  %v4967_v0 = vmul.f32 0.5, %v4636_v59  ;;  %v4638_v1 = vadd.f32 %v4637_v58, %v4585_v61  ;;  %v4589_v2 = vadd.f32 %v4588_v63, %v3360_v42 }
 0x4c7   : > { %v4590_v3 = vpop.f32.mrf.mxu0  ;;  %v4643_v14 = vpop.f32.mrf.mxu1 }
 0x4c8   : > { %6990 = vtanh.f32 %v4967_v0  ;;  %v4968_v4 = vmul.f32 0.5, %v4638_v1  ;;  %v4642_v5 = vadd.f32 %v4641_v13, %v4589_v2  ;;  %v4591_v6 = vadd.f32 %v4590_v3, %v3364_v50 }
 0x4c9   : > { %v4592_v16 = vpop.f32.mrf.mxu0  ;;  %v4645_v23 = vpop.f32.mrf.mxu1 }
 0x4ca   : > { %6992 = vtanh.f32 %v4968_v4  ;;  %v4974_v8 = vmul.f32 0.5, %v4642_v5  ;;  %v4644_v9 = vadd.f32 %v4643_v14, %v4591_v6  ;;  %v4593_v39 = vadd.f32 %v4592_v16, %v3360_v42 }
 0x4cb   : > { %v4594_v62 = vpop.f32.mrf.mxu0  ;;  %v4647_v17 = vpop.f32.mrf.mxu1 }
 0x4cc   : > { %6994 = vtanh.f32 %v4974_v8  ;;  %v4975_v43 = vmul.f32 0.5, %v4644_v9  ;;  %v4646_v15 = vadd.f32 %v4645_v23, %v4593_v39  ;;  %v4595_v10 = vadd.f32 %v4594_v62, %v3364_v50 }
 0x4ce   : > { %6996 = vtanh.f32 %v4975_v43  ;;  %v4981_v18 = vmul.f32 0.5, %v4646_v15  ;;  %v4648_v19 = vadd.f32 %v4647_v17, %v4595_v10 }
 0x4d0   : > { %6998 = vtanh.f32 %v4981_v18  ;;  %v4982_v20 = vmul.f32 0.5, %v4648_v19 }
 0x4d1   : > { %v6987_v21 = vpop.eup %6986 }
 0x4d2   : > { %v5016_v22 = vmul.f32 0.5, %v6987_v21  ;;  %7000 = vtanh.f32 %v4982_v20 }
 0x4d3   : > { %v6989_v12 = vpop.eup %6988 }
 0x4d4   : > { %v5017_v24 = vmul.f32 0.5, %v6989_v12  ;;  %v5044_v25 = vadd.f32 0.5, %v5016_v22 }
 0x4d5   : > { %v6991_v30 = vpop.eup %6990 }
 0x4d6   : > { %v5045_v26 = vadd.f32 0.5, %v5017_v24  ;;  %v5023_v7 = vmul.f32 0.5, %v6991_v30 }
 0x4d7   : > { %v6993_v31 = vpop.eup %6992 }
 0x4d8   : > { %v6021_v27 = vpack.c.bf16 %v5045_v26, %v5044_v25  ;;  %v5024_v28 = vmul.f32 0.5, %v6993_v31  ;;  %v5051_v32 = vadd.f32 0.5, %v5023_v7 }
 0x4d9   : > { %v6995_v29 = vpop.eup %6994 }
 0x4da   : > { %5217 = vst [vmem:[%s7869_s22] sm:$0xff] %v6021_v27  ;;  %v5052_v52 = vadd.f32 0.5, %v5024_v28  ;;  %v5030_v37 = vmul.f32 0.5, %v6995_v29 }
 0x4db   : > { %v6997_v35 = vpop.eup %6996 }
 0x4dc   : > { %v6025_v40 = vpack.c.bf16 %v5052_v52, %v5051_v32  ;;  %v5031_v42 = vmul.f32 0.5, %v6997_v35  ;;  %v5058_v54 = vadd.f32 0.5, %v5030_v37 }
 0x4dd   : > { %v6999_v50 = vpop.eup %6998 }
 0x4de   : > { %5221 = vst [vmem:[%s7869_s22 + $0x1c] sm:$0xff] %v6025_v40  ;;  %v5059_v36 = vadd.f32 0.5, %v5031_v42  ;;  %v5037_v44 = vmul.f32 0.5, %v6999_v50 }
 0x4df   : > { %v7001_v46 = vpop.eup %7000 }
 0x4e0   : > { %v6029_v38 = vpack.c.bf16 %v5059_v36, %v5058_v54  ;;  %v5038_v49 = vmul.f32 0.5, %v7001_v46  ;;  %v5065_v47 = vadd.f32 0.5, %v5037_v44 }
 0x4e2   : > { %5225 = vst [vmem:[%s7869_s22 + $0x38] sm:$0xff] %v6029_v38  ;;  %v5066_v45 = vadd.f32 0.5, %v5038_v49 }
 0x4e4   : > { %v6033_v48 = vpack.c.bf16 %v5066_v45, %v5065_v47 }
 0x4e6   : > { %5229 = vst [vmem:[%s7869_s22 + $0x54] sm:$0xff] %v6033_v48 }
 0x4fd   : > { %v4684_v56 = vpop.f32.mrf.mxu0  ;;  %v4737_v57 = vpop.f32.mrf.mxu1 }
 0x4fe   : > { %v4685_v58 = vadd.f32 %v4684_v56, %v3368_v51 }
 0x4ff   : > { %v4686_v60 = vpop.f32.mrf.mxu0  ;;  %v4739_v59 = vpop.f32.mrf.mxu1 }
 0x500   : > { %v4738_v61 = vadd.f32 %v4737_v57, %v4685_v58  ;;  %v4687_v63 = vadd.f32 %v4686_v60, %v3372_v55 }
 0x501   : > { %v4688_v13 = vpop.f32.mrf.mxu0  ;;  %v4741_v0 = vpop.f32.mrf.mxu1 }
 0x502   : > { %v4962_v1 = vmul.f32 0.5, %v4738_v61  ;;  %v4740_v2 = vadd.f32 %v4739_v59, %v4687_v63  ;;  %v4689_v3 = vadd.f32 %v4688_v13, %v3368_v51 }
 0x503   : > { %v4690_v14 = vpop.f32.mrf.mxu0  ;;  %v4743_v4 = vpop.f32.mrf.mxu1 }
 0x504   : > { %7002 = vtanh.f32 %v4962_v1  ;;  %v4963_v5 = vmul.f32 0.5, %v4740_v2  ;;  %v4742_v34 = vadd.f32 %v4741_v0, %v4689_v3  ;;  %v4691_v6 = vadd.f32 %v4690_v14, %v3372_v55 }
 0x505   : > { %v4694_v33 = vpop.f32.mrf.mxu0  ;;  %v4747_v16 = vpop.f32.mrf.mxu1 }
 0x506   : > { %7004 = vtanh.f32 %v4963_v5  ;;  %v4969_v23 = vmul.f32 0.5, %v4742_v34  ;;  %v4744_v8 = vadd.f32 %v4743_v4, %v4691_v6  ;;  %v4695_v9 = vadd.f32 %v4694_v33, %v3368_v51 }
 0x507   : > { %v4696_v39 = vpop.f32.mrf.mxu0  ;;  %v4749_v62 = vpop.f32.mrf.mxu1 }
 0x508   : > { %7006 = vtanh.f32 %v4969_v23  ;;  %v4970_v43 = vmul.f32 0.5, %v4744_v8  ;;  %v4748_v15 = vadd.f32 %v4747_v16, %v4695_v9  ;;  %v4697_v10 = vadd.f32 %v4696_v39, %v3372_v55 }
 0x509   : > { %v4698_v17 = vpop.f32.mrf.mxu0  ;;  %v4751_v18 = vpop.f32.mrf.mxu1 }
 0x50a   : > { %7008 = vtanh.f32 %v4970_v43  ;;  %v4976_v19 = vmul.f32 0.5, %v4748_v15  ;;  %v4750_v20 = vadd.f32 %v4749_v62, %v4697_v10  ;;  %v4699_v21 = vadd.f32 %v4698_v17, %v3368_v51 }
 0x50b   : > { %v4700_v22 = vpop.f32.mrf.mxu0  ;;  %v4753_v25 = vpop.f32.mrf.mxu1 }
 0x50c   : > { %7010 = vtanh.f32 %v4976_v19  ;;  %v4977_v12 = vmul.f32 0.5, %v4750_v20  ;;  %v4752_v24 = vadd.f32 %v4751_v18, %v4699_v21  ;;  %v4701_v30 = vadd.f32 %v4700_v22, %v3372_v55 }
 0x50e   : > { %7012 = vtanh.f32 %v4977_v12  ;;  %v4983_v26 = vmul.f32 0.5, %v4752_v24  ;;  %v4754_v7 = vadd.f32 %v4753_v25, %v4701_v30 }
 0x510   : > { %7014 = vtanh.f32 %v4983_v26  ;;  %v4984_v31 = vmul.f32 0.5, %v4754_v7 }
 0x511   : > { %7241 = shalt.err (!%p7238_p8)
}
 0x512   : > { %s7242_s15 = scalar_lea.hbm %s7886_s19, 1024  ;;  %s7246_s6 = scalar_lea.hbm %s7995_s11, 2048 }
 0x513   : > { %p7243_p3 = scmp.ne.s32.totalorder %s7886_s19, %s7242_s15  ;;  %p7247_p2 = scmp.lt.s32.totalorder %s7886_s19, %s7995_s11 }
 0x514   : > { %p7248_p10 = scmp.lt.s32.totalorder %s7246_s6, %s7242_s15 }
 0x515   : > { %p7244_p5 = pnand %p7243_p3, %p8035_p7 }
 0x516   : > { %p7249_p0 = por %p7248_p10, %p7247_p2 }
 0x517   : > { %p7245_p12 = pneg %p7244_p5 }
 0x519   : > { %p7250_p13 = pnand %p7249_p0, %p7245_p12 }
 0x51b   : > { %7253 = shalt.err (!%p7250_p13)
}
 0x51c   : > { %s7357_s26 = smov 256   ;;  %s7358_s14 = smov 16   ;;  %v7003_v27 = vpop.eup %7002  ;;  %7016 = vtanh.f32 %v4984_v31  ;;  %v3375_v13 = vsub.s32 4, %v7756_v11  ;;  %v3379_v0 = vsub.s32 5, %v7756_v11 }
 0x51d   : > { %6125 = dma.vmem_to_hbm [thread:$0]  (%p8035_p7), %s7881_s7, 1024, %s7886_s19, %s5247_s24, %s7357_s26, %s7357_s26, %s7358_s14   ;;  %v5018_v28 = vmul.f32 0.5, %v7003_v27  ;;  %v7005_v29 = vpop.eup %7004 }
 0x51e   : > { %v5019_v32 = vmul.f32 0.5, %v7005_v29  ;;  %v7007_v52 = vpop.eup %7006  ;;  %v3376_v1 = vrot.slane %v7862_v41, %v3375_v13  ;;  %v3380_v2 = vrot.slane %v7862_v41, %v3379_v0  ;;  %s6099_s7 = smul.u32 1792, %s7443_s23  ;;  %s5261_s2 = sshll.u32 %s7869_s22, 4  ;;  %s7940_s2 = int_to_ptr.vmem [resolvable:$true] %s5261_s2 }
 0x51f   : > { %v5046_v37 = vadd.f32 0.5, %v5018_v28  ;;  %v5025_v40 = vmul.f32 0.5, %v7007_v52  ;;  %v7009_v42 = vpop.eup %7008  ;;  %s5242_s29 = scalar_lea.sflag [#allocation4], %s7633_s28  ;;  %s7254_s23 = scalar_lea.vmem %s7940_s2, 1792 }
 0x520   : > { %v5047_v35 = vadd.f32 0.5, %v5019_v32  ;;  %v5026_v54 = vmul.f32 0.5, %v7009_v42  ;;  %v7011_v36 = vpop.eup %7010  ;;  %s7938_s24 = scalar_lea.hbm %s7994_s10, %s6099_s7  ;;  %p7255_p9 = scmp.ne.s32.totalorder %s7940_s2, %s7254_s23 }
 0x521   : > { %v5053_v44 = vadd.f32 0.5, %v5025_v40  ;;  %v5032_v38 = vmul.f32 0.5, %v7011_v36  ;;  %v7013_v49 = vpop.eup %7012  ;;  %s7359_s30 = smov [#allocation14]  }
 0x522   : > { %v6022_v50 = vpack.c.bf16 %v5047_v35, %v5046_v37  ;;  %v5054_v46 = vadd.f32 0.5, %v5026_v54  ;;  %v5033_v45 = vmul.f32 0.5, %v7013_v49  ;;  %v7015_v48 = vpop.eup %7014  ;;  %p7256_p11 = pnand %p7255_p9, %p8035_p7  ;;  %s7258_s27 = sshll.u32 %s7359_s30, 4  ;;  %s7259_s27 = int_to_ptr.vmem [resolvable:$false] %s7258_s27 }
 0x523   : > { %v5060_v51 = vadd.f32 0.5, %v5032_v38  ;;  %v5039_v56 = vmul.f32 0.5, %v7015_v48  ;;  %s7260_s12 = scalar_lea.vmem %s7259_s27, 3584  ;;  %p7261_p4 = scmp.lt.s32.totalorder %s7940_s2, %s7259_s27 }
 0x524   : > { %5218 = vst [vmem:[%s7869_s22 + $0x8] sm:$0xff] %v6022_v50  ;;  %v6026_v47 = vpack.c.bf16 %v5054_v46, %v5053_v44  ;;  %v5061_v55 = vadd.f32 0.5, %v5033_v45  ;;  %p7257_p1 = pneg %p7256_p11  ;;  %p7262_p6 = scmp.lt.s32.totalorder %s7260_s12, %s7254_s23 }
 0x525   : > { %v5067_v59 = vadd.f32 0.5, %v5039_v56 }
 0x526   : > { %5222 = vst [vmem:[%s7869_s22 + $0x24] sm:$0xff] %v6026_v47  ;;  %v6030_v58 = vpack.c.bf16 %v5061_v55, %v5060_v51  ;;  %p7263_p8 = por %p7262_p6, %p7261_p4 }
 0x528   : > { %5226 = vst [vmem:[%s7869_s22 + $0x40] sm:$0xff] %v6030_v58  ;;  %p7264_p3 = pnand %p7263_p8, %p7257_p1 }
 0x529   : > { %v7017_v57 = vpop.eup %7016 }
 0x52a   : > { %v5040_v60 = vmul.f32 0.5, %v7017_v57 }
 0x52c   : > { %v5068_v61 = vadd.f32 0.5, %v5040_v60 }
 0x52e   : > { %v6034_v63 = vpack.c.bf16 %v5068_v61, %v5067_v59 }
 0x530   : > { %5230 = vst [vmem:[%s7869_s22 + $0x5c] sm:$0xff] %v6034_v63  ;;  %v3383_v63 = vsub.s32 6, %v7756_v11 }
 0x53e   : > { %v4790_v3 = vpop.f32.mrf.mxu0  ;;  %v4843_v14 = vpop.f32.mrf.mxu1 }
 0x53f   : > { %v4791_v4 = vadd.f32 %v4790_v3, %v3376_v1 }
 0x540   : > { %v4792_v5 = vpop.f32.mrf.mxu0  ;;  %v4845_v34 = vpop.f32.mrf.mxu1 }
 0x541   : > { %v4844_v6 = vadd.f32 %v4843_v14, %v4791_v4  ;;  %v4793_v33 = vadd.f32 %v4792_v5, %v3380_v2 }
 0x542   : > { %v4794_v16 = vpop.f32.mrf.mxu0  ;;  %v4847_v23 = vpop.f32.mrf.mxu1 }
 0x543   : > { %v4964_v8 = vmul.f32 0.5, %v4844_v6  ;;  %v4846_v9 = vadd.f32 %v4845_v34, %v4793_v33  ;;  %v4795_v39 = vadd.f32 %v4794_v16, %v3376_v1  ;;  %v3384_v6 = vrot.slane %v7862_v41, %v3383_v63 }
 0x544   : > { %v4796_v62 = vpop.f32.mrf.mxu0  ;;  %v4849_v43 = vpop.f32.mrf.mxu1 }
 0x545   : > { %7018 = vtanh.f32 %v4964_v8  ;;  %v4965_v15 = vmul.f32 0.5, %v4846_v9  ;;  %v4848_v10 = vadd.f32 %v4847_v23, %v4795_v39  ;;  %v4797_v17 = vadd.f32 %v4796_v62, %v3380_v2 }
 0x546   : > { %v4800_v18 = vpop.f32.mrf.mxu0  ;;  %v4853_v19 = vpop.f32.mrf.mxu1 }
 0x547   : > { %7020 = vtanh.f32 %v4965_v15  ;;  %v4971_v20 = vmul.f32 0.5, %v4848_v10  ;;  %v4850_v21 = vadd.f32 %v4849_v43, %v4797_v17  ;;  %v4801_v22 = vadd.f32 %v4800_v18, %v3376_v1 }
 0x548   : > { %v4802_v12 = vpop.f32.mrf.mxu0  ;;  %v4855_v24 = vpop.f32.mrf.mxu1 }
 0x549   : > { %7022 = vtanh.f32 %v4971_v20  ;;  %v4972_v30 = vmul.f32 0.5, %v4850_v21  ;;  %v4854_v25 = vadd.f32 %v4853_v19, %v4801_v22  ;;  %v4803_v26 = vadd.f32 %v4802_v12, %v3380_v2 }
 0x54a   : > { %v4804_v7 = vpop.f32.mrf.mxu0  ;;  %v4857_v31 = vpop.f32.mrf.mxu1 }
 0x54b   : > { %7024 = vtanh.f32 %v4972_v30  ;;  %v4978_v27 = vmul.f32 0.5, %v4854_v25  ;;  %v4856_v28 = vadd.f32 %v4855_v24, %v4803_v26  ;;  %v4805_v29 = vadd.f32 %v4804_v7, %v3376_v1 }
 0x54c   : > { %v4806_v32 = vpop.f32.mrf.mxu0  ;;  %v4859_v40 = vpop.f32.mrf.mxu1 }
 0x54d   : > { %7026 = vtanh.f32 %v4978_v27  ;;  %v4979_v52 = vmul.f32 0.5, %v4856_v28  ;;  %v4858_v37 = vadd.f32 %v4857_v31, %v4805_v29  ;;  %v4807_v35 = vadd.f32 %v4806_v32, %v3380_v2 }
 0x54f   : > { %7028 = vtanh.f32 %v4979_v52  ;;  %v4985_v42 = vmul.f32 0.5, %v4858_v37  ;;  %v4860_v50 = vadd.f32 %v4859_v40, %v4807_v35 }
 0x551   : > { %7030 = vtanh.f32 %v4985_v42  ;;  %v4986_v54 = vmul.f32 0.5, %v4860_v50 }
 0x552   : > { %v7019_v36 = vpop.eup %7018 }
 0x553   : > { %v5020_v44 = vmul.f32 0.5, %v7019_v36  ;;  %7032 = vtanh.f32 %v4986_v54 }
 0x554   : > { %v7021_v46 = vpop.eup %7020 }
 0x555   : > { %v5021_v38 = vmul.f32 0.5, %v7021_v46  ;;  %v5048_v47 = vadd.f32 0.5, %v5020_v44  ;;  %v5073_v44 = vand.u32 127, %v772_v53 }
 0x556   : > { %v7023_v49 = vpop.eup %7022 }
 0x557   : > { %v5049_v45 = vadd.f32 0.5, %v5021_v38  ;;  %v5027_v48 = vmul.f32 0.5, %v7023_v49  ;;  %v5079_v49 = vadd.s32 768, %v5073_v44 }
 0x558   : > { %v7025_v51 = vpop.eup %7024 }
 0x559   : > { %v6023_v55 = vpack.c.bf16 %v5049_v45, %v5048_v47  ;;  %v5028_v56 = vmul.f32 0.5, %v7025_v51  ;;  %v5055_v58 = vadd.f32 0.5, %v5027_v48  ;;  %vm5086_vm1 = vcmp.lt.s32.totalorder %v5079_v49, 784 }
 0x55a   : > { %v7027_v57 = vpop.eup %7026 }
 0x55b   : > { %5219 = vst [vmem:[%s7869_s22 + $0x10] sm:$0xff] %v6023_v55  ;;  %v5056_v60 = vadd.f32 0.5, %v5028_v56  ;;  %v5034_v59 = vmul.f32 0.5, %v7027_v57 }
 0x55c   : > { %v7029_v61 = vpop.eup %7028 }
 0x55d   : > { %v6027_v13 = vpack.c.bf16 %v5056_v60, %v5055_v58  ;;  %v5035_v0 = vmul.f32 0.5, %v7029_v61  ;;  %v5062_v2 = vadd.f32 0.5, %v5034_v59 }
 0x55e   : > { %v7031_v1 = vpop.eup %7030 }
 0x55f   : > { %5223 = vst [vmem:[%s7869_s22 + $0x2c] sm:$0xff] %v6027_v13  ;;  %v5063_v3 = vadd.f32 0.5, %v5035_v0  ;;  %v5041_v14 = vmul.f32 0.5, %v7031_v1  ;;  %v6055_v4 = vpop.f32.mrf.mxu0  ;;  %v6083_v5 = vpop.f32.mrf.mxu1 }
 0x560   : > { %v7033_v34 = vpop.eup %7032 }
 0x561   : > { %v6031_v33 = vpack.c.bf16 %v5063_v3, %v5062_v2  ;;  %v5042_v16 = vmul.f32 0.5, %v7033_v34  ;;  %v6056_v23 = vpop.f32.mrf.mxu0  ;;  %v6084_v8 = vpop.f32.mrf.mxu1  ;;  %v5069_v11 = vadd.f32 0.5, %v5041_v14 }
 0x562   : > { %v6057_v9 = vadd.f32 %v6056_v23, %v6055_v4  ;;  %v6085_v10 = vadd.f32 %v6084_v8, %v6083_v5 }
 0x563   : > { %5227 = vst [vmem:[%s7869_s22 + $0x48] sm:$0xff] %v6031_v33  ;;  %v5070_v39 = vadd.f32 0.5, %v5042_v16  ;;  %v6058_v62 = vpop.f32.mrf.mxu0  ;;  %v6086_v43 = vpop.f32.mrf.mxu1 }
 0x564   : > { %v4897_v15 = vadd.f32 %v6057_v9, %v3384_v6 }
 0x565   : > { %v6035_v17 = vpack.c.bf16 %v5070_v39, %v5069_v11  ;;  %v6059_v18 = vpop.f32.mrf.mxu0  ;;  %v6087_v19 = vpop.f32.mrf.mxu1 }
 0x566   : > { %v4946_v20 = vadd.f32 %v6085_v10, %v4897_v15  ;;  %v6060_v21 = vadd.f32 %v6059_v18, %v6058_v62  ;;  %v6088_v30 = vadd.f32 %v6087_v19, %v6086_v43 }
 0x567   : > { %5231 = vst [vmem:[%s7869_s22 + $0x64] sm:$0xff] %v6035_v17  ;;  %v6061_v41 = vpop.f32.mrf.mxu0  ;;  %v6089_v22 = vpop.f32.mrf.mxu1 }
 0x568   : > { %v4966_v12 = vmul.f32 0.5, %v4946_v20  ;;  %v4900_v24 = vadd.f32 %v6060_v21, %v3384_v6 }
 0x569   : > { %v6062_v25 = vpop.f32.mrf.mxu0  ;;  %v6090_v26 = vpop.f32.mrf.mxu1 }
 0x56a   : > { %7034 = vtanh.f32 %v4966_v12  ;;  %v4949_v7 = vadd.f32 %v6088_v30, %v4900_v24  ;;  %v6063_v31 = vadd.f32 %v6062_v25, %v6061_v41  ;;  %v6091_v52 = vadd.f32 %v6090_v26, %v6089_v22 }
 0x56b   : > { %v6064_v27 = vpop.f32.mrf.mxu0  ;;  %v6092_v28 = vpop.f32.mrf.mxu1 }
 0x56c   : > { %v4973_v29 = vmul.f32 0.5, %v4949_v7  ;;  %v4905_v32 = vadd.f32 %v6063_v31, %v3384_v6 }
 0x56d   : > { %v6065_v37 = vpop.f32.mrf.mxu0  ;;  %v6093_v35 = vpop.f32.mrf.mxu1 }
 0x56e   : > { %7036 = vtanh.f32 %v4973_v29  ;;  %v4954_v40 = vadd.f32 %v6091_v52, %v4905_v32  ;;  %v6066_v42 = vadd.f32 %v6065_v37, %v6064_v27  ;;  %v6094_v36 = vadd.f32 %v6093_v35, %v6092_v28 }
 0x570   : > { %v4980_v50 = vmul.f32 0.5, %v4954_v40  ;;  %v4908_v54 = vadd.f32 %v6066_v42, %v3384_v6 }
 0x572   : > { %7038 = vtanh.f32 %v4980_v50  ;;  %v4957_v46 = vadd.f32 %v6094_v36, %v4908_v54 }
 0x574   : > { %v4987_v38 = vmul.f32 0.5, %v4957_v46 }
 0x576   : > { %7040 = vtanh.f32 %v4987_v38 }
 0x577   : > { %v7035_v47 = vpop.eup %7034 }
 0x578   : > { %v5022_v45 = vmul.f32 0.5, %v7035_v47 }
 0x57a   : > { %v5050_v48 = vadd.f32 0.5, %v5022_v45 }
 0x57b   : > { %v7037_v51 = vpop.eup %7036 }
 0x57c   : > { %v5107_v55 = vsel %vm5086_vm1, %v5050_v48, 0.0  ;;  %v5029_v56 = vmul.f32 0.5, %v7037_v51 }
 0x57d   : > { %v6024_v57 = vpack.c.bf16 %v5107_v55, %v5107_v55 }
 0x57e   : > { %v5057_v53 = vadd.f32 0.5, %v5029_v56 }
 0x57f   : > { %v7039_v58 = vpop.eup %7038  ;;  %5220 = vst [vmem:[%s7869_s22 + $0x18] sm:$0xf] %v6024_v57 }
 0x580   : > { %v5114_v60 = vsel %vm5086_vm1, %v5057_v53, 0.0  ;;  %v5036_v59 = vmul.f32 0.5, %v7039_v58 }
 0x581   : > { %v6028_v61 = vpack.c.bf16 %v5114_v60, %v5114_v60 }
 0x582   : > { %v5064_v63 = vadd.f32 0.5, %v5036_v59 }
 0x583   : > { %v7041_v13 = vpop.eup %7040  ;;  %5224 = vst [vmem:[%s7869_s22 + $0x34] sm:$0xf] %v6028_v61 }
 0x584   : > { %v5121_v0 = vsel %vm5086_vm1, %v5064_v63, 0.0  ;;  %v5043_v1 = vmul.f32 0.5, %v7041_v13 }
 0x585   : > { %v6032_v2 = vpack.c.bf16 %v5121_v0, %v5121_v0 }
 0x586   : > { %v5071_v3 = vadd.f32 0.5, %v5043_v1 }
 0x587   : > { %5228 = vst [vmem:[%s7869_s22 + $0x50] sm:$0xf] %v6032_v2 }
 0x588   : > { %v5128_v14 = vsel %vm5086_vm1, %v5071_v3, 0.0 }
 0x589   : > { %v6036_v4 = vpack.c.bf16 %v5128_v14, %v5128_v14 }
 0x58b   : > { %5232 = vst [vmem:[%s7869_s22 + $0x6c] sm:$0xf] %v6036_v4 }
 0x58c   : > { %7267 = shalt.err (!%p7264_p3)
}
 0x58d   : > { %s7268_s22 = scalar_lea.hbm %s7938_s24, 1792  ;;  %s7272_s0 = scalar_lea.hbm %s7994_s10, 3584 }
 0x58e   : > { %p7269_p5 = scmp.ne.s32.totalorder %s7938_s24, %s7268_s22  ;;  %p7273_p10 = scmp.lt.s32.totalorder %s7938_s24, %s7994_s10 }
 0x58f   : > { %p7274_p0 = scmp.lt.s32.totalorder %s7272_s0, %s7268_s22 }
 0x590   : > { %p7270_p12 = pnand %p7269_p5, %p8035_p7 }
 0x591   : > { %p7275_p13 = por %p7274_p0, %p7273_p10 }
 0x592   : > { %p7271_p2 = pneg %p7270_p12 }
 0x594   : > { %p7276_p9 = pnand %p7275_p13, %p7271_p2 }
 0x596   : > { %7279 = shalt.err (!%p7276_p9)
}
 0x597   : > { %s7360_s13 = smov 448   ;;  %s7361_s26 = smov 28  }
 0x598   : > { %6124 = dma.vmem_to_hbm [thread:$0]  (%p8035_p7), %s7940_s2, 1792, %s7938_s24, %s5242_s29, %s7360_s13, %s7360_s13, %s7361_s26  }
 0x599 PF: > { %s5293_s14 = sand.u32 1, %s7326_s17   ;;  %p8036_p11 = scmp.ne.s32.totalorder %s8023_s16, 0 }
 0x59a   : > { %p8037_p1 = scmp.ge.s32.totalorder %s7338_s20, 2  ;;  %s5294_s7 = scalar_lea.sflag [#allocation4], %s5293_s14 }
 0x59c   : > { %p6152_p4 = pnand %p8037_p1, %p8036_p11 }
 0x59e   : > { %p6153_p6 = pneg %p6152_p4 }
 0x5a0   : > { %7317 = dma.done.wait (%p6153_p6), %s5294_s7, 1792  }
 0x5a1   : > { %7319 = vsyncadd (%p6153_p6), %s5294_s7, 4294965504  ;;  %s5303_s4 = scalar_lea.sflag [#allocation16], %s5293_s14 }
 0x5a2   : > { %7321 = dma.done.wait (%p6153_p6), %s5303_s4, 1024  }
 0x5a3   : > { %7323 = vsyncadd (%p6153_p6), %s5303_s4, 4294966272  ;;  %s8038_s20 = sld [smem:[#allocation25_spill]]  ;;  %s8041_s17 = smov %s7330_s18 }
 0x5a4   : > { %s8039_s25 = sld [smem:[#allocation24_spill]] }
 0x5a5   : > { %s8040_s19 = sld [smem:[#allocation26_spill]] }
 0x5a9   : > { %p33_p7 = scmp.ge.s32.totalorder %s8038_s20, 4  }
 0x5aa   : > { %s8042_s18 = smov %s8039_s25 }
 0x5ab   :  { %35 = sbr.rel (!%p33_p7) target bundleno = 18 (0x12), region = 155 }
 0x5b0   :  { %5308 = vsyncpa [#allocation3], 1 }
 0x5b1   :  { %5310 = vsyncpa [#allocation3 + $0x1], 1 }
 0x5b2   :  { %5311 = vsyncpa [#allocation6], 1 }
 0x5b3   :  { %5313 = vsyncpa [#allocation6 + $0x1], 1 }
 0x5b4   :  { %5314 = vsyncpa [#allocation9], 1 }
 0x5b5   :  { %5315 = vsyncpa [#allocation12], 1 }
 0x5b6   :  { %5316 = vsyncpa [#allocation4], 1 }
 0x5b7   :  { %5318 = vsyncpa [#allocation4 + $0x1], 1 }
 0x5b8   :  { %5319 = vsyncpa [#allocation16], 1 }
 0x5b9   :  { %5321 = vsyncpa [#allocation16 + $0x1], 1 }

</bundles_post_ra>
